<compile_context>
chip_gen: v5e
topology: v5e:2x2
jax: 0.10.0
libtpu: 0.0.40
codegen_flags: <defaults>
</compile_context>

<pallas_src>
import functools
import math

import jax
import jax.numpy as jnp
from jax.experimental import pallas as pl
from jax.experimental.pallas import tpu as pltpu


# ---------------------------------------------------------------------------
# small helpers
# ---------------------------------------------------------------------------

def _round_up(x, m):
    return ((x + m - 1) // m) * m


def _pick_tile(dim, candidates):
    for c in candidates:
        if dim % c == 0:
            return c
    return dim


@functools.lru_cache(maxsize=None)
def _vmem_limit_bytes():
    """Generation-aware VMEM budget: physical capacity minus pipeline headroom."""
    cap = 64 * 1024 * 1024  # conservative default (v7x per-core VMEM)
    try:
        cap = int(getattr(pltpu.get_tpu_info(), "vmem_capacity_bytes", cap))
    except Exception:
        pass
    # v7x (64 MiB)  -> ~46 MiB ; v5e/v6e (128 MiB) -> ~110 MiB
    return int(min(max(cap - 18 * 1024 * 1024, 32 * 1024 * 1024),
                   112 * 1024 * 1024))


def _pad2(a, rows, cols):
    r, c = a.shape
    return jnp.pad(a, ((0, rows - r), (0, cols - c)))


def _pad1(a, n):
    return jnp.pad(a, ((0, n - a.shape[0]),))


def _scatter_head_cols(w, num_heads, dh, dhp, rows_p):
    """(E_in, H*dh) weight -> (rows_p, H*dhp), head h at cols [h*dhp, h*dhp+dh)."""
    e_in, _ = w.shape
    out = jnp.zeros((rows_p, num_heads * dhp), w.dtype)
    for h in range(num_heads):
        out = out.at[:e_in, h * dhp:h * dhp + dh].set(w[:, h * dh:(h + 1) * dh])
    return out


def _scatter_head_bias(b, num_heads, dh, dhp):
    out = jnp.zeros((num_heads * dhp,), b.dtype)
    for h in range(num_heads):
        out = out.at[h * dhp:h * dhp + dh].set(b[h * dh:(h + 1) * dh])
    return out


def _scatter_head_rows(w, num_heads, dh, dhp, cols_p):
    """(H*dh, E_out) weight -> (H*dhp, cols_p), head h at rows [h*dhp, h*dhp+dh)."""
    _, e_out = w.shape
    out = jnp.zeros((num_heads * dhp, cols_p), w.dtype)
    for h in range(num_heads):
        out = out.at[h * dhp:h * dhp + dh, :e_out].set(w[h * dh:(h + 1) * dh, :])
    return out


# ---------------------------------------------------------------------------
# Pallas kernels
# ---------------------------------------------------------------------------

def _matmul_kernel(x_ref, w_ref, b_ref, o_ref, acc_ref, *, relu):
    """Tiled matmul with f32 accumulator; bias (+ optional ReLU) epilogue."""
    @pl.when(pl.program_id(2) == 0)
    def _init():
        acc_ref[...] = jnp.zeros_like(acc_ref)

    acc_ref[...] += jnp.dot(x_ref[...], w_ref[...],
                            preferred_element_type=jnp.float32)

    @pl.when(pl.program_id(2) == pl.num_programs(2) - 1)
    def _fin():
        y = acc_ref[...] + b_ref[...]
        if relu:
            y = jnp.maximum(y, 0.0)
        o_ref[...] = y.astype(o_ref.dtype)


def pallas_linear(x, w, b, *, relu=False, out_dtype=jnp.bfloat16):
    """x:(M,K) bf16 @ w:(K,N) bf16 + b:(N,) f32 -> (M,N).  K,N % 128 == 0."""
    M, K = x.shape
    _, N = w.shape
    Mp = _round_up(max(M, 8), 8)
    if Mp != M:  # safety net — callers keep M 8-aligned so this never fires
        x = jnp.pad(x, ((0, Mp - M), (0, 0)))
    tm = _pick_tile(Mp, (512, 256, 128, 64, 32, 16, 8))
    tn = _pick_tile(N, (1024, 512, 256, 128))
    tk = _pick_tile(K, (1024, 512, 256, 128))
    b2 = b.reshape(1, N).astype(jnp.float32)
    out = pl.pallas_call(
        functools.partial(_matmul_kernel, relu=relu),
        out_shape=jax.ShapeDtypeStruct((Mp, N), out_dtype),
        grid=(Mp // tm, N // tn, K // tk),
        in_specs=[
            pl.BlockSpec((tm, tk), lambda i, j, k: (i, k)),
            pl.BlockSpec((tk, tn), lambda i, j, k: (k, j)),
            pl.BlockSpec((1, tn), lambda i, j, k: (0, j)),
        ],
        out_specs=pl.BlockSpec((tm, tn), lambda i, j, k: (i, j)),
        scratch_shapes=[pltpu.VMEM((tm, tn), jnp.float32)],
        compiler_params=pltpu.CompilerParams(
            dimension_semantics=("parallel", "parallel", "arbitrary"),
            vmem_limit_bytes=_vmem_limit_bytes()),
    )(x, w, b2)
    return out[:M] if Mp != M else out


def _matmul_add_ln_kernel(x_ref, w_ref, b_ref, r_ref, g_ref, bb_ref,
                          o_ref, acc_ref, *, d_real, eps):
    """Tiled matmul + bias, then fused residual-add + LayerNorm epilogue.

    Padded feature columns (>= d_real) of the matmul output, bias and residual
    are all exactly zero by construction; variance is computed from centered
    values masked to the real width (numerically safer than E[x^2]-mu^2).
    """
    @pl.when(pl.program_id(1) == 0)
    def _init():
        acc_ref[...] = jnp.zeros_like(acc_ref)

    acc_ref[...] += jnp.dot(x_ref[...], w_ref[...],
                            preferred_element_type=jnp.float32)

    @pl.when(pl.program_id(1) == pl.num_programs(1) - 1)
    def _fin():
        h = acc_ref[...] + b_ref[...] + r_ref[...].astype(jnp.float32)
        n_cols = h.shape[-1]
        inv_d = 1.0 / d_real
        mu = jnp.sum(h, axis=-1, keepdims=True) * inv_d
        diff = h - mu
        if d_real < n_cols:
            colmask = jax.lax.broadcasted_iota(jnp.int32, (1, n_cols), 1) < d_real
            diff = jnp.where(colmask, diff, 0.0)
        var = jnp.sum(diff * diff, axis=-1, keepdims=True) * inv_d
        y = diff * jax.lax.rsqrt(var + eps)
        o_ref[...] = (y * g_ref[...] + bb_ref[...]).astype(o_ref.dtype)


def pallas_linear_add_ln(x, w, b, resid, gamma, beta, *, d_real, eps=1e-5,
                         out_dtype=jnp.bfloat16):
    """LayerNorm(x @ w + b + resid) with stats over the first d_real cols."""
    M, K = x.shape
    _, N = w.shape
    tm = _pick_tile(M, (512, 256, 128, 64, 32, 16, 8))
    # keep the double-buffered (tk, N) weight block under ~8 MiB
    tk_cands = tuple(c for c in (1024, 512, 256, 128)
                     if c * N * 2 * 2 <= 8 * 1024 * 1024) or (128,)
    tk = _pick_tile(K, tk_cands)
    b2 = b.reshape(1, N).astype(jnp.float32)
    g2 = gamma.reshape(1, N).astype(jnp.float32)
    bb2 = beta.reshape(1, N).astype(jnp.float32)
    return pl.pallas_call(
        functools.partial(_matmul_add_ln_kernel, d_real=d_real, eps=eps),
        out_shape=jax.ShapeDtypeStruct((M, N), out_dtype),
        grid=(M // tm, K // tk),
        in_specs=[
            pl.BlockSpec((tm, tk), lambda i, k: (i, k)),
            pl.BlockSpec((tk, N), lambda i, k: (k, 0)),
            pl.BlockSpec((1, N), lambda i, k: (0, 0)),
            pl.BlockSpec((tm, N), lambda i, k: (i, 0)),
            pl.BlockSpec((1, N), lambda i, k: (0, 0)),
            pl.BlockSpec((1, N), lambda i, k: (0, 0)),
        ],
        out_specs=pl.BlockSpec((tm, N), lambda i, k: (i, 0)),
        scratch_shapes=[pltpu.VMEM((tm, N), jnp.float32)],
        compiler_params=pltpu.CompilerParams(
            dimension_semantics=("parallel", "arbitrary"),
            vmem_limit_bytes=_vmem_limit_bytes()),
    )(x, w, b2, resid, g2, bb2)


def _flash_attn_kernel(q_ref, k_ref, v_ref, o_ref, m_sc, l_sc, acc_sc,
                       *, s_real, s_pad, tk):
    """Flash-style cross-attention for one (batch, head, q-tile); kv-tile loop
    is the innermost grid axis.  All blocks are 128-lane aligned (Dhp)."""
    ki = pl.program_id(3)

    @pl.when(ki == 0)
    def _init():
        m_sc[...] = jnp.full(m_sc.shape, -jnp.inf, m_sc.dtype)
        l_sc[...] = jnp.zeros_like(l_sc)
        acc_sc[...] = jnp.zeros_like(acc_sc)

    q = q_ref[0]   # (tq, Dhp) bf16, 1/sqrt(Dh) already folded into the weights
    k = k_ref[0]   # (tk, Dhp) bf16
    v = v_ref[0]   # (tk, Dhp) bf16

    s = jax.lax.dot_general(q, k, (((1,), (1,)), ((), ())),
                            preferred_element_type=jnp.float32)  # (tq, tk)
    if s_pad > s_real:  # mask only the Sp-padding key rows (static check)
        kpos = ki * tk + jax.lax.broadcasted_iota(jnp.int32, (1, tk), 1)
        s = s + jnp.where(kpos < s_real, 0.0, -1e30)

    m_prev = m_sc[...]
    m_new = jnp.maximum(m_prev, jnp.max(s, axis=-1, keepdims=True))
    alpha = jnp.exp(m_prev - m_new)
    p = jnp.exp(s - m_new)
    l_sc[...] = alpha * l_sc[...] + jnp.sum(p, axis=-1, keepdims=True)
    acc_sc[...] = alpha * acc_sc[...] + jnp.dot(
        p.astype(jnp.bfloat16), v, preferred_element_type=jnp.float32)
    m_sc[...] = m_new

    @pl.when(ki == pl.num_programs(3) - 1)
    def _fin():
        o_ref[0] = (acc_sc[...] *
                    pl.reciprocal(l_sc[...], approx=True)).astype(o_ref.dtype)


def pallas_cross_attention(q3, kv_all3, *, layer_idx, num_heads, dhp, s_real):
    """q3: (B, Sp, H*Dhp); kv_all3: (B, Sp, 2*H*Dhp*num_layers) -> (B, Sp, H*Dhp).

    The layer's K/V column blocks are selected directly by the index_map, so no
    JAX-level slice/copy of the fused KV activation is needed.
    """
    B, Sp, Hq = q3.shape
    tq = _pick_tile(Sp, (256, 128, 64, 32, 16, 8))
    tk = _pick_tile(Sp, (512, 256, 128, 64, 32, 16, 8))
    k_base = layer_idx * 2 * num_heads
    v_base = k_base + num_heads
    return pl.pallas_call(
        functools.partial(_flash_attn_kernel, s_real=s_real, s_pad=Sp, tk=tk),
        out_shape=jax.ShapeDtypeStruct((B, Sp, Hq), jnp.bfloat16),
        grid=(B, num_heads, Sp // tq, Sp // tk),
        in_specs=[
            pl.BlockSpec((1, tq, dhp), lambda b, h, qi, ki: (b, qi, h)),
            pl.BlockSpec((1, tk, dhp), lambda b, h, qi, ki: (b, ki, k_base + h)),
            pl.BlockSpec((1, tk, dhp), lambda b, h, qi, ki: (b, ki, v_base + h)),
        ],
        out_specs=pl.BlockSpec((1, tq, dhp), lambda b, h, qi, ki: (b, qi, h)),
        scratch_shapes=[
            pltpu.VMEM((tq, 1), jnp.float32),
            pltpu.VMEM((tq, 1), jnp.float32),
            pltpu.VMEM((tq, dhp), jnp.float32),
        ],
        compiler_params=pltpu.CompilerParams(
            dimension_semantics=("parallel", "parallel", "parallel", "arbitrary"),
            vmem_limit_bytes=_vmem_limit_bytes()),
    )(q3, kv_all3, kv_all3)


# ---------------------------------------------------------------------------
# Parameter setup (raw f32 params -> padded / bf16 device params)
# ---------------------------------------------------------------------------

def init_decoder_params(key, vocab_size, embed_size, num_heads,
                        forward_expansion, num_layers, latent_dim):
    ks = jax.random.split(key, 4 + num_layers)
    w = lambda k, shape: (0.02 * jax.random.normal(k, shape)).astype(jnp.float32)
    params = {
        "embed": w(ks[0], (vocab_size, embed_size)),
        "from_latent_w": w(ks[1], (latent_dim, embed_size)),
        "from_latent_b": jnp.zeros((embed_size,), jnp.float32),
        "to_tokens_w": w(ks[2], (embed_size, vocab_size)),
        "to_tokens_b": jnp.zeros((vocab_size,), jnp.float32),
        "layers": [],
    }
    hidden = forward_expansion * embed_size
    for li in range(num_layers):
        lk = jax.random.split(ks[4 + li], 6)
        params["layers"].append({
            "wq": w(lk[0], (embed_size, embed_size)), "bq": jnp.zeros((embed_size,), jnp.float32),
            "wk": w(lk[1], (embed_size, embed_size)), "bk": jnp.zeros((embed_size,), jnp.float32),
            "wv": w(lk[2], (embed_size, embed_size)), "bv": jnp.zeros((embed_size,), jnp.float32),
            "wo": w(lk[3], (embed_size, embed_size)), "bo": jnp.zeros((embed_size,), jnp.float32),
            "ln1_g": jnp.ones((embed_size,), jnp.float32), "ln1_b": jnp.zeros((embed_size,), jnp.float32),
            "ff1_w": w(lk[4], (embed_size, hidden)), "ff1_b": jnp.zeros((hidden,), jnp.float32),
            "ff2_w": w(lk[5], (hidden, embed_size)), "ff2_b": jnp.zeros((embed_size,), jnp.float32),
            "ln2_g": jnp.ones((embed_size,), jnp.float32), "ln2_b": jnp.zeros((embed_size,), jnp.float32),
        })
    return params


def prepare_padded_params(p, *, vocab_size, embed_size, num_heads,
                          forward_expansion, latent_dim):
    """Zero-pad feature dims to 128 multiples, pad per-head dims to 128 (lane
    alignment), fold the attention scale into wq/bq, fuse the K/V projections
    of ALL layers into one weight, cast matmul weights to bf16.  Off hot path."""
    E, H = embed_size, num_heads
    dh = E // H
    dhp = _round_up(dh, 128)
    Ep = _round_up(E, 128)
    Vp = _round_up(vocab_size, 128)
    Lp = _round_up(latent_dim, 128)
    Hp = _round_up(forward_expansion * E, 128)
    bf = jnp.bfloat16
    scale = 1.0 / math.sqrt(dh)
    out = {
        "embed": _pad2(p["embed"], vocab_size, Ep).astype(bf),
        "from_latent_w": _pad2(p["from_latent_w"], Lp, Ep).astype(bf),
        "from_latent_b": _pad1(p["from_latent_b"], Ep).astype(jnp.float32),
        "to_tokens_w": _pad2(p["to_tokens_w"], Ep, Vp).astype(bf),
        "to_tokens_b": _pad1(p["to_tokens_b"], Vp).astype(jnp.float32),
        "layers": [],
    }
    wkv_cols, bkv_parts = [], []
    for lp in p["layers"]:
        wq = _scatter_head_cols(lp["wq"] * scale, H, dh, dhp, Ep).astype(bf)
        bq = _scatter_head_bias(lp["bq"] * scale, H, dh, dhp).astype(jnp.float32)
        wk = _scatter_head_cols(lp["wk"], H, dh, dhp, Ep)
        wv = _scatter_head_cols(lp["wv"], H, dh, dhp, Ep)
        bk = _scatter_head_bias(lp["bk"], H, dh, dhp)
        bv = _scatter_head_bias(lp["bv"], H, dh, dhp)
        wkv_cols.append(jnp.concatenate([wk, wv], axis=1).astype(bf))
        bkv_parts.append(jnp.concatenate([bk, bv]))
        wo = _scatter_head_rows(lp["wo"], H, dh, dhp, Ep).astype(bf)
        out["layers"].append({
            "wq": wq, "bq": bq,
            "wo": wo, "bo": _pad1(lp["bo"], Ep).astype(jnp.float32),
            "ln1_g": _pad1(lp["ln1_g"], Ep), "ln1_b": _pad1(lp["ln1_b"], Ep),
            "ff1_w": _pad2(lp["ff1_w"], Ep, Hp).astype(bf),
            "ff1_b": _pad1(lp["ff1_b"], Hp).astype(jnp.float32),
            "ff2_w": _pad2(lp["ff2_w"], Hp, Ep).astype(bf),
            "ff2_b": _pad1(lp["ff2_b"], Ep).astype(jnp.float32),
            "ln2_g": _pad1(lp["ln2_g"], Ep), "ln2_b": _pad1(lp["ln2_b"], Ep),
        })
    out["wkv_all"] = jnp.concatenate(wkv_cols, axis=1)          # (Ep, 2*H*dhp*L)
    out["bkv_all"] = jnp.concatenate(bkv_parts).astype(jnp.float32)
    return out


# ---------------------------------------------------------------------------
# Forward pass
# ---------------------------------------------------------------------------

def decoder_layer_forward(x3, kv_all3, p, *, layer_idx, num_heads, embed_size,
                          seq_len, dhp):
    B, Sp, Ep = x3.shape
    hq = num_heads * dhp
    x2 = x3.reshape(B * Sp, Ep)

    q = pallas_linear(x2, p["wq"], p["bq"])                     # (M, H*Dhp)
    attn3 = pallas_cross_attention(q.reshape(B, Sp, hq), kv_all3,
                                   layer_idx=layer_idx, num_heads=num_heads,
                                   dhp=dhp, s_real=seq_len)
    attn2 = attn3.reshape(B * Sp, hq)

    # output projection with fused residual-add + LayerNorm epilogue
    x1 = pallas_linear_add_ln(attn2, p["wo"], p["bo"], x2,
                              p["ln1_g"], p["ln1_b"], d_real=embed_size)

    ff = pallas_linear(x1, p["ff1_w"], p["ff1_b"], relu=True)
    x_out = pallas_linear_add_ln(ff, p["ff2_w"], p["ff2_b"], x1,
                                 p["ln2_g"], p["ln2_b"], d_real=embed_size)
    return x_out.reshape(B, Sp, Ep)


def decoder_forward(params, tokens, encoder_out, *, num_heads, embed_size,
                    vocab_size, attention_mask=None):
    # TODO(synk): attention_mask (src_mask) support; reference is called with None.
    B, S = tokens.shape
    Ep = params["embed"].shape[1]
    Sp = _round_up(S, 8)
    dh = embed_size // num_heads
    dhp = _round_up(dh, 128)

    # Embedding lookup (gather) — glue in plain JAX. Dropout: eval => identity.
    x = jnp.take(params["embed"], tokens, axis=0)               # (B, S, Ep) bf16
    if Sp != S:
        x = jnp.pad(x, ((0, 0), (0, Sp - S), (0, 0)))

    # from_latent projection (rows pre-padded to 8 so no pad on the hot path).
    Be, Se, L = encoder_out.shape
    Lp = params["from_latent_w"].shape[0]
    Se8 = _round_up(max(Se, 1), 8)
    enc_in = encoder_out.astype(jnp.bfloat16)
    if Se8 != Se or Lp != L:
        enc_in = jnp.pad(enc_in, ((0, 0), (0, Se8 - Se), (0, Lp - L)))
    enc = pallas_linear(enc_in.reshape(Be * Se8, Lp),
                        params["from_latent_w"], params["from_latent_b"])
    enc = enc.reshape(Be, Se8, Ep)

    # F.pad / slice semantics: keep min(Se, S) rows, zero-pad up to Sp
    # (rows in [S, Sp) are masked inside the attention kernel).
    keep = min(Se, S)
    enc = enc[:, :keep, :]
    if keep < Sp:
        enc = jnp.pad(enc, ((0, 0), (0, Sp - keep), (0, 0)))

    # Fused K/V projection for ALL layers in one matmul (enc is layer-invariant).
    kv_all = pallas_linear(enc.reshape(B * Sp, Ep),
                           params["wkv_all"], params["bkv_all"])
    kv_all3 = kv_all.reshape(B, Sp, -1)                         # (B, Sp, 2*H*Dhp*L)

    for li, lp in enumerate(params["layers"]):
        x = decoder_layer_forward(x, kv_all3, lp, layer_idx=li,
                                  num_heads=num_heads, embed_size=embed_size,
                                  seq_len=S, dhp=dhp)

    logits = pallas_linear(x.reshape(B * Sp, Ep), params["to_tokens_w"],
                           params["to_tokens_b"])               # bf16 writeback
    logits = logits.reshape(B, Sp, -1)[:, :S, :vocab_size].astype(jnp.float32)
    assert logits.shape == (B, S, vocab_size)
    return logits


if __name__ == "__main__":
    vocab_size, embed_size, num_heads = 50, 32, 4
    forward_expansion, num_layers, latent_dim = 2, 2, 16
    B, S, enc_S = 2, 10, 6  # enc_S < S and S % 8 != 0 exercise pad + mask paths

    key = jax.random.PRNGKey(0)
    pkey, tkey, ekey = jax.random.split(key, 3)

    raw_params = init_decoder_params(pkey, vocab_size, embed_size, num_heads,
                                     forward_expansion, num_layers, latent_dim)
    params = prepare_padded_params(raw_params, vocab_size=vocab_size,
                                   embed_size=embed_size, num_heads=num_heads,
                                   forward_expansion=forward_expansion,
                                   latent_dim=latent_dim)

    tokens = jax.random.randint(tkey, (B, S), 0, vocab_size, dtype=jnp.int32)
    encoder_out = jax.random.normal(ekey, (B, enc_S, latent_dim), dtype=jnp.float32)

    fwd = jax.jit(functools.partial(decoder_forward, num_heads=num_heads,
                                    embed_size=embed_size, vocab_size=vocab_size))
    out = fwd(params, tokens, encoder_out)
    jax.block_until_ready(out)
    assert out.shape == (B, S, vocab_size)
    assert bool(jnp.all(jnp.isfinite(out)))
    print("KERNEL_OK")
</pallas_src>

<mosaic_0001>
module attributes {stable_mosaic.version = 11 : i64} {
  func.func @_matmul_kernel(%arg0: i32, %arg1: i32, %arg2: i32, %arg3: memref<32x128xbf16, #tpu.memory_space<vmem>>, %arg4: memref<128x512xbf16, #tpu.memory_space<vmem>>, %arg5: memref<1x512xf32, #tpu.memory_space<vmem>>, %arg6: memref<32x512xbf16, #tpu.memory_space<vmem>>, %arg7: memref<32x512xf32, #tpu.memory_space<vmem>>) attributes {dimension_semantics = [#tpu.dimension_semantics<parallel>, #tpu.dimension_semantics<parallel>, #tpu.dimension_semantics<arbitrary>], iteration_bounds = array<i64: 1, 1, 1>, scalar_prefetch = 0 : i64, scratch_operands = 1 : i64, tpu.core_type = #tpu.core_type<tc>, window_params = [{transform_indices = @transform_0, window_bounds = array<i64: 32, 128>}, {transform_indices = @transform_1, window_bounds = array<i64: 128, 512>}, {transform_indices = @transform_2, window_bounds = array<i64: 1, 512>}, {transform_indices = @transform_3, window_bounds = array<i64: 32, 512>}]} {
    %c0_i32 = arith.constant 0 : i32
    %0 = arith.cmpi eq, %arg2, %c0_i32 : i32
    %1 = arith.extui %0 : i1 to i32
    %c0_i32_0 = arith.constant 0 : i32
    %2 = arith.cmpi ne, %1, %c0_i32_0 : i32
    scf.if %2 {
      %cst_10 = arith.constant 0.000000e+00 : f32
      %12 = vector.broadcast %cst_10 : f32 to vector<32x512xf32>
      %c0_11 = arith.constant 0 : index
      %c0_12 = arith.constant 0 : index
      %13 = vector.load %arg7[%c0_11, %c0_12] : memref<32x512xf32, #tpu.memory_space<vmem>>, vector<32x512xf32>
      tpu.vector_store %arg7[%c0_11, %c0_12], %12 {strides = array<i32>} : memref<32x512xf32, #tpu.memory_space<vmem>>, vector<32x512xf32>,
    } else {
    }
    %c0 = arith.constant 0 : index
    %c0_1 = arith.constant 0 : index
    %3 = vector.load %arg7[%c0, %c0_1] : memref<32x512xf32, #tpu.memory_space<vmem>>, vector<32x512xf32>
    %c0_2 = arith.constant 0 : index
    %c0_3 = arith.constant 0 : index
    %4 = vector.load %arg3[%c0_2, %c0_3] : memref<32x128xbf16, #tpu.memory_space<vmem>>, vector<32x128xbf16>
    %c0_4 = arith.constant 0 : index
    %c0_5 = arith.constant 0 : index
    %5 = vector.load %arg4[%c0_4, %c0_5] : memref<128x512xbf16, #tpu.memory_space<vmem>>, vector<128x512xbf16>
    %cst = arith.constant dense<0.000000e+00> : vector<32x512xf32>
    %6 = tpu.matmul %4, %5, %cst {dimension_numbers = #tpu.dot_dimension_numbers<[1], [0], [0], [1], [0, 0, 1, 1], [], []>} : vector<32x128xbf16>, vector<128x512xbf16>, vector<32x512xf32> -> vector<32x512xf32>
    %7 = arith.addf %3, %6 : vector<32x512xf32>
    %c0_6 = arith.constant 0 : index
    %c0_7 = arith.constant 0 : index
    %8 = vector.load %arg7[%c0_6, %c0_7] : memref<32x512xf32, #tpu.memory_space<vmem>>, vector<32x512xf32>
    tpu.vector_store %arg7[%c0_6, %c0_7], %7 {strides = array<i32>} : memref<32x512xf32, #tpu.memory_space<vmem>>, vector<32x512xf32>,
    %c0_i32_8 = arith.constant 0 : i32
    %9 = arith.cmpi eq, %arg2, %c0_i32_8 : i32
    %10 = arith.extui %9 : i1 to i32
    %c0_i32_9 = arith.constant 0 : i32
    %11 = arith.cmpi ne, %10, %c0_i32_9 : i32
    scf.if %11 {
      %c0_10 = arith.constant 0 : index
      %c0_11 = arith.constant 0 : index
      %12 = vector.load %arg7[%c0_10, %c0_11] : memref<32x512xf32, #tpu.memory_space<vmem>>, vector<32x512xf32>
      %c0_12 = arith.constant 0 : index
      %c0_13 = arith.constant 0 : index
      %13 = vector.load %arg5[%c0_12, %c0_13] : memref<1x512xf32, #tpu.memory_space<vmem>>, vector<1x512xf32>
      %14 = vector.broadcast %13 : vector<1x512xf32> to vector<32x512xf32>
      %15 = arith.addf %12, %14 : vector<32x512xf32>
      %16 = arith.truncf %15 : vector<32x512xf32> to vector<32x512xbf16>
      %c0_14 = arith.constant 0 : index
      %c0_15 = arith.constant 0 : index
      %17 = vector.load %arg6[%c0_14, %c0_15] : memref<32x512xbf16, #tpu.memory_space<vmem>>, vector<32x512xbf16>
      tpu.vector_store %arg6[%c0_14, %c0_15], %16 {strides = array<i32>} : memref<32x512xbf16, #tpu.memory_space<vmem>>, vector<32x512xbf16>,
    } else {
    }
    return
  }
  func.func @transform_0(%arg0: i32, %arg1: i32, %arg2: i32) -> (i32, i32) {
    %c0_i32 = arith.constant 0 : i32
    return %arg0, %arg2 : i32, i32
  }
  func.func @transform_1(%arg0: i32, %arg1: i32, %arg2: i32) -> (i32, i32) {
    %c0_i32 = arith.constant 0 : i32
    return %arg2, %arg1 : i32, i32
  }
  func.func @transform_2(%arg0: i32, %arg1: i32, %arg2: i32) -> (i32, i32) {
    %c0_i32 = arith.constant 0 : i32
    %c0_i32_0 = arith.constant 0 : i32
    return %c0_i32, %arg1 : i32, i32
  }
  func.func @transform_3(%arg0: i32, %arg1: i32, %arg2: i32) -> (i32, i32) {
    %c0_i32 = arith.constant 0 : i32
    return %arg0, %arg1 : i32, i32
  }
}

module attributes {stable_mosaic.version = 11 : i64} {
  func.func @_matmul_kernel(%arg0: i32, %arg1: i32, %arg2: i32, %arg3: memref<16x128xbf16, #tpu.memory_space<vmem>>, %arg4: memref<128x128xbf16, #tpu.memory_space<vmem>>, %arg5: memref<1x128xf32, #tpu.memory_space<vmem>>, %arg6: memref<16x128xbf16, #tpu.memory_space<vmem>>, %arg7: memref<16x128xf32, #tpu.memory_space<vmem>>) attributes {dimension_semantics = [#tpu.dimension_semantics<parallel>, #tpu.dimension_semantics<parallel>, #tpu.dimension_semantics<arbitrary>], iteration_bounds = array<i64: 1, 1, 1>, scalar_prefetch = 0 : i64, scratch_operands = 1 : i64, tpu.core_type = #tpu.core_type<tc>, window_params = [{transform_indices = @transform_0, window_bounds = array<i64: 16, 128>}, {transform_indices = @transform_1, window_bounds = array<i64: 128, 128>}, {transform_indices = @transform_2, window_bounds = array<i64: 1, 128>}, {transform_indices = @transform_3, window_bounds = array<i64: 16, 128>}]} {
    %c0_i32 = arith.constant 0 : i32
    %0 = arith.cmpi eq, %arg2, %c0_i32 : i32
    %1 = arith.extui %0 : i1 to i32
    %c0_i32_0 = arith.constant 0 : i32
    %2 = arith.cmpi ne, %1, %c0_i32_0 : i32
    scf.if %2 {
      %cst_10 = arith.constant 0.000000e+00 : f32
      %12 = vector.broadcast %cst_10 : f32 to vector<16x128xf32>
      %c0_11 = arith.constant 0 : index
      %c0_12 = arith.constant 0 : index
      %13 = vector.load %arg7[%c0_11, %c0_12] : memref<16x128xf32, #tpu.memory_space<vmem>>, vector<16x128xf32>
      tpu.vector_store %arg7[%c0_11, %c0_12], %12 {strides = array<i32>} : memref<16x128xf32, #tpu.memory_space<vmem>>, vector<16x128xf32>,
    } else {
    }
    %c0 = arith.constant 0 : index
    %c0_1 = arith.constant 0 : index
    %3 = vector.load %arg7[%c0, %c0_1] : memref<16x128xf32, #tpu.memory_space<vmem>>, vector<16x128xf32>
    %c0_2 = arith.constant 0 : index
    %c0_3 = arith.constant 0 : index
    %4 = vector.load %arg3[%c0_2, %c0_3] : memref<16x128xbf16, #tpu.memory_space<vmem>>, vector<16x128xbf16>
    %c0_4 = arith.constant 0 : index
    %c0_5 = arith.constant 0 : index
    %5 = vector.load %arg4[%c0_4, %c0_5] : memref<128x128xbf16, #tpu.memory_space<vmem>>, vector<128x128xbf16>
    %cst = arith.constant dense<0.000000e+00> : vector<16x128xf32>
    %6 = tpu.matmul %4, %5, %cst {dimension_numbers = #tpu.dot_dimension_numbers<[1], [0], [0], [1], [0, 0, 1, 1], [], []>} : vector<16x128xbf16>, vector<128x128xbf16>, vector<16x128xf32> -> vector<16x128xf32>
    %7 = arith.addf %3, %6 : vector<16x128xf32>
    %c0_6 = arith.constant 0 : index
    %c0_7 = arith.constant 0 : index
    %8 = vector.load %arg7[%c0_6, %c0_7] : memref<16x128xf32, #tpu.memory_space<vmem>>, vector<16x128xf32>
    tpu.vector_store %arg7[%c0_6, %c0_7], %7 {strides = array<i32>} : memref<16x128xf32, #tpu.memory_space<vmem>>, vector<16x128xf32>,
    %c0_i32_8 = arith.constant 0 : i32
    %9 = arith.cmpi eq, %arg2, %c0_i32_8 : i32
    %10 = arith.extui %9 : i1 to i32
    %c0_i32_9 = arith.constant 0 : i32
    %11 = arith.cmpi ne, %10, %c0_i32_9 : i32
    scf.if %11 {
      %c0_10 = arith.constant 0 : index
      %c0_11 = arith.constant 0 : index
      %12 = vector.load %arg7[%c0_10, %c0_11] : memref<16x128xf32, #tpu.memory_space<vmem>>, vector<16x128xf32>
      %c0_12 = arith.constant 0 : index
      %c0_13 = arith.constant 0 : index
      %13 = vector.load %arg5[%c0_12, %c0_13] : memref<1x128xf32, #tpu.memory_space<vmem>>, vector<1x128xf32>
      %14 = vector.broadcast %13 : vector<1x128xf32> to vector<16x128xf32>
      %15 = arith.addf %12, %14 : vector<16x128xf32>
      %16 = arith.truncf %15 : vector<16x128xf32> to vector<16x128xbf16>
      %c0_14 = arith.constant 0 : index
      %c0_15 = arith.constant 0 : index
      %17 = vector.load %arg6[%c0_14, %c0_15] : memref<16x128xbf16, #tpu.memory_space<vmem>>, vector<16x128xbf16>
      tpu.vector_store %arg6[%c0_14, %c0_15], %16 {strides = array<i32>} : memref<16x128xbf16, #tpu.memory_space<vmem>>, vector<16x128xbf16>,
    } else {
    }
    return
  }
  func.func @transform_0(%arg0: i32, %arg1: i32, %arg2: i32) -> (i32, i32) {
    %c0_i32 = arith.constant 0 : i32
    return %arg0, %arg2 : i32, i32
  }
  func.func @transform_1(%arg0: i32, %arg1: i32, %arg2: i32) -> (i32, i32) {
    %c0_i32 = arith.constant 0 : i32
    return %arg2, %arg1 : i32, i32
  }
  func.func @transform_2(%arg0: i32, %arg1: i32, %arg2: i32) -> (i32, i32) {
    %c0_i32 = arith.constant 0 : i32
    %c0_i32_0 = arith.constant 0 : i32
    return %c0_i32, %arg1 : i32, i32
  }
  func.func @transform_3(%arg0: i32, %arg1: i32, %arg2: i32) -> (i32, i32) {
    %c0_i32 = arith.constant 0 : i32
    return %arg0, %arg1 : i32, i32
  }
}

module attributes {stable_mosaic.version = 11 : i64} {
  func.func @_matmul_kernel(%arg0: i32, %arg1: i32, %arg2: i32, %arg3: memref<32x128xbf16, #tpu.memory_space<vmem>>, %arg4: memref<128x1024xbf16, #tpu.memory_space<vmem>>, %arg5: memref<1x1024xf32, #tpu.memory_space<vmem>>, %arg6: memref<32x1024xbf16, #tpu.memory_space<vmem>>, %arg7: memref<32x1024xf32, #tpu.memory_space<vmem>>) attributes {dimension_semantics = [#tpu.dimension_semantics<parallel>, #tpu.dimension_semantics<parallel>, #tpu.dimension_semantics<arbitrary>], iteration_bounds = array<i64: 1, 2, 1>, scalar_prefetch = 0 : i64, scratch_operands = 1 : i64, tpu.core_type = #tpu.core_type<tc>, window_params = [{transform_indices = @transform_0, window_bounds = array<i64: 32, 128>}, {transform_indices = @transform_1, window_bounds = array<i64: 128, 1024>}, {transform_indices = @transform_2, window_bounds = array<i64: 1, 1024>}, {transform_indices = @transform_3, window_bounds = array<i64: 32, 1024>}]} {
    %c0_i32 = arith.constant 0 : i32
    %0 = arith.cmpi eq, %arg2, %c0_i32 : i32
    %1 = arith.extui %0 : i1 to i32
    %c0_i32_0 = arith.constant 0 : i32
    %2 = arith.cmpi ne, %1, %c0_i32_0 : i32
    scf.if %2 {
      %cst_10 = arith.constant 0.000000e+00 : f32
      %12 = vector.broadcast %cst_10 : f32 to vector<32x1024xf32>
      %c0_11 = arith.constant 0 : index
      %c0_12 = arith.constant 0 : index
      %13 = vector.load %arg7[%c0_11, %c0_12] : memref<32x1024xf32, #tpu.memory_space<vmem>>, vector<32x1024xf32>
      tpu.vector_store %arg7[%c0_11, %c0_12], %12 {strides = array<i32>} : memref<32x1024xf32, #tpu.memory_space<vmem>>, vector<32x1024xf32>,
    } else {
    }
    %c0 = arith.constant 0 : index
    %c0_1 = arith.constant 0 : index
    %3 = vector.load %arg7[%c0, %c0_1] : memref<32x1024xf32, #tpu.memory_space<vmem>>, vector<32x1024xf32>
    %c0_2 = arith.constant 0 : index
    %c0_3 = arith.constant 0 : index
    %4 = vector.load %arg3[%c0_2, %c0_3] : memref<32x128xbf16, #tpu.memory_space<vmem>>, vector<32x128xbf16>
    %c0_4 = arith.constant 0 : index
    %c0_5 = arith.constant 0 : index
    %5 = vector.load %arg4[%c0_4, %c0_5] : memref<128x1024xbf16, #tpu.memory_space<vmem>>, vector<128x1024xbf16>
    %cst = arith.constant dense<0.000000e+00> : vector<32x1024xf32>
    %6 = tpu.matmul %4, %5, %cst {dimension_numbers = #tpu.dot_dimension_numbers<[1], [0], [0], [1], [0, 0, 1, 1], [], []>} : vector<32x128xbf16>, vector<128x1024xbf16>, vector<32x1024xf32> -> vector<32x1024xf32>
    %7 = arith.addf %3, %6 : vector<32x1024xf32>
    %c0_6 = arith.constant 0 : index
    %c0_7 = arith.constant 0 : index
    %8 = vector.load %arg7[%c0_6, %c0_7] : memref<32x1024xf32, #tpu.memory_space<vmem>>, vector<32x1024xf32>
    tpu.vector_store %arg7[%c0_6, %c0_7], %7 {strides = array<i32>} : memref<32x1024xf32, #tpu.memory_space<vmem>>, vector<32x1024xf32>,
    %c0_i32_8 = arith.constant 0 : i32
    %9 = arith.cmpi eq, %arg2, %c0_i32_8 : i32
    %10 = arith.extui %9 : i1 to i32
    %c0_i32_9 = arith.constant 0 : i32
    %11 = arith.cmpi ne, %10, %c0_i32_9 : i32
    scf.if %11 {
      %c0_10 = arith.constant 0 : index
      %c0_11 = arith.constant 0 : index
      %12 = vector.load %arg7[%c0_10, %c0_11] : memref<32x1024xf32, #tpu.memory_space<vmem>>, vector<32x1024xf32>
      %c0_12 = arith.constant 0 : index
      %c0_13 = arith.constant 0 : index
      %13 = vector.load %arg5[%c0_12, %c0_13] : memref<1x1024xf32, #tpu.memory_space<vmem>>, vector<1x1024xf32>
      %14 = vector.broadcast %13 : vector<1x1024xf32> to vector<32x1024xf32>
      %15 = arith.addf %12, %14 : vector<32x1024xf32>
      %16 = arith.truncf %15 : vector<32x1024xf32> to vector<32x1024xbf16>
      %c0_14 = arith.constant 0 : index
      %c0_15 = arith.constant 0 : index
      %17 = vector.load %arg6[%c0_14, %c0_15] : memref<32x1024xbf16, #tpu.memory_space<vmem>>, vector<32x1024xbf16>
      tpu.vector_store %arg6[%c0_14, %c0_15], %16 {strides = array<i32>} : memref<32x1024xbf16, #tpu.memory_space<vmem>>, vector<32x1024xbf16>,
    } else {
    }
    return
  }
  func.func @transform_0(%arg0: i32, %arg1: i32, %arg2: i32) -> (i32, i32) {
    %c0_i32 = arith.constant 0 : i32
    return %arg0, %arg2 : i32, i32
  }
  func.func @transform_1(%arg0: i32, %arg1: i32, %arg2: i32) -> (i32, i32) {
    %c0_i32 = arith.constant 0 : i32
    return %arg2, %arg1 : i32, i32
  }
  func.func @transform_2(%arg0: i32, %arg1: i32, %arg2: i32) -> (i32, i32) {
    %c0_i32 = arith.constant 0 : i32
    %c0_i32_0 = arith.constant 0 : i32
    return %c0_i32, %arg1 : i32, i32
  }
  func.func @transform_3(%arg0: i32, %arg1: i32, %arg2: i32) -> (i32, i32) {
    %c0_i32 = arith.constant 0 : i32
    return %arg0, %arg1 : i32, i32
  }
}

module attributes {stable_mosaic.version = 11 : i64} {
  func.func @_flash_attn_kernel(%arg0: i32, %arg1: i32, %arg2: i32, %arg3: i32, %arg4: memref<1x16x128xbf16, #tpu.memory_space<vmem>>, %arg5: memref<1x16x128xbf16, #tpu.memory_space<vmem>>, %arg6: memref<1x16x128xbf16, #tpu.memory_space<vmem>>, %arg7: memref<1x16x128xbf16, #tpu.memory_space<vmem>>, %arg8: memref<16x1xf32, #tpu.memory_space<vmem>>, %arg9: memref<16x1xf32, #tpu.memory_space<vmem>>, %arg10: memref<16x128xf32, #tpu.memory_space<vmem>>) attributes {dimension_semantics = [#tpu.dimension_semantics<parallel>, #tpu.dimension_semantics<parallel>, #tpu.dimension_semantics<parallel>, #tpu.dimension_semantics<arbitrary>], iteration_bounds = array<i64: 2, 4, 1, 1>, scalar_prefetch = 0 : i64, scratch_operands = 3 : i64, tpu.core_type = #tpu.core_type<tc>, window_params = [{transform_indices = @transform_0, window_bounds = array<i64: 1, 16, 128>}, {transform_indices = @transform_1, window_bounds = array<i64: 1, 16, 128>}, {transform_indices = @transform_2, window_bounds = array<i64: 1, 16, 128>}, {transform_indices = @transform_3, window_bounds = array<i64: 1, 16, 128>}]} {
    %c0_i32 = arith.constant 0 : i32
    %0 = arith.cmpi eq, %arg3, %c0_i32 : i32
    %1 = arith.extui %0 : i1 to i32
    %c0_i32_0 = arith.constant 0 : i32
    %2 = arith.cmpi ne, %1, %c0_i32_0 : i32
    scf.if %2 {
      %cst_28 = arith.constant 0xFF800000 : f32
      %47 = vector.broadcast %cst_28 : f32 to vector<16x1xf32>
      %c0_29 = arith.constant 0 : index
      %c0_30 = arith.constant 0 : index
      %48 = vector.load %arg8[%c0_29, %c0_30] : memref<16x1xf32, #tpu.memory_space<vmem>>, vector<16x1xf32>
      tpu.vector_store %arg8[%c0_29, %c0_30], %47 {strides = array<i32>} : memref<16x1xf32, #tpu.memory_space<vmem>>, vector<16x1xf32>,
      %cst_31 = arith.constant 0.000000e+00 : f32
      %49 = vector.broadcast %cst_31 : f32 to vector<16x1xf32>
      %c0_32 = arith.constant 0 : index
      %c0_33 = arith.constant 0 : index
      %50 = vector.load %arg9[%c0_32, %c0_33] : memref<16x1xf32, #tpu.memory_space<vmem>>, vector<16x1xf32>
      tpu.vector_store %arg9[%c0_32, %c0_33], %49 {strides = array<i32>} : memref<16x1xf32, #tpu.memory_space<vmem>>, vector<16x1xf32>,
      %cst_34 = arith.constant 0.000000e+00 : f32
      %51 = vector.broadcast %cst_34 : f32 to vector<16x128xf32>
      %c0_35 = arith.constant 0 : index
      %c0_36 = arith.constant 0 : index
      %52 = vector.load %arg10[%c0_35, %c0_36] : memref<16x128xf32, #tpu.memory_space<vmem>>, vector<16x128xf32>
      tpu.vector_store %arg10[%c0_35, %c0_36], %51 {strides = array<i32>} : memref<16x128xf32, #tpu.memory_space<vmem>>, vector<16x128xf32>,
    } else {
    }
    %c0 = arith.constant 0 : index
    %c0_1 = arith.constant 0 : index
    %c0_2 = arith.constant 0 : index
    %3 = vector.load %arg4[%c0, %c0_1, %c0_2] : memref<1x16x128xbf16, #tpu.memory_space<vmem>>, vector<1x16x128xbf16>
    %4 = vector.shape_cast %3 : vector<1x16x128xbf16> to vector<16x128xbf16>
    %c0_3 = arith.constant 0 : index
    %c0_4 = arith.constant 0 : index
    %c0_5 = arith.constant 0 : index
    %5 = vector.load %arg5[%c0_3, %c0_4, %c0_5] : memref<1x16x128xbf16, #tpu.memory_space<vmem>>, vector<1x16x128xbf16>
    %6 = vector.shape_cast %5 : vector<1x16x128xbf16> to vector<16x128xbf16>
    %c0_6 = arith.constant 0 : index
    %c0_7 = arith.constant 0 : index
    %c0_8 = arith.constant 0 : index
    %7 = vector.load %arg6[%c0_6, %c0_7, %c0_8] : memref<1x16x128xbf16, #tpu.memory_space<vmem>>, vector<1x16x128xbf16>
    %8 = vector.shape_cast %7 : vector<1x16x128xbf16> to vector<16x128xbf16>
    %cst = arith.constant dense<0.000000e+00> : vector<16x16xf32>
    %9 = tpu.matmul %4, %6, %cst {dimension_numbers = #tpu.dot_dimension_numbers<[1], [1], [0], [0], [0, 0, 1, 0], [], []>} : vector<16x128xbf16>, vector<16x128xbf16>, vector<16x16xf32> -> vector<16x16xf32>
    %c16_i32 = arith.constant 16 : i32
    %10 = arith.muli %arg3, %c16_i32 : i32
    %11 = tpu.iota {dimensions = array<i32: 1>} : vector<1x16xi32>
    %12 = vector.broadcast %10 : i32 to vector<1x16xi32>
    %13 = arith.addi %12, %11 : vector<1x16xi32>
    %c10_i32 = arith.constant 10 : i32
    %14 = vector.broadcast %c10_i32 : i32 to vector<1x16xi32>
    %15 = arith.cmpi slt, %13, %14 : vector<1x16xi32>
    %cst_9 = arith.constant 0.000000e+00 : f32
    %cst_10 = arith.constant -1.000000e+30 : f32
    %16 = vector.broadcast %cst_9 : f32 to vector<1x16xf32>
    %17 = vector.broadcast %cst_10 : f32 to vector<1x16xf32>
    %18 = arith.select %15, %16, %17 : vector<1x16xi1>, vector<1x16xf32>
    %19 = vector.broadcast %18 : vector<1x16xf32> to vector<16x16xf32>
    %20 = arith.addf %9, %19 : vector<16x16xf32>
    %c0_11 = arith.constant 0 : index
    %c0_12 = arith.constant 0 : index
    %21 = vector.load %arg8[%c0_11, %c0_12] : memref<16x1xf32, #tpu.memory_space<vmem>>, vector<16x1xf32>
    %cst_13 = arith.constant dense<0xFF800000> : vector<16xf32>
    %22 = vector.multi_reduction <maximumf>, %20, %cst_13 [1] : vector<16x16xf32> to vector<16xf32>
    %23 = vector.shape_cast %22 : vector<16xf32> to vector<16x1xf32>
    %24 = arith.maximumf %21, %23 : vector<16x1xf32>
    %25 = arith.subf %21, %24 : vector<16x1xf32>
    %26 = math.exp %25 : vector<16x1xf32>
    %27 = vector.broadcast %24 : vector<16x1xf32> to vector<16x16xf32>
    %28 = arith.subf %20, %27 : vector<16x16xf32>
    %29 = math.exp %28 : vector<16x16xf32>
    %c0_14 = arith.constant 0 : index
    %c0_15 = arith.constant 0 : index
    %30 = vector.load %arg9[%c0_14, %c0_15] : memref<16x1xf32, #tpu.memory_space<vmem>>, vector<16x1xf32>
    %31 = arith.mulf %26, %30 : vector<16x1xf32>
    %cst_16 = arith.constant dense<0.000000e+00> : vector<16xf32>
    %32 = vector.multi_reduction <add>, %29, %cst_16 [1] : vector<16x16xf32> to vector<16xf32>
    %33 = vector.shape_cast %32 : vector<16xf32> to vector<16x1xf32>
    %34 = arith.addf %31, %33 : vector<16x1xf32>
    %c0_17 = arith.constant 0 : index
    %c0_18 = arith.constant 0 : index
    %35 = vector.load %arg9[%c0_17, %c0_18] : memref<16x1xf32, #tpu.memory_space<vmem>>, vector<16x1xf32>
    tpu.vector_store %arg9[%c0_17, %c0_18], %34 {strides = array<i32>} : memref<16x1xf32, #tpu.memory_space<vmem>>, vector<16x1xf32>,
    %c0_19 = arith.constant 0 : index
    %c0_20 = arith.constant 0 : index
    %36 = vector.load %arg10[%c0_19, %c0_20] : memref<16x128xf32, #tpu.memory_space<vmem>>, vector<16x128xf32>
    %37 = vector.broadcast %26 : vector<16x1xf32> to vector<16x128xf32>
    %38 = arith.mulf %37, %36 : vector<16x128xf32>
    %39 = arith.truncf %29 : vector<16x16xf32> to vector<16x16xbf16>
    %cst_21 = arith.constant dense<0.000000e+00> : vector<16x128xf32>
    %40 = tpu.matmul %39, %8, %cst_21 {dimension_numbers = #tpu.dot_dimension_numbers<[1], [0], [0], [1], [0, 0, 1, 1], [], []>} : vector<16x16xbf16>, vector<16x128xbf16>, vector<16x128xf32> -> vector<16x128xf32>
    %41 = arith.addf %38, %40 : vector<16x128xf32>
    %c0_22 = arith.constant 0 : index
    %c0_23 = arith.constant 0 : index
    %42 = vector.load %arg10[%c0_22, %c0_23] : memref<16x128xf32, #tpu.memory_space<vmem>>, vector<16x128xf32>
    tpu.vector_store %arg10[%c0_22, %c0_23], %41 {strides = array<i32>} : memref<16x128xf32, #tpu.memory_space<vmem>>, vector<16x128xf32>,
    %c0_24 = arith.constant 0 : index
    %c0_25 = arith.constant 0 : index
    %43 = vector.load %arg8[%c0_24, %c0_25] : memref<16x1xf32, #tpu.memory_space<vmem>>, vector<16x1xf32>
    tpu.vector_store %arg8[%c0_24, %c0_25], %24 {strides = array<i32>} : memref<16x1xf32, #tpu.memory_space<vmem>>, vector<16x1xf32>,
    %c0_i32_26 = arith.constant 0 : i32
    %44 = arith.cmpi eq, %arg3, %c0_i32_26 : i32
    %45 = arith.extui %44 : i1 to i32
    %c0_i32_27 = arith.constant 0 : i32
    %46 = arith.cmpi ne, %45, %c0_i32_27 : i32
    scf.if %46 {
      %c0_28 = arith.constant 0 : index
      %c0_29 = arith.constant 0 : index
      %47 = vector.load %arg10[%c0_28, %c0_29] : memref<16x128xf32, #tpu.memory_space<vmem>>, vector<16x128xf32>
      %c0_30 = arith.constant 0 : index
      %c0_31 = arith.constant 0 : index
      %48 = vector.load %arg9[%c0_30, %c0_31] : memref<16x1xf32, #tpu.memory_space<vmem>>, vector<16x1xf32>
      %49 = tpu.reciprocal %48 {approx = true} : vector<16x1xf32> -> vector<16x1xf32>
      %50 = vector.broadcast %49 : vector<16x1xf32> to vector<16x128xf32>
      %51 = arith.mulf %47, %50 : vector<16x128xf32>
      %52 = arith.truncf %51 : vector<16x128xf32> to vector<16x128xbf16>
      %c0_32 = arith.constant 0 : index
      %c0_33 = arith.constant 0 : index
      %c0_34 = arith.constant 0 : index
      %53 = vector.load %arg7[%c0_32, %c0_33, %c0_34] : memref<1x16x128xbf16, #tpu.memory_space<vmem>>, vector<1x16x128xbf16>
      %54 = vector.shape_cast %53 : vector<1x16x128xbf16> to vector<16x128xbf16>
      %55 = vector.shape_cast %52 : vector<16x128xbf16> to vector<1x16x128xbf16>
      tpu.vector_store %arg7[%c0_32, %c0_33, %c0_34], %55 {strides = array<i32>} : memref<1x16x128xbf16, #tpu.memory_space<vmem>>, vector<1x16x128xbf16>,
    } else {
    }
    return
  }
  func.func @transform_0(%arg0: i32, %arg1: i32, %arg2: i32, %arg3: i32) -> (i32, i32, i32) {
    %c0_i32 = arith.constant 0 : i32
    return %arg0, %arg2, %arg1 : i32, i32, i32
  }
  func.func @transform_1(%arg0: i32, %arg1: i32, %arg2: i32, %arg3: i32) -> (i32, i32, i32) {
    %c0_i32 = arith.constant 0 : i32
    %0 = arith.addi %c0_i32, %arg1 : i32
    %c0_i32_0 = arith.constant 0 : i32
    return %arg0, %arg3, %0 : i32, i32, i32
  }
  func.func @transform_2(%arg0: i32, %arg1: i32, %arg2: i32, %arg3: i32) -> (i32, i32, i32) {
    %c4_i32 = arith.constant 4 : i32
    %0 = arith.addi %c4_i32, %arg1 : i32
    %c0_i32 = arith.constant 0 : i32
    return %arg0, %arg3, %0 : i32, i32, i32
  }
  func.func @transform_3(%arg0: i32, %arg1: i32, %arg2: i32, %arg3: i32) -> (i32, i32, i32) {
    %c0_i32 = arith.constant 0 : i32
    return %arg0, %arg2, %arg1 : i32, i32, i32
  }
}

module attributes {stable_mosaic.version = 11 : i64} {
  func.func @_matmul_add_ln_kernel(%arg0: i32, %arg1: i32, %arg2: memref<32x512xbf16, #tpu.memory_space<vmem>>, %arg3: memref<512x128xbf16, #tpu.memory_space<vmem>>, %arg4: memref<1x128xf32, #tpu.memory_space<vmem>>, %arg5: memref<32x128xbf16, #tpu.memory_space<vmem>>, %arg6: memref<1x128xf32, #tpu.memory_space<vmem>>, %arg7: memref<1x128xf32, #tpu.memory_space<vmem>>, %arg8: memref<32x128xbf16, #tpu.memory_space<vmem>>, %arg9: memref<32x128xf32, #tpu.memory_space<vmem>>) attributes {dimension_semantics = [#tpu.dimension_semantics<parallel>, #tpu.dimension_semantics<arbitrary>], iteration_bounds = array<i64: 1, 1>, scalar_prefetch = 0 : i64, scratch_operands = 1 : i64, tpu.core_type = #tpu.core_type<tc>, window_params = [{transform_indices = @transform_0, window_bounds = array<i64: 32, 512>}, {transform_indices = @transform_1, window_bounds = array<i64: 512, 128>}, {pipeline_mode = #tpu.pipeline_mode<synchronous>, transform_indices = @transform_2, window_bounds = array<i64: 1, 128>}, {transform_indices = @transform_3, window_bounds = array<i64: 32, 128>}, {pipeline_mode = #tpu.pipeline_mode<synchronous>, transform_indices = @transform_4, window_bounds = array<i64: 1, 128>}, {pipeline_mode = #tpu.pipeline_mode<synchronous>, transform_indices = @transform_5, window_bounds = array<i64: 1, 128>}, {transform_indices = @transform_6, window_bounds = array<i64: 32, 128>}]} {
    %c0_i32 = arith.constant 0 : i32
    %0 = arith.cmpi eq, %arg1, %c0_i32 : i32
    %1 = arith.extui %0 : i1 to i32
    %c0_i32_0 = arith.constant 0 : i32
    %2 = arith.cmpi ne, %1, %c0_i32_0 : i32
    scf.if %2 {
      %cst_10 = arith.constant 0.000000e+00 : f32
      %12 = vector.broadcast %cst_10 : f32 to vector<32x128xf32>
      %c0_11 = arith.constant 0 : index
      %c0_12 = arith.constant 0 : index
      %13 = vector.load %arg9[%c0_11, %c0_12] : memref<32x128xf32, #tpu.memory_space<vmem>>, vector<32x128xf32>
      tpu.vector_store %arg9[%c0_11, %c0_12], %12 {strides = array<i32>} : memref<32x128xf32, #tpu.memory_space<vmem>>, vector<32x128xf32>,
    } else {
    }
    %c0 = arith.constant 0 : index
    %c0_1 = arith.constant 0 : index
    %3 = vector.load %arg9[%c0, %c0_1] : memref<32x128xf32, #tpu.memory_space<vmem>>, vector<32x128xf32>
    %c0_2 = arith.constant 0 : index
    %c0_3 = arith.constant 0 : index
    %4 = vector.load %arg2[%c0_2, %c0_3] : memref<32x512xbf16, #tpu.memory_space<vmem>>, vector<32x512xbf16>
    %c0_4 = arith.constant 0 : index
    %c0_5 = arith.constant 0 : index
    %5 = vector.load %arg3[%c0_4, %c0_5] : memref<512x128xbf16, #tpu.memory_space<vmem>>, vector<512x128xbf16>
    %cst = arith.constant dense<0.000000e+00> : vector<32x128xf32>
    %6 = tpu.matmul %4, %5, %cst {dimension_numbers = #tpu.dot_dimension_numbers<[1], [0], [0], [1], [0, 0, 1, 1], [], []>} : vector<32x512xbf16>, vector<512x128xbf16>, vector<32x128xf32> -> vector<32x128xf32>
    %7 = arith.addf %3, %6 : vector<32x128xf32>
    %c0_6 = arith.constant 0 : index
    %c0_7 = arith.constant 0 : index
    %8 = vector.load %arg9[%c0_6, %c0_7] : memref<32x128xf32, #tpu.memory_space<vmem>>, vector<32x128xf32>
    tpu.vector_store %arg9[%c0_6, %c0_7], %7 {strides = array<i32>} : memref<32x128xf32, #tpu.memory_space<vmem>>, vector<32x128xf32>,
    %c0_i32_8 = arith.constant 0 : i32
    %9 = arith.cmpi eq, %arg1, %c0_i32_8 : i32
    %10 = arith.extui %9 : i1 to i32
    %c0_i32_9 = arith.constant 0 : i32
    %11 = arith.cmpi ne, %10, %c0_i32_9 : i32
    scf.if %11 {
      %c0_10 = arith.constant 0 : index
      %c0_11 = arith.constant 0 : index
      %12 = vector.load %arg9[%c0_10, %c0_11] : memref<32x128xf32, #tpu.memory_space<vmem>>, vector<32x128xf32>
      %c0_12 = arith.constant 0 : index
      %c0_13 = arith.constant 0 : index
      %13 = vector.load %arg4[%c0_12, %c0_13] : memref<1x128xf32, #tpu.memory_space<vmem>>, vector<1x128xf32>
      %14 = vector.broadcast %13 : vector<1x128xf32> to vector<32x128xf32>
      %15 = arith.addf %12, %14 : vector<32x128xf32>
      %c0_14 = arith.constant 0 : index
      %c0_15 = arith.constant 0 : index
      %16 = vector.load %arg5[%c0_14, %c0_15] : memref<32x128xbf16, #tpu.memory_space<vmem>>, vector<32x128xbf16>
      %17 = arith.extf %16 : vector<32x128xbf16> to vector<32x128xf32>
      %18 = arith.addf %15, %17 : vector<32x128xf32>
      %cst_16 = arith.constant dense<0.000000e+00> : vector<32xf32>
      %19 = vector.multi_reduction <add>, %18, %cst_16 [1] : vector<32x128xf32> to vector<32xf32>
      %20 = vector.shape_cast %19 : vector<32xf32> to vector<32x1xf32>
      %cst_17 = arith.constant 3.125000e-02 : f32
      %21 = vector.broadcast %cst_17 : f32 to vector<32x1xf32>
      %22 = arith.mulf %20, %21 : vector<32x1xf32>
      %23 = vector.broadcast %22 : vector<32x1xf32> to vector<32x128xf32>
      %24 = arith.subf %18, %23 : vector<32x128xf32>
      %25 = tpu.iota {dimensions = array<i32: 1>} : vector<1x128xi32>
      %c32_i32 = arith.constant 32 : i32
      %26 = vector.broadcast %c32_i32 : i32 to vector<1x128xi32>
      %27 = arith.cmpi slt, %25, %26 : vector<1x128xi32>
      %cst_18 = arith.constant 0.000000e+00 : f32
      %28 = vector.shape_cast %27 : vector<1x128xi1> to vector<1x128xi1>
      %29 = vector.broadcast %28 : vector<1x128xi1> to vector<32x128xi1>
      %30 = vector.broadcast %cst_18 : f32 to vector<32x128xf32>
      %31 = arith.select %29, %24, %30 : vector<32x128xi1>, vector<32x128xf32>
      %32 = arith.mulf %31, %31 : vector<32x128xf32>
      %cst_19 = arith.constant dense<0.000000e+00> : vector<32xf32>
      %33 = vector.multi_reduction <add>, %32, %cst_19 [1] : vector<32x128xf32> to vector<32xf32>
      %34 = vector.shape_cast %33 : vector<32xf32> to vector<32x1xf32>
      %cst_20 = arith.constant 3.125000e-02 : f32
      %35 = vector.broadcast %cst_20 : f32 to vector<32x1xf32>
      %36 = arith.mulf %34, %35 : vector<32x1xf32>
      %cst_21 = arith.constant 9.99999974E-6 : f32
      %37 = vector.broadcast %cst_21 : f32 to vector<32x1xf32>
      %38 = arith.addf %36, %37 : vector<32x1xf32>
      %39 = math.rsqrt %38 : vector<32x1xf32>
      %40 = vector.broadcast %39 : vector<32x1xf32> to vector<32x128xf32>
      %41 = arith.mulf %31, %40 : vector<32x128xf32>
      %c0_22 = arith.constant 0 : index
      %c0_23 = arith.constant 0 : index
      %42 = vector.load %arg6[%c0_22, %c0_23] : memref<1x128xf32, #tpu.memory_space<vmem>>, vector<1x128xf32>
      %43 = vector.broadcast %42 : vector<1x128xf32> to vector<32x128xf32>
      %44 = arith.mulf %41, %43 : vector<32x128xf32>
      %c0_24 = arith.constant 0 : index
      %c0_25 = arith.constant 0 : index
      %45 = vector.load %arg7[%c0_24, %c0_25] : memref<1x128xf32, #tpu.memory_space<vmem>>, vector<1x128xf32>
      %46 = vector.broadcast %45 : vector<1x128xf32> to vector<32x128xf32>
      %47 = arith.addf %44, %46 : vector<32x128xf32>
      %48 = arith.truncf %47 : vector<32x128xf32> to vector<32x128xbf16>
      %c0_26 = arith.constant 0 : index
      %c0_27 = arith.constant 0 : index
      %49 = vector.load %arg8[%c0_26, %c0_27] : memref<32x128xbf16, #tpu.memory_space<vmem>>, vector<32x128xbf16>
      tpu.vector_store %arg8[%c0_26, %c0_27], %48 {strides = array<i32>} : memref<32x128xbf16, #tpu.memory_space<vmem>>, vector<32x128xbf16>,
    } else {
    }
    return
  }
  func.func @transform_0(%arg0: i32, %arg1: i32) -> (i32, i32) {
    %c0_i32 = arith.constant 0 : i32
    return %arg0, %arg1 : i32, i32
  }
  func.func @transform_1(%arg0: i32, %arg1: i32) -> (i32, i32) {
    %c0_i32 = arith.constant 0 : i32
    %c0_i32_0 = arith.constant 0 : i32
    return %arg1, %c0_i32 : i32, i32
  }
  func.func @transform_2(%arg0: i32, %arg1: i32) -> (i32, i32) {
    %c0_i32 = arith.constant 0 : i32
    %c0_i32_0 = arith.constant 0 : i32
    %c0_i32_1 = arith.constant 0 : i32
    return %c0_i32, %c0_i32_0 : i32, i32
  }
  func.func @transform_3(%arg0: i32, %arg1: i32) -> (i32, i32) {
    %c0_i32 = arith.constant 0 : i32
    %c0_i32_0 = arith.constant 0 : i32
    return %arg0, %c0_i32 : i32, i32
  }
  func.func @transform_4(%arg0: i32, %arg1: i32) -> (i32, i32) {
    %c0_i32 = arith.constant 0 : i32
    %c0_i32_0 = arith.constant 0 : i32
    %c0_i32_1 = arith.constant 0 : i32
    return %c0_i32, %c0_i32_0 : i32, i32
  }
  func.func @transform_5(%arg0: i32, %arg1: i32) -> (i32, i32) {
    %c0_i32 = arith.constant 0 : i32
    %c0_i32_0 = arith.constant 0 : i32
    %c0_i32_1 = arith.constant 0 : i32
    return %c0_i32, %c0_i32_0 : i32, i32
  }
  func.func @transform_6(%arg0: i32, %arg1: i32) -> (i32, i32) {
    %c0_i32 = arith.constant 0 : i32
    %c0_i32_0 = arith.constant 0 : i32
    return %arg0, %c0_i32 : i32, i32
  }
}

module attributes {stable_mosaic.version = 11 : i64} {
  func.func @_matmul_kernel(%arg0: i32, %arg1: i32, %arg2: i32, %arg3: memref<32x128xbf16, #tpu.memory_space<vmem>>, %arg4: memref<128x128xbf16, #tpu.memory_space<vmem>>, %arg5: memref<1x128xf32, #tpu.memory_space<vmem>>, %arg6: memref<32x128xbf16, #tpu.memory_space<vmem>>, %arg7: memref<32x128xf32, #tpu.memory_space<vmem>>) attributes {dimension_semantics = [#tpu.dimension_semantics<parallel>, #tpu.dimension_semantics<parallel>, #tpu.dimension_semantics<arbitrary>], iteration_bounds = array<i64: 1, 1, 1>, scalar_prefetch = 0 : i64, scratch_operands = 1 : i64, tpu.core_type = #tpu.core_type<tc>, window_params = [{transform_indices = @transform_0, window_bounds = array<i64: 32, 128>}, {transform_indices = @transform_1, window_bounds = array<i64: 128, 128>}, {transform_indices = @transform_2, window_bounds = array<i64: 1, 128>}, {transform_indices = @transform_3, window_bounds = array<i64: 32, 128>}]} {
    %c0_i32 = arith.constant 0 : i32
    %0 = arith.cmpi eq, %arg2, %c0_i32 : i32
    %1 = arith.extui %0 : i1 to i32
    %c0_i32_0 = arith.constant 0 : i32
    %2 = arith.cmpi ne, %1, %c0_i32_0 : i32
    scf.if %2 {
      %cst_10 = arith.constant 0.000000e+00 : f32
      %12 = vector.broadcast %cst_10 : f32 to vector<32x128xf32>
      %c0_11 = arith.constant 0 : index
      %c0_12 = arith.constant 0 : index
      %13 = vector.load %arg7[%c0_11, %c0_12] : memref<32x128xf32, #tpu.memory_space<vmem>>, vector<32x128xf32>
      tpu.vector_store %arg7[%c0_11, %c0_12], %12 {strides = array<i32>} : memref<32x128xf32, #tpu.memory_space<vmem>>, vector<32x128xf32>,
    } else {
    }
    %c0 = arith.constant 0 : index
    %c0_1 = arith.constant 0 : index
    %3 = vector.load %arg7[%c0, %c0_1] : memref<32x128xf32, #tpu.memory_space<vmem>>, vector<32x128xf32>
    %c0_2 = arith.constant 0 : index
    %c0_3 = arith.constant 0 : index
    %4 = vector.load %arg3[%c0_2, %c0_3] : memref<32x128xbf16, #tpu.memory_space<vmem>>, vector<32x128xbf16>
    %c0_4 = arith.constant 0 : index
    %c0_5 = arith.constant 0 : index
    %5 = vector.load %arg4[%c0_4, %c0_5] : memref<128x128xbf16, #tpu.memory_space<vmem>>, vector<128x128xbf16>
    %cst = arith.constant dense<0.000000e+00> : vector<32x128xf32>
    %6 = tpu.matmul %4, %5, %cst {dimension_numbers = #tpu.dot_dimension_numbers<[1], [0], [0], [1], [0, 0, 1, 1], [], []>} : vector<32x128xbf16>, vector<128x128xbf16>, vector<32x128xf32> -> vector<32x128xf32>
    %7 = arith.addf %3, %6 : vector<32x128xf32>
    %c0_6 = arith.constant 0 : index
    %c0_7 = arith.constant 0 : index
    %8 = vector.load %arg7[%c0_6, %c0_7] : memref<32x128xf32, #tpu.memory_space<vmem>>, vector<32x128xf32>
    tpu.vector_store %arg7[%c0_6, %c0_7], %7 {strides = array<i32>} : memref<32x128xf32, #tpu.memory_space<vmem>>, vector<32x128xf32>,
    %c0_i32_8 = arith.constant 0 : i32
    %9 = arith.cmpi eq, %arg2, %c0_i32_8 : i32
    %10 = arith.extui %9 : i1 to i32
    %c0_i32_9 = arith.constant 0 : i32
    %11 = arith.cmpi ne, %10, %c0_i32_9 : i32
    scf.if %11 {
      %c0_10 = arith.constant 0 : index
      %c0_11 = arith.constant 0 : index
      %12 = vector.load %arg7[%c0_10, %c0_11] : memref<32x128xf32, #tpu.memory_space<vmem>>, vector<32x128xf32>
      %c0_12 = arith.constant 0 : index
      %c0_13 = arith.constant 0 : index
      %13 = vector.load %arg5[%c0_12, %c0_13] : memref<1x128xf32, #tpu.memory_space<vmem>>, vector<1x128xf32>
      %14 = vector.broadcast %13 : vector<1x128xf32> to vector<32x128xf32>
      %15 = arith.addf %12, %14 : vector<32x128xf32>
      %cst_14 = arith.constant 0.000000e+00 : f32
      %16 = vector.broadcast %cst_14 : f32 to vector<32x128xf32>
      %17 = arith.maximumf %15, %16 : vector<32x128xf32>
      %18 = arith.truncf %17 : vector<32x128xf32> to vector<32x128xbf16>
      %c0_15 = arith.constant 0 : index
      %c0_16 = arith.constant 0 : index
      %19 = vector.load %arg6[%c0_15, %c0_16] : memref<32x128xbf16, #tpu.memory_space<vmem>>, vector<32x128xbf16>
      tpu.vector_store %arg6[%c0_15, %c0_16], %18 {strides = array<i32>} : memref<32x128xbf16, #tpu.memory_space<vmem>>, vector<32x128xbf16>,
    } else {
    }
    return
  }
  func.func @transform_0(%arg0: i32, %arg1: i32, %arg2: i32) -> (i32, i32) {
    %c0_i32 = arith.constant 0 : i32
    return %arg0, %arg2 : i32, i32
  }
  func.func @transform_1(%arg0: i32, %arg1: i32, %arg2: i32) -> (i32, i32) {
    %c0_i32 = arith.constant 0 : i32
    return %arg2, %arg1 : i32, i32
  }
  func.func @transform_2(%arg0: i32, %arg1: i32, %arg2: i32) -> (i32, i32) {
    %c0_i32 = arith.constant 0 : i32
    %c0_i32_0 = arith.constant 0 : i32
    return %c0_i32, %arg1 : i32, i32
  }
  func.func @transform_3(%arg0: i32, %arg1: i32, %arg2: i32) -> (i32, i32) {
    %c0_i32 = arith.constant 0 : i32
    return %arg0, %arg1 : i32, i32
  }
}

module attributes {stable_mosaic.version = 11 : i64} {
  func.func @_matmul_add_ln_kernel(%arg0: i32, %arg1: i32, %arg2: memref<32x128xbf16, #tpu.memory_space<vmem>>, %arg3: memref<128x128xbf16, #tpu.memory_space<vmem>>, %arg4: memref<1x128xf32, #tpu.memory_space<vmem>>, %arg5: memref<32x128xbf16, #tpu.memory_space<vmem>>, %arg6: memref<1x128xf32, #tpu.memory_space<vmem>>, %arg7: memref<1x128xf32, #tpu.memory_space<vmem>>, %arg8: memref<32x128xbf16, #tpu.memory_space<vmem>>, %arg9: memref<32x128xf32, #tpu.memory_space<vmem>>) attributes {dimension_semantics = [#tpu.dimension_semantics<parallel>, #tpu.dimension_semantics<arbitrary>], iteration_bounds = array<i64: 1, 1>, scalar_prefetch = 0 : i64, scratch_operands = 1 : i64, tpu.core_type = #tpu.core_type<tc>, window_params = [{transform_indices = @transform_0, window_bounds = array<i64: 32, 128>}, {transform_indices = @transform_1, window_bounds = array<i64: 128, 128>}, {pipeline_mode = #tpu.pipeline_mode<synchronous>, transform_indices = @transform_2, window_bounds = array<i64: 1, 128>}, {transform_indices = @transform_3, window_bounds = array<i64: 32, 128>}, {pipeline_mode = #tpu.pipeline_mode<synchronous>, transform_indices = @transform_4, window_bounds = array<i64: 1, 128>}, {pipeline_mode = #tpu.pipeline_mode<synchronous>, transform_indices = @transform_5, window_bounds = array<i64: 1, 128>}, {transform_indices = @transform_6, window_bounds = array<i64: 32, 128>}]} {
    %c0_i32 = arith.constant 0 : i32
    %0 = arith.cmpi eq, %arg1, %c0_i32 : i32
    %1 = arith.extui %0 : i1 to i32
    %c0_i32_0 = arith.constant 0 : i32
    %2 = arith.cmpi ne, %1, %c0_i32_0 : i32
    scf.if %2 {
      %cst_10 = arith.constant 0.000000e+00 : f32
      %12 = vector.broadcast %cst_10 : f32 to vector<32x128xf32>
      %c0_11 = arith.constant 0 : index
      %c0_12 = arith.constant 0 : index
      %13 = vector.load %arg9[%c0_11, %c0_12] : memref<32x128xf32, #tpu.memory_space<vmem>>, vector<32x128xf32>
      tpu.vector_store %arg9[%c0_11, %c0_12], %12 {strides = array<i32>} : memref<32x128xf32, #tpu.memory_space<vmem>>, vector<32x128xf32>,
    } else {
    }
    %c0 = arith.constant 0 : index
    %c0_1 = arith.constant 0 : index
    %3 = vector.load %arg9[%c0, %c0_1] : memref<32x128xf32, #tpu.memory_space<vmem>>, vector<32x128xf32>
    %c0_2 = arith.constant 0 : index
    %c0_3 = arith.constant 0 : index
    %4 = vector.load %arg2[%c0_2, %c0_3] : memref<32x128xbf16, #tpu.memory_space<vmem>>, vector<32x128xbf16>
    %c0_4 = arith.constant 0 : index
    %c0_5 = arith.constant 0 : index
    %5 = vector.load %arg3[%c0_4, %c0_5] : memref<128x128xbf16, #tpu.memory_space<vmem>>, vector<128x128xbf16>
    %cst = arith.constant dense<0.000000e+00> : vector<32x128xf32>
    %6 = tpu.matmul %4, %5, %cst {dimension_numbers = #tpu.dot_dimension_numbers<[1], [0], [0], [1], [0, 0, 1, 1], [], []>} : vector<32x128xbf16>, vector<128x128xbf16>, vector<32x128xf32> -> vector<32x128xf32>
    %7 = arith.addf %3, %6 : vector<32x128xf32>
    %c0_6 = arith.constant 0 : index
    %c0_7 = arith.constant 0 : index
    %8 = vector.load %arg9[%c0_6, %c0_7] : memref<32x128xf32, #tpu.memory_space<vmem>>, vector<32x128xf32>
    tpu.vector_store %arg9[%c0_6, %c0_7], %7 {strides = array<i32>} : memref<32x128xf32, #tpu.memory_space<vmem>>, vector<32x128xf32>,
    %c0_i32_8 = arith.constant 0 : i32
    %9 = arith.cmpi eq, %arg1, %c0_i32_8 : i32
    %10 = arith.extui %9 : i1 to i32
    %c0_i32_9 = arith.constant 0 : i32
    %11 = arith.cmpi ne, %10, %c0_i32_9 : i32
    scf.if %11 {
      %c0_10 = arith.constant 0 : index
      %c0_11 = arith.constant 0 : index
      %12 = vector.load %arg9[%c0_10, %c0_11] : memref<32x128xf32, #tpu.memory_space<vmem>>, vector<32x128xf32>
      %c0_12 = arith.constant 0 : index
      %c0_13 = arith.constant 0 : index
      %13 = vector.load %arg4[%c0_12, %c0_13] : memref<1x128xf32, #tpu.memory_space<vmem>>, vector<1x128xf32>
      %14 = vector.broadcast %13 : vector<1x128xf32> to vector<32x128xf32>
      %15 = arith.addf %12, %14 : vector<32x128xf32>
      %c0_14 = arith.constant 0 : index
      %c0_15 = arith.constant 0 : index
      %16 = vector.load %arg5[%c0_14, %c0_15] : memref<32x128xbf16, #tpu.memory_space<vmem>>, vector<32x128xbf16>
      %17 = arith.extf %16 : vector<32x128xbf16> to vector<32x128xf32>
      %18 = arith.addf %15, %17 : vector<32x128xf32>
      %cst_16 = arith.constant dense<0.000000e+00> : vector<32xf32>
      %19 = vector.multi_reduction <add>, %18, %cst_16 [1] : vector<32x128xf32> to vector<32xf32>
      %20 = vector.shape_cast %19 : vector<32xf32> to vector<32x1xf32>
      %cst_17 = arith.constant 3.125000e-02 : f32
      %21 = vector.broadcast %cst_17 : f32 to vector<32x1xf32>
      %22 = arith.mulf %20, %21 : vector<32x1xf32>
      %23 = vector.broadcast %22 : vector<32x1xf32> to vector<32x128xf32>
      %24 = arith.subf %18, %23 : vector<32x128xf32>
      %25 = tpu.iota {dimensions = array<i32: 1>} : vector<1x128xi32>
      %c32_i32 = arith.constant 32 : i32
      %26 = vector.broadcast %c32_i32 : i32 to vector<1x128xi32>
      %27 = arith.cmpi slt, %25, %26 : vector<1x128xi32>
      %cst_18 = arith.constant 0.000000e+00 : f32
      %28 = vector.shape_cast %27 : vector<1x128xi1> to vector<1x128xi1>
      %29 = vector.broadcast %28 : vector<1x128xi1> to vector<32x128xi1>
      %30 = vector.broadcast %cst_18 : f32 to vector<32x128xf32>
      %31 = arith.select %29, %24, %30 : vector<32x128xi1>, vector<32x128xf32>
      %32 = arith.mulf %31, %31 : vector<32x128xf32>
      %cst_19 = arith.constant dense<0.000000e+00> : vector<32xf32>
      %33 = vector.multi_reduction <add>, %32, %cst_19 [1] : vector<32x128xf32> to vector<32xf32>
      %34 = vector.shape_cast %33 : vector<32xf32> to vector<32x1xf32>
      %cst_20 = arith.constant 3.125000e-02 : f32
      %35 = vector.broadcast %cst_20 : f32 to vector<32x1xf32>
      %36 = arith.mulf %34, %35 : vector<32x1xf32>
      %cst_21 = arith.constant 9.99999974E-6 : f32
      %37 = vector.broadcast %cst_21 : f32 to vector<32x1xf32>
      %38 = arith.addf %36, %37 : vector<32x1xf32>
      %39 = math.rsqrt %38 : vector<32x1xf32>
      %40 = vector.broadcast %39 : vector<32x1xf32> to vector<32x128xf32>
      %41 = arith.mulf %31, %40 : vector<32x128xf32>
      %c0_22 = arith.constant 0 : index
      %c0_23 = arith.constant 0 : index
      %42 = vector.load %arg6[%c0_22, %c0_23] : memref<1x128xf32, #tpu.memory_space<vmem>>, vector<1x128xf32>
      %43 = vector.broadcast %42 : vector<1x128xf32> to vector<32x128xf32>
      %44 = arith.mulf %41, %43 : vector<32x128xf32>
      %c0_24 = arith.constant 0 : index
      %c0_25 = arith.constant 0 : index
      %45 = vector.load %arg7[%c0_24, %c0_25] : memref<1x128xf32, #tpu.memory_space<vmem>>, vector<1x128xf32>
      %46 = vector.broadcast %45 : vector<1x128xf32> to vector<32x128xf32>
      %47 = arith.addf %44, %46 : vector<32x128xf32>
      %48 = arith.truncf %47 : vector<32x128xf32> to vector<32x128xbf16>
      %c0_26 = arith.constant 0 : index
      %c0_27 = arith.constant 0 : index
      %49 = vector.load %arg8[%c0_26, %c0_27] : memref<32x128xbf16, #tpu.memory_space<vmem>>, vector<32x128xbf16>
      tpu.vector_store %arg8[%c0_26, %c0_27], %48 {strides = array<i32>} : memref<32x128xbf16, #tpu.memory_space<vmem>>, vector<32x128xbf16>,
    } else {
    }
    return
  }
  func.func @transform_0(%arg0: i32, %arg1: i32) -> (i32, i32) {
    %c0_i32 = arith.constant 0 : i32
    return %arg0, %arg1 : i32, i32
  }
  func.func @transform_1(%arg0: i32, %arg1: i32) -> (i32, i32) {
    %c0_i32 = arith.constant 0 : i32
    %c0_i32_0 = arith.constant 0 : i32
    return %arg1, %c0_i32 : i32, i32
  }
  func.func @transform_2(%arg0: i32, %arg1: i32) -> (i32, i32) {
    %c0_i32 = arith.constant 0 : i32
    %c0_i32_0 = arith.constant 0 : i32
    %c0_i32_1 = arith.constant 0 : i32
    return %c0_i32, %c0_i32_0 : i32, i32
  }
  func.func @transform_3(%arg0: i32, %arg1: i32) -> (i32, i32) {
    %c0_i32 = arith.constant 0 : i32
    %c0_i32_0 = arith.constant 0 : i32
    return %arg0, %c0_i32 : i32, i32
  }
  func.func @transform_4(%arg0: i32, %arg1: i32) -> (i32, i32) {
    %c0_i32 = arith.constant 0 : i32
    %c0_i32_0 = arith.constant 0 : i32
    %c0_i32_1 = arith.constant 0 : i32
    return %c0_i32, %c0_i32_0 : i32, i32
  }
  func.func @transform_5(%arg0: i32, %arg1: i32) -> (i32, i32) {
    %c0_i32 = arith.constant 0 : i32
    %c0_i32_0 = arith.constant 0 : i32
    %c0_i32_1 = arith.constant 0 : i32
    return %c0_i32, %c0_i32_0 : i32, i32
  }
  func.func @transform_6(%arg0: i32, %arg1: i32) -> (i32, i32) {
    %c0_i32 = arith.constant 0 : i32
    %c0_i32_0 = arith.constant 0 : i32
    return %arg0, %c0_i32 : i32, i32
  }
}

module attributes {stable_mosaic.version = 11 : i64} {
  func.func @_matmul_kernel(%arg0: i32, %arg1: i32, %arg2: i32, %arg3: memref<32x128xbf16, #tpu.memory_space<vmem>>, %arg4: memref<128x512xbf16, #tpu.memory_space<vmem>>, %arg5: memref<1x512xf32, #tpu.memory_space<vmem>>, %arg6: memref<32x512xbf16, #tpu.memory_space<vmem>>, %arg7: memref<32x512xf32, #tpu.memory_space<vmem>>) attributes {dimension_semantics = [#tpu.dimension_semantics<parallel>, #tpu.dimension_semantics<parallel>, #tpu.dimension_semantics<arbitrary>], iteration_bounds = array<i64: 1, 1, 1>, scalar_prefetch = 0 : i64, scratch_operands = 1 : i64, tpu.core_type = #tpu.core_type<tc>, window_params = [{transform_indices = @transform_0, window_bounds = array<i64: 32, 128>}, {transform_indices = @transform_1, window_bounds = array<i64: 128, 512>}, {transform_indices = @transform_2, window_bounds = array<i64: 1, 512>}, {transform_indices = @transform_3, window_bounds = array<i64: 32, 512>}]} {
    %c0_i32 = arith.constant 0 : i32
    %0 = arith.cmpi eq, %arg2, %c0_i32 : i32
    %1 = arith.extui %0 : i1 to i32
    %c0_i32_0 = arith.constant 0 : i32
    %2 = arith.cmpi ne, %1, %c0_i32_0 : i32
    scf.if %2 {
      %cst_10 = arith.constant 0.000000e+00 : f32
      %12 = vector.broadcast %cst_10 : f32 to vector<32x512xf32>
      %c0_11 = arith.constant 0 : index
      %c0_12 = arith.constant 0 : index
      %13 = vector.load %arg7[%c0_11, %c0_12] : memref<32x512xf32, #tpu.memory_space<vmem>>, vector<32x512xf32>
      tpu.vector_store %arg7[%c0_11, %c0_12], %12 {strides = array<i32>} : memref<32x512xf32, #tpu.memory_space<vmem>>, vector<32x512xf32>,
    } else {
    }
    %c0 = arith.constant 0 : index
    %c0_1 = arith.constant 0 : index
    %3 = vector.load %arg7[%c0, %c0_1] : memref<32x512xf32, #tpu.memory_space<vmem>>, vector<32x512xf32>
    %c0_2 = arith.constant 0 : index
    %c0_3 = arith.constant 0 : index
    %4 = vector.load %arg3[%c0_2, %c0_3] : memref<32x128xbf16, #tpu.memory_space<vmem>>, vector<32x128xbf16>
    %c0_4 = arith.constant 0 : index
    %c0_5 = arith.constant 0 : index
    %5 = vector.load %arg4[%c0_4, %c0_5] : memref<128x512xbf16, #tpu.memory_space<vmem>>, vector<128x512xbf16>
    %cst = arith.constant dense<0.000000e+00> : vector<32x512xf32>
    %6 = tpu.matmul %4, %5, %cst {dimension_numbers = #tpu.dot_dimension_numbers<[1], [0], [0], [1], [0, 0, 1, 1], [], []>} : vector<32x128xbf16>, vector<128x512xbf16>, vector<32x512xf32> -> vector<32x512xf32>
    %7 = arith.addf %3, %6 : vector<32x512xf32>
    %c0_6 = arith.constant 0 : index
    %c0_7 = arith.constant 0 : index
    %8 = vector.load %arg7[%c0_6, %c0_7] : memref<32x512xf32, #tpu.memory_space<vmem>>, vector<32x512xf32>
    tpu.vector_store %arg7[%c0_6, %c0_7], %7 {strides = array<i32>} : memref<32x512xf32, #tpu.memory_space<vmem>>, vector<32x512xf32>,
    %c0_i32_8 = arith.constant 0 : i32
    %9 = arith.cmpi eq, %arg2, %c0_i32_8 : i32
    %10 = arith.extui %9 : i1 to i32
    %c0_i32_9 = arith.constant 0 : i32
    %11 = arith.cmpi ne, %10, %c0_i32_9 : i32
    scf.if %11 {
      %c0_10 = arith.constant 0 : index
      %c0_11 = arith.constant 0 : index
      %12 = vector.load %arg7[%c0_10, %c0_11] : memref<32x512xf32, #tpu.memory_space<vmem>>, vector<32x512xf32>
      %c0_12 = arith.constant 0 : index
      %c0_13 = arith.constant 0 : index
      %13 = vector.load %arg5[%c0_12, %c0_13] : memref<1x512xf32, #tpu.memory_space<vmem>>, vector<1x512xf32>
      %14 = vector.broadcast %13 : vector<1x512xf32> to vector<32x512xf32>
      %15 = arith.addf %12, %14 : vector<32x512xf32>
      %16 = arith.truncf %15 : vector<32x512xf32> to vector<32x512xbf16>
      %c0_14 = arith.constant 0 : index
      %c0_15 = arith.constant 0 : index
      %17 = vector.load %arg6[%c0_14, %c0_15] : memref<32x512xbf16, #tpu.memory_space<vmem>>, vector<32x512xbf16>
      tpu.vector_store %arg6[%c0_14, %c0_15], %16 {strides = array<i32>} : memref<32x512xbf16, #tpu.memory_space<vmem>>, vector<32x512xbf16>,
    } else {
    }
    return
  }
  func.func @transform_0(%arg0: i32, %arg1: i32, %arg2: i32) -> (i32, i32) {
    %c0_i32 = arith.constant 0 : i32
    return %arg0, %arg2 : i32, i32
  }
  func.func @transform_1(%arg0: i32, %arg1: i32, %arg2: i32) -> (i32, i32) {
    %c0_i32 = arith.constant 0 : i32
    return %arg2, %arg1 : i32, i32
  }
  func.func @transform_2(%arg0: i32, %arg1: i32, %arg2: i32) -> (i32, i32) {
    %c0_i32 = arith.constant 0 : i32
    %c0_i32_0 = arith.constant 0 : i32
    return %c0_i32, %arg1 : i32, i32
  }
  func.func @transform_3(%arg0: i32, %arg1: i32, %arg2: i32) -> (i32, i32) {
    %c0_i32 = arith.constant 0 : i32
    return %arg0, %arg1 : i32, i32
  }
}

module attributes {stable_mosaic.version = 11 : i64} {
  func.func @_flash_attn_kernel(%arg0: i32, %arg1: i32, %arg2: i32, %arg3: i32, %arg4: memref<1x16x128xbf16, #tpu.memory_space<vmem>>, %arg5: memref<1x16x128xbf16, #tpu.memory_space<vmem>>, %arg6: memref<1x16x128xbf16, #tpu.memory_space<vmem>>, %arg7: memref<1x16x128xbf16, #tpu.memory_space<vmem>>, %arg8: memref<16x1xf32, #tpu.memory_space<vmem>>, %arg9: memref<16x1xf32, #tpu.memory_space<vmem>>, %arg10: memref<16x128xf32, #tpu.memory_space<vmem>>) attributes {dimension_semantics = [#tpu.dimension_semantics<parallel>, #tpu.dimension_semantics<parallel>, #tpu.dimension_semantics<parallel>, #tpu.dimension_semantics<arbitrary>], iteration_bounds = array<i64: 2, 4, 1, 1>, scalar_prefetch = 0 : i64, scratch_operands = 3 : i64, tpu.core_type = #tpu.core_type<tc>, window_params = [{transform_indices = @transform_0, window_bounds = array<i64: 1, 16, 128>}, {transform_indices = @transform_1, window_bounds = array<i64: 1, 16, 128>}, {transform_indices = @transform_2, window_bounds = array<i64: 1, 16, 128>}, {transform_indices = @transform_3, window_bounds = array<i64: 1, 16, 128>}]} {
    %c0_i32 = arith.constant 0 : i32
    %0 = arith.cmpi eq, %arg3, %c0_i32 : i32
    %1 = arith.extui %0 : i1 to i32
    %c0_i32_0 = arith.constant 0 : i32
    %2 = arith.cmpi ne, %1, %c0_i32_0 : i32
    scf.if %2 {
      %cst_28 = arith.constant 0xFF800000 : f32
      %47 = vector.broadcast %cst_28 : f32 to vector<16x1xf32>
      %c0_29 = arith.constant 0 : index
      %c0_30 = arith.constant 0 : index
      %48 = vector.load %arg8[%c0_29, %c0_30] : memref<16x1xf32, #tpu.memory_space<vmem>>, vector<16x1xf32>
      tpu.vector_store %arg8[%c0_29, %c0_30], %47 {strides = array<i32>} : memref<16x1xf32, #tpu.memory_space<vmem>>, vector<16x1xf32>,
      %cst_31 = arith.constant 0.000000e+00 : f32
      %49 = vector.broadcast %cst_31 : f32 to vector<16x1xf32>
      %c0_32 = arith.constant 0 : index
      %c0_33 = arith.constant 0 : index
      %50 = vector.load %arg9[%c0_32, %c0_33] : memref<16x1xf32, #tpu.memory_space<vmem>>, vector<16x1xf32>
      tpu.vector_store %arg9[%c0_32, %c0_33], %49 {strides = array<i32>} : memref<16x1xf32, #tpu.memory_space<vmem>>, vector<16x1xf32>,
      %cst_34 = arith.constant 0.000000e+00 : f32
      %51 = vector.broadcast %cst_34 : f32 to vector<16x128xf32>
      %c0_35 = arith.constant 0 : index
      %c0_36 = arith.constant 0 : index
      %52 = vector.load %arg10[%c0_35, %c0_36] : memref<16x128xf32, #tpu.memory_space<vmem>>, vector<16x128xf32>
      tpu.vector_store %arg10[%c0_35, %c0_36], %51 {strides = array<i32>} : memref<16x128xf32, #tpu.memory_space<vmem>>, vector<16x128xf32>,
    } else {
    }
    %c0 = arith.constant 0 : index
    %c0_1 = arith.constant 0 : index
    %c0_2 = arith.constant 0 : index
    %3 = vector.load %arg4[%c0, %c0_1, %c0_2] : memref<1x16x128xbf16, #tpu.memory_space<vmem>>, vector<1x16x128xbf16>
    %4 = vector.shape_cast %3 : vector<1x16x128xbf16> to vector<16x128xbf16>
    %c0_3 = arith.constant 0 : index
    %c0_4 = arith.constant 0 : index
    %c0_5 = arith.constant 0 : index
    %5 = vector.load %arg5[%c0_3, %c0_4, %c0_5] : memref<1x16x128xbf16, #tpu.memory_space<vmem>>, vector<1x16x128xbf16>
    %6 = vector.shape_cast %5 : vector<1x16x128xbf16> to vector<16x128xbf16>
    %c0_6 = arith.constant 0 : index
    %c0_7 = arith.constant 0 : index
    %c0_8 = arith.constant 0 : index
    %7 = vector.load %arg6[%c0_6, %c0_7, %c0_8] : memref<1x16x128xbf16, #tpu.memory_space<vmem>>, vector<1x16x128xbf16>
    %8 = vector.shape_cast %7 : vector<1x16x128xbf16> to vector<16x128xbf16>
    %cst = arith.constant dense<0.000000e+00> : vector<16x16xf32>
    %9 = tpu.matmul %4, %6, %cst {dimension_numbers = #tpu.dot_dimension_numbers<[1], [1], [0], [0], [0, 0, 1, 0], [], []>} : vector<16x128xbf16>, vector<16x128xbf16>, vector<16x16xf32> -> vector<16x16xf32>
    %c16_i32 = arith.constant 16 : i32
    %10 = arith.muli %arg3, %c16_i32 : i32
    %11 = tpu.iota {dimensions = array<i32: 1>} : vector<1x16xi32>
    %12 = vector.broadcast %10 : i32 to vector<1x16xi32>
    %13 = arith.addi %12, %11 : vector<1x16xi32>
    %c10_i32 = arith.constant 10 : i32
    %14 = vector.broadcast %c10_i32 : i32 to vector<1x16xi32>
    %15 = arith.cmpi slt, %13, %14 : vector<1x16xi32>
    %cst_9 = arith.constant 0.000000e+00 : f32
    %cst_10 = arith.constant -1.000000e+30 : f32
    %16 = vector.broadcast %cst_9 : f32 to vector<1x16xf32>
    %17 = vector.broadcast %cst_10 : f32 to vector<1x16xf32>
    %18 = arith.select %15, %16, %17 : vector<1x16xi1>, vector<1x16xf32>
    %19 = vector.broadcast %18 : vector<1x16xf32> to vector<16x16xf32>
    %20 = arith.addf %9, %19 : vector<16x16xf32>
    %c0_11 = arith.constant 0 : index
    %c0_12 = arith.constant 0 : index
    %21 = vector.load %arg8[%c0_11, %c0_12] : memref<16x1xf32, #tpu.memory_space<vmem>>, vector<16x1xf32>
    %cst_13 = arith.constant dense<0xFF800000> : vector<16xf32>
    %22 = vector.multi_reduction <maximumf>, %20, %cst_13 [1] : vector<16x16xf32> to vector<16xf32>
    %23 = vector.shape_cast %22 : vector<16xf32> to vector<16x1xf32>
    %24 = arith.maximumf %21, %23 : vector<16x1xf32>
    %25 = arith.subf %21, %24 : vector<16x1xf32>
    %26 = math.exp %25 : vector<16x1xf32>
    %27 = vector.broadcast %24 : vector<16x1xf32> to vector<16x16xf32>
    %28 = arith.subf %20, %27 : vector<16x16xf32>
    %29 = math.exp %28 : vector<16x16xf32>
    %c0_14 = arith.constant 0 : index
    %c0_15 = arith.constant 0 : index
    %30 = vector.load %arg9[%c0_14, %c0_15] : memref<16x1xf32, #tpu.memory_space<vmem>>, vector<16x1xf32>
    %31 = arith.mulf %26, %30 : vector<16x1xf32>
    %cst_16 = arith.constant dense<0.000000e+00> : vector<16xf32>
    %32 = vector.multi_reduction <add>, %29, %cst_16 [1] : vector<16x16xf32> to vector<16xf32>
    %33 = vector.shape_cast %32 : vector<16xf32> to vector<16x1xf32>
    %34 = arith.addf %31, %33 : vector<16x1xf32>
    %c0_17 = arith.constant 0 : index
    %c0_18 = arith.constant 0 : index
    %35 = vector.load %arg9[%c0_17, %c0_18] : memref<16x1xf32, #tpu.memory_space<vmem>>, vector<16x1xf32>
    tpu.vector_store %arg9[%c0_17, %c0_18], %34 {strides = array<i32>} : memref<16x1xf32, #tpu.memory_space<vmem>>, vector<16x1xf32>,
    %c0_19 = arith.constant 0 : index
    %c0_20 = arith.constant 0 : index
    %36 = vector.load %arg10[%c0_19, %c0_20] : memref<16x128xf32, #tpu.memory_space<vmem>>, vector<16x128xf32>
    %37 = vector.broadcast %26 : vector<16x1xf32> to vector<16x128xf32>
    %38 = arith.mulf %37, %36 : vector<16x128xf32>
    %39 = arith.truncf %29 : vector<16x16xf32> to vector<16x16xbf16>
    %cst_21 = arith.constant dense<0.000000e+00> : vector<16x128xf32>
    %40 = tpu.matmul %39, %8, %cst_21 {dimension_numbers = #tpu.dot_dimension_numbers<[1], [0], [0], [1], [0, 0, 1, 1], [], []>} : vector<16x16xbf16>, vector<16x128xbf16>, vector<16x128xf32> -> vector<16x128xf32>
    %41 = arith.addf %38, %40 : vector<16x128xf32>
    %c0_22 = arith.constant 0 : index
    %c0_23 = arith.constant 0 : index
    %42 = vector.load %arg10[%c0_22, %c0_23] : memref<16x128xf32, #tpu.memory_space<vmem>>, vector<16x128xf32>
    tpu.vector_store %arg10[%c0_22, %c0_23], %41 {strides = array<i32>} : memref<16x128xf32, #tpu.memory_space<vmem>>, vector<16x128xf32>,
    %c0_24 = arith.constant 0 : index
    %c0_25 = arith.constant 0 : index
    %43 = vector.load %arg8[%c0_24, %c0_25] : memref<16x1xf32, #tpu.memory_space<vmem>>, vector<16x1xf32>
    tpu.vector_store %arg8[%c0_24, %c0_25], %24 {strides = array<i32>} : memref<16x1xf32, #tpu.memory_space<vmem>>, vector<16x1xf32>,
    %c0_i32_26 = arith.constant 0 : i32
    %44 = arith.cmpi eq, %arg3, %c0_i32_26 : i32
    %45 = arith.extui %44 : i1 to i32
    %c0_i32_27 = arith.constant 0 : i32
    %46 = arith.cmpi ne, %45, %c0_i32_27 : i32
    scf.if %46 {
      %c0_28 = arith.constant 0 : index
      %c0_29 = arith.constant 0 : index
      %47 = vector.load %arg10[%c0_28, %c0_29] : memref<16x128xf32, #tpu.memory_space<vmem>>, vector<16x128xf32>
      %c0_30 = arith.constant 0 : index
      %c0_31 = arith.constant 0 : index
      %48 = vector.load %arg9[%c0_30, %c0_31] : memref<16x1xf32, #tpu.memory_space<vmem>>, vector<16x1xf32>
      %49 = tpu.reciprocal %48 {approx = true} : vector<16x1xf32> -> vector<16x1xf32>
      %50 = vector.broadcast %49 : vector<16x1xf32> to vector<16x128xf32>
      %51 = arith.mulf %47, %50 : vector<16x128xf32>
      %52 = arith.truncf %51 : vector<16x128xf32> to vector<16x128xbf16>
      %c0_32 = arith.constant 0 : index
      %c0_33 = arith.constant 0 : index
      %c0_34 = arith.constant 0 : index
      %53 = vector.load %arg7[%c0_32, %c0_33, %c0_34] : memref<1x16x128xbf16, #tpu.memory_space<vmem>>, vector<1x16x128xbf16>
      %54 = vector.shape_cast %53 : vector<1x16x128xbf16> to vector<16x128xbf16>
      %55 = vector.shape_cast %52 : vector<16x128xbf16> to vector<1x16x128xbf16>
      tpu.vector_store %arg7[%c0_32, %c0_33, %c0_34], %55 {strides = array<i32>} : memref<1x16x128xbf16, #tpu.memory_space<vmem>>, vector<1x16x128xbf16>,
    } else {
    }
    return
  }
  func.func @transform_0(%arg0: i32, %arg1: i32, %arg2: i32, %arg3: i32) -> (i32, i32, i32) {
    %c0_i32 = arith.constant 0 : i32
    return %arg0, %arg2, %arg1 : i32, i32, i32
  }
  func.func @transform_1(%arg0: i32, %arg1: i32, %arg2: i32, %arg3: i32) -> (i32, i32, i32) {
    %c8_i32 = arith.constant 8 : i32
    %0 = arith.addi %c8_i32, %arg1 : i32
    %c0_i32 = arith.constant 0 : i32
    return %arg0, %arg3, %0 : i32, i32, i32
  }
  func.func @transform_2(%arg0: i32, %arg1: i32, %arg2: i32, %arg3: i32) -> (i32, i32, i32) {
    %c12_i32 = arith.constant 12 : i32
    %0 = arith.addi %c12_i32, %arg1 : i32
    %c0_i32 = arith.constant 0 : i32
    return %arg0, %arg3, %0 : i32, i32, i32
  }
  func.func @transform_3(%arg0: i32, %arg1: i32, %arg2: i32, %arg3: i32) -> (i32, i32, i32) {
    %c0_i32 = arith.constant 0 : i32
    return %arg0, %arg2, %arg1 : i32, i32, i32
  }
}

module attributes {stable_mosaic.version = 11 : i64} {
  func.func @_matmul_kernel(%arg0: i32, %arg1: i32, %arg2: i32, %arg3: memref<32x128xbf16, #tpu.memory_space<vmem>>, %arg4: memref<128x128xbf16, #tpu.memory_space<vmem>>, %arg5: memref<1x128xf32, #tpu.memory_space<vmem>>, %arg6: memref<32x128xbf16, #tpu.memory_space<vmem>>, %arg7: memref<32x128xf32, #tpu.memory_space<vmem>>) attributes {dimension_semantics = [#tpu.dimension_semantics<parallel>, #tpu.dimension_semantics<parallel>, #tpu.dimension_semantics<arbitrary>], iteration_bounds = array<i64: 1, 1, 1>, scalar_prefetch = 0 : i64, scratch_operands = 1 : i64, tpu.core_type = #tpu.core_type<tc>, window_params = [{transform_indices = @transform_0, window_bounds = array<i64: 32, 128>}, {transform_indices = @transform_1, window_bounds = array<i64: 128, 128>}, {transform_indices = @transform_2, window_bounds = array<i64: 1, 128>}, {transform_indices = @transform_3, window_bounds = array<i64: 32, 128>}]} {
    %c0_i32 = arith.constant 0 : i32
    %0 = arith.cmpi eq, %arg2, %c0_i32 : i32
    %1 = arith.extui %0 : i1 to i32
    %c0_i32_0 = arith.constant 0 : i32
    %2 = arith.cmpi ne, %1, %c0_i32_0 : i32
    scf.if %2 {
      %cst_10 = arith.constant 0.000000e+00 : f32
      %12 = vector.broadcast %cst_10 : f32 to vector<32x128xf32>
      %c0_11 = arith.constant 0 : index
      %c0_12 = arith.constant 0 : index
      %13 = vector.load %arg7[%c0_11, %c0_12] : memref<32x128xf32, #tpu.memory_space<vmem>>, vector<32x128xf32>
      tpu.vector_store %arg7[%c0_11, %c0_12], %12 {strides = array<i32>} : memref<32x128xf32, #tpu.memory_space<vmem>>, vector<32x128xf32>,
    } else {
    }
    %c0 = arith.constant 0 : index
    %c0_1 = arith.constant 0 : index
    %3 = vector.load %arg7[%c0, %c0_1] : memref<32x128xf32, #tpu.memory_space<vmem>>, vector<32x128xf32>
    %c0_2 = arith.constant 0 : index
    %c0_3 = arith.constant 0 : index
    %4 = vector.load %arg3[%c0_2, %c0_3] : memref<32x128xbf16, #tpu.memory_space<vmem>>, vector<32x128xbf16>
    %c0_4 = arith.constant 0 : index
    %c0_5 = arith.constant 0 : index
    %5 = vector.load %arg4[%c0_4, %c0_5] : memref<128x128xbf16, #tpu.memory_space<vmem>>, vector<128x128xbf16>
    %cst = arith.constant dense<0.000000e+00> : vector<32x128xf32>
    %6 = tpu.matmul %4, %5, %cst {dimension_numbers = #tpu.dot_dimension_numbers<[1], [0], [0], [1], [0, 0, 1, 1], [], []>} : vector<32x128xbf16>, vector<128x128xbf16>, vector<32x128xf32> -> vector<32x128xf32>
    %7 = arith.addf %3, %6 : vector<32x128xf32>
    %c0_6 = arith.constant 0 : index
    %c0_7 = arith.constant 0 : index
    %8 = vector.load %arg7[%c0_6, %c0_7] : memref<32x128xf32, #tpu.memory_space<vmem>>, vector<32x128xf32>
    tpu.vector_store %arg7[%c0_6, %c0_7], %7 {strides = array<i32>} : memref<32x128xf32, #tpu.memory_space<vmem>>, vector<32x128xf32>,
    %c0_i32_8 = arith.constant 0 : i32
    %9 = arith.cmpi eq, %arg2, %c0_i32_8 : i32
    %10 = arith.extui %9 : i1 to i32
    %c0_i32_9 = arith.constant 0 : i32
    %11 = arith.cmpi ne, %10, %c0_i32_9 : i32
    scf.if %11 {
      %c0_10 = arith.constant 0 : index
      %c0_11 = arith.constant 0 : index
      %12 = vector.load %arg7[%c0_10, %c0_11] : memref<32x128xf32, #tpu.memory_space<vmem>>, vector<32x128xf32>
      %c0_12 = arith.constant 0 : index
      %c0_13 = arith.constant 0 : index
      %13 = vector.load %arg5[%c0_12, %c0_13] : memref<1x128xf32, #tpu.memory_space<vmem>>, vector<1x128xf32>
      %14 = vector.broadcast %13 : vector<1x128xf32> to vector<32x128xf32>
      %15 = arith.addf %12, %14 : vector<32x128xf32>
      %cst_14 = arith.constant 0.000000e+00 : f32
      %16 = vector.broadcast %cst_14 : f32 to vector<32x128xf32>
      %17 = arith.maximumf %15, %16 : vector<32x128xf32>
      %18 = arith.truncf %17 : vector<32x128xf32> to vector<32x128xbf16>
      %c0_15 = arith.constant 0 : index
      %c0_16 = arith.constant 0 : index
      %19 = vector.load %arg6[%c0_15, %c0_16] : memref<32x128xbf16, #tpu.memory_space<vmem>>, vector<32x128xbf16>
      tpu.vector_store %arg6[%c0_15, %c0_16], %18 {strides = array<i32>} : memref<32x128xbf16, #tpu.memory_space<vmem>>, vector<32x128xbf16>,
    } else {
    }
    return
  }
  func.func @transform_0(%arg0: i32, %arg1: i32, %arg2: i32) -> (i32, i32) {
    %c0_i32 = arith.constant 0 : i32
    return %arg0, %arg2 : i32, i32
  }
  func.func @transform_1(%arg0: i32, %arg1: i32, %arg2: i32) -> (i32, i32) {
    %c0_i32 = arith.constant 0 : i32
    return %arg2, %arg1 : i32, i32
  }
  func.func @transform_2(%arg0: i32, %arg1: i32, %arg2: i32) -> (i32, i32) {
    %c0_i32 = arith.constant 0 : i32
    %c0_i32_0 = arith.constant 0 : i32
    return %c0_i32, %arg1 : i32, i32
  }
  func.func @transform_3(%arg0: i32, %arg1: i32, %arg2: i32) -> (i32, i32) {
    %c0_i32 = arith.constant 0 : i32
    return %arg0, %arg1 : i32, i32
  }
}

module attributes {stable_mosaic.version = 11 : i64} {
  func.func @_matmul_kernel(%arg0: i32, %arg1: i32, %arg2: i32, %arg3: memref<32x128xbf16, #tpu.memory_space<vmem>>, %arg4: memref<128x128xbf16, #tpu.memory_space<vmem>>, %arg5: memref<1x128xf32, #tpu.memory_space<vmem>>, %arg6: memref<32x128xbf16, #tpu.memory_space<vmem>>, %arg7: memref<32x128xf32, #tpu.memory_space<vmem>>) attributes {dimension_semantics = [#tpu.dimension_semantics<parallel>, #tpu.dimension_semantics<parallel>, #tpu.dimension_semantics<arbitrary>], iteration_bounds = array<i64: 1, 1, 1>, scalar_prefetch = 0 : i64, scratch_operands = 1 : i64, tpu.core_type = #tpu.core_type<tc>, window_params = [{transform_indices = @transform_0, window_bounds = array<i64: 32, 128>}, {transform_indices = @transform_1, window_bounds = array<i64: 128, 128>}, {transform_indices = @transform_2, window_bounds = array<i64: 1, 128>}, {transform_indices = @transform_3, window_bounds = array<i64: 32, 128>}]} {
    %c0_i32 = arith.constant 0 : i32
    %0 = arith.cmpi eq, %arg2, %c0_i32 : i32
    %1 = arith.extui %0 : i1 to i32
    %c0_i32_0 = arith.constant 0 : i32
    %2 = arith.cmpi ne, %1, %c0_i32_0 : i32
    scf.if %2 {
      %cst_10 = arith.constant 0.000000e+00 : f32
      %12 = vector.broadcast %cst_10 : f32 to vector<32x128xf32>
      %c0_11 = arith.constant 0 : index
      %c0_12 = arith.constant 0 : index
      %13 = vector.load %arg7[%c0_11, %c0_12] : memref<32x128xf32, #tpu.memory_space<vmem>>, vector<32x128xf32>
      tpu.vector_store %arg7[%c0_11, %c0_12], %12 {strides = array<i32>} : memref<32x128xf32, #tpu.memory_space<vmem>>, vector<32x128xf32>,
    } else {
    }
    %c0 = arith.constant 0 : index
    %c0_1 = arith.constant 0 : index
    %3 = vector.load %arg7[%c0, %c0_1] : memref<32x128xf32, #tpu.memory_space<vmem>>, vector<32x128xf32>
    %c0_2 = arith.constant 0 : index
    %c0_3 = arith.constant 0 : index
    %4 = vector.load %arg3[%c0_2, %c0_3] : memref<32x128xbf16, #tpu.memory_space<vmem>>, vector<32x128xbf16>
    %c0_4 = arith.constant 0 : index
    %c0_5 = arith.constant 0 : index
    %5 = vector.load %arg4[%c0_4, %c0_5] : memref<128x128xbf16, #tpu.memory_space<vmem>>, vector<128x128xbf16>
    %cst = arith.constant dense<0.000000e+00> : vector<32x128xf32>
    %6 = tpu.matmul %4, %5, %cst {dimension_numbers = #tpu.dot_dimension_numbers<[1], [0], [0], [1], [0, 0, 1, 1], [], []>} : vector<32x128xbf16>, vector<128x128xbf16>, vector<32x128xf32> -> vector<32x128xf32>
    %7 = arith.addf %3, %6 : vector<32x128xf32>
    %c0_6 = arith.constant 0 : index
    %c0_7 = arith.constant 0 : index
    %8 = vector.load %arg7[%c0_6, %c0_7] : memref<32x128xf32, #tpu.memory_space<vmem>>, vector<32x128xf32>
    tpu.vector_store %arg7[%c0_6, %c0_7], %7 {strides = array<i32>} : memref<32x128xf32, #tpu.memory_space<vmem>>, vector<32x128xf32>,
    %c0_i32_8 = arith.constant 0 : i32
    %9 = arith.cmpi eq, %arg2, %c0_i32_8 : i32
    %10 = arith.extui %9 : i1 to i32
    %c0_i32_9 = arith.constant 0 : i32
    %11 = arith.cmpi ne, %10, %c0_i32_9 : i32
    scf.if %11 {
      %c0_10 = arith.constant 0 : index
      %c0_11 = arith.constant 0 : index
      %12 = vector.load %arg7[%c0_10, %c0_11] : memref<32x128xf32, #tpu.memory_space<vmem>>, vector<32x128xf32>
      %c0_12 = arith.constant 0 : index
      %c0_13 = arith.constant 0 : index
      %13 = vector.load %arg5[%c0_12, %c0_13] : memref<1x128xf32, #tpu.memory_space<vmem>>, vector<1x128xf32>
      %14 = vector.broadcast %13 : vector<1x128xf32> to vector<32x128xf32>
      %15 = arith.addf %12, %14 : vector<32x128xf32>
      %16 = arith.truncf %15 : vector<32x128xf32> to vector<32x128xbf16>
      %c0_14 = arith.constant 0 : index
      %c0_15 = arith.constant 0 : index
      %17 = vector.load %arg6[%c0_14, %c0_15] : memref<32x128xbf16, #tpu.memory_space<vmem>>, vector<32x128xbf16>
      tpu.vector_store %arg6[%c0_14, %c0_15], %16 {strides = array<i32>} : memref<32x128xbf16, #tpu.memory_space<vmem>>, vector<32x128xbf16>,
    } else {
    }
    return
  }
  func.func @transform_0(%arg0: i32, %arg1: i32, %arg2: i32) -> (i32, i32) {
    %c0_i32 = arith.constant 0 : i32
    return %arg0, %arg2 : i32, i32
  }
  func.func @transform_1(%arg0: i32, %arg1: i32, %arg2: i32) -> (i32, i32) {
    %c0_i32 = arith.constant 0 : i32
    return %arg2, %arg1 : i32, i32
  }
  func.func @transform_2(%arg0: i32, %arg1: i32, %arg2: i32) -> (i32, i32) {
    %c0_i32 = arith.constant 0 : i32
    %c0_i32_0 = arith.constant 0 : i32
    return %c0_i32, %arg1 : i32, i32
  }
  func.func @transform_3(%arg0: i32, %arg1: i32, %arg2: i32) -> (i32, i32) {
    %c0_i32 = arith.constant 0 : i32
    return %arg0, %arg1 : i32, i32
  }
}

</mosaic_0001>

<bundles_post_ra>
// kernel: decoder_forward.13
= control target key start
LH: loop header
LB: loop body
LE: loop exit
PB: predicated region body
PF: predicated region fallthrough
CT: control target
= control target key end

     0   :  { %8 = vsyncpa [#allocation4], 0  ;;  %s228_s15 = smov [#allocation3]   ;;  %s229_s17 = smov 64   ;;  %s263_s0 = inlined_call_operand.vmem [shape: bf16[16,128], index: 0, kind: input, shape index: {}]   ;;  %s264_s1 = inlined_call_operand.hbm [shape: bf16[128,128], index: 1, kind: input, shape index: {}]   ;;  %s265_s2 = inlined_call_operand.vmem [shape: f32[1,128], index: 2, kind: input, shape index: {}]   ;;  %s266_s3 = inlined_call_operand.vmem [shape: bf16[16,128], index: 3, kind: output, shape index: {}]  }
   0x1   :  { %s15_s14 = sshll.u32 %s264_s1, 4  ;;  %s17_s16 = sshll.u32 %s228_s15, 4  ;;  %s16_s14 = int_to_ptr.hbm [resolvable:$true] %s15_s14  ;;  %s18_s16 = int_to_ptr.vmem [resolvable:$true] %s17_s16 }
   0x2   :  { %s230_s18 = smov 4  }
   0x3   :  { %23 = dma.hbm_to_vmem [thread:$0]  %s16_s14, 1024, %s18_s16, [#allocation4], %s229_s17, %s229_s17, %s230_s18  }
   0x4   :  { %226 = dma.done.wait [#allocation4], 1024  }
   0x5   :  { %227 = vsyncadd [#allocation4], 4294966272  ;;  %v192_v0 = vld [vmem:[#allocation3 + $0x38] sm:$0xff]  ;;  %v191_v1 = vld [vmem:[#allocation3 + $0x30] sm:$0xff] }
   0x6   :  { %110 = vmatpush.bf16.msra.mxu0 %v192_v0  ;;  %v190_v2 = vld [vmem:[#allocation3 + $0x28] sm:$0xff]  ;;  %v189_v3 = vld [vmem:[#allocation3 + $0x20] sm:$0xff]  ;;  %v188_v4 = vld [vmem:[#allocation3 + $0x18] sm:$0xff] }
   0x7   :  { %v187_v5 = vld [vmem:[#allocation3 + $0x10] sm:$0xff]  ;;  %v186_v6 = vld [vmem:[#allocation3 + $0x8] sm:$0xff]  ;;  %v185_v7 = vld [vmem:[#allocation3] sm:$0xff] }
   0x8   :  { %v184_v8 = vld [vmem:[%s263_s0] sm:$0xff] }
   0x9   :  { %v201_v10 = vld [vmem:[%s265_s2] ss:$0 sm:$0xff] }
   0xa   :  { %111 = vmatpush.bf16.msra.mxu0 %v191_v1 }
   0xe   :  { %112 = vmatpush.bf16.msra.mxu0 %v190_v2 }
  0x12   :  { %113 = vmatpush.bf16.msra.mxu0 %v189_v3 }
  0x16   :  { %114 = vmatpush.bf16.msra.mxu0 %v188_v4 }
  0x1a   :  { %115 = vmatpush.bf16.msra.mxu0 %v187_v5 }
  0x1e   :  { %116 = vmatpush.bf16.msra.mxu0 %v186_v6 }
  0x22   :  { %117 = vmatpush.bf16.msra.mxu0 %v185_v7 }
  0x25   :  { %118 = vmatmul.bf16.vlgmr.msra.gmra.mxu0 %v184_v8 }
  0xa2   :  { %v119_v9 = vpop.f32.mrf.mxu0 }
  0xa3   :  { %v137_v12 = vadd.f32 %v201_v10, %v119_v9 }
  0xaa   :  { %v121_v11 = vpop.f32.mrf.mxu0 }
  0xab   :  { %v138_v13 = vadd.f32 %v201_v10, %v121_v11 }
  0xad   :  { %v196_v14 = vpack.c.bf16 %v138_v13, %v137_v12 }
  0xaf   :  { %197 = vst [vmem:[%s266_s3] sm:$0xff] %v196_v14  }
  0xb0   :  { %147 = vsyncpa [#allocation4], 1 }

// kernel: decoder_forward.16
= control target key start
LH: loop header
LB: loop body
LE: loop exit
PB: predicated region body
PF: predicated region fallthrough
CT: control target
= control target key end

     0   :  { %s998_s12 = smov 0   ;;  %s1000_s13 = smov 0   ;;  %s1173_s0 = inlined_call_operand.vmem [shape: bf16[2,16,512], index: 0, kind: input, shape index: {}]   ;;  %s1174_s1 = inlined_call_operand.vmem [shape: bf16[2,16,2048], index: 1, kind: input, shape index: {}, may-alias: {1,2}]   ;;  %s1175_s2 = inlined_call_operand.vmem [shape: bf16[2,16,2048], index: 2, kind: input, shape index: {}, may-alias: {1,2}]   ;;  %s1176_s3 = inlined_call_operand.vmem [shape: bf16[2,16,512], index: 3, kind: output, shape index: {}]  }
   0x1   :  { %s1002_s14 = smov 0   ;;  %s1004_s15 = smov 0  }
   0x2   :  { %s1006_s16 = smov 0   ;;  %s1008_s17 = smov 0  }
   0x3   :  { %s1010_s18 = smov 0   ;;  %s1012_s19 = smov 0  }
   0x4   :  { %s1014_s20 = smov 0  }
   0x5 LB: > { %s765_s21 = sadd.s32 4294967295, %s972_s20   ;;  %s35_s22 = sadd.s32 1, %s964_s18  ;;  %s972_s20 = sphi %s1014_s20, %s13_s20   ;;  %s968_s19 = sphi %s1012_s19, %s1190_s19   ;;  %s964_s18 = sphi %s1010_s18, %s1189_s18   ;;  %s960_s17 = sphi %s1008_s17, %s1188_s17   ;;  %s956_s16 = sphi %s1006_s16, %s1187_s16   ;;  %s952_s15 = sphi %s1004_s15, %s1186_s15   ;;  %s948_s14 = sphi %s1002_s14, %s1185_s14   ;;  %s944_s13 = sphi %s1000_s13, %s1184_s13   ;;  %s940_s12 = sphi %s998_s12, %s1183_s12  }
   0x6   : > { %p37_p0 = scmp.ge.s32.totalorder %s35_s22, 4  ;;  %s39_s23 = sadd.s32 1, %s968_s19 }
   0x7   : > { %s50_s24 = sadd.s32 1, %s952_s15  ;;  %p57_p1 = scmp.ne.s32.totalorder %s952_s15, %s948_s14 }
   0x8   : > { %s1192_s22 = smov (%p37_p0, %s35_s22), 0  ;;  %s1194_s23 = smov (!%p37_p0, %s39_s23), %s968_s19 }
   0x9   : > { %s46_s25 = ssub.s32 %s964_s18, %s1192_s22  ;;  %p58_p2 = scmp.eq.s32.totalorder %s972_s20, 0 }
   0xa   : > { %p41_p3 = scmp.ge.s32.totalorder %s1194_s23, 2  ;;  %s103_s26 = sadd.s32 4, %s964_s18 }
   0xb   : > { %p1061_p4 = por %p58_p2, %p57_p1  ;;  %s104_s28 = sadd.s32 4, %s1192_s22 }
   0xc   : > { %s1196_s23 = smov (%p41_p3, %s1194_s23), 0  ;;  %s108_s29 = ssub.s32 %s103_s26, %s104_s28 }
   0xd   : > { %1179 = sst [smem:[#allocation9_spill]] %s1196_s23  ;;  %s112_s30 = sadd.s32 1, %s944_s13 }
   0xe   : > { %s43_s4 = ssub.s32 %s968_s19, %s1196_s23  ;;  %p119_p5 = scmp.ne.s32.totalorder %s944_s13, %s940_s12 }
   0xf   : > { %s47_s5 = sor.u32 %s46_s25, %s43_s4  ;;  %s109_s6 = sor.u32 %s108_s29, %s43_s4 }
  0x10   : > { %p48_p6 = scmp.eq.s32.totalorder %s47_s5, 0  ;;  %p110_p7 = scmp.eq.s32.totalorder %s109_s6, 0 }
  0x11   : > { %p1075_p8 = por %p119_p5, %p58_p2  ;;  %p153_p9 = scmp.eq.s32.totalorder %s765_s21, 7 }
  0x12   : > { %s1080_s8 = scalar_select %p48_p6, %s952_s15, %s50_s24  }
  0x13   : > { %s1083_s9 = scalar_select %p110_p7, %s944_s13, %s112_s30  }
  0x14   : > { %p1088_p10 = por %p153_p9, %p57_p1  ;;  %p768_p11 = scmp.ge.s32.totalorder %s972_s20, 8 }
  0x16   : > { %175 = sbr.rel (%p768_p11) target bundleno = 51 (0x33), region = 16 }
  0x1b   : > { %178 = sbr.rel (!%p1061_p4) target bundleno = 35 (0x23), region = 20  ;;  %s180_s11 = sand.u32 (%p1061_p4), 1, %s952_s15  }
  0x1c   : > { %s770_s21 = sshll.u32 (%p1061_p4), %s968_s19, 3  ;;  %s769_s24 = sshll.u32 (%p1061_p4), %s180_s11, 3 }
  0x1d   : > { %s187_s25 = sadd.s32 (%p1061_p4), %s964_s18, %s770_s21  ;;  %s182_s4 = scalar_lea.vmem (%p1061_p4), [#allocation5], %s769_s24 }
  0x1e   : > { %s771_s26 = sshll.u32 (%p1061_p4), %s187_s25, 2 }
  0x1f   : > { %s189_s30 = scalar_lea.vmem (%p1061_p4), %s1173_s0, %s771_s26 }
  0x20   : > { %v206_v0 = vld [vmem:[%s189_s30] sm:$0xf]  ;;  %v208_v1 = vld [vmem:[%s189_s30 + $0x10] sm:$0xf] }
  0x21   : > { %207 = vst [vmem:[%s182_s4] sm:$0xf] %v206_v0 }
  0x22   : > { %209 = vst [vmem:[%s182_s4 + $0x4] sm:$0xf] %v208_v1 }
  0x23 PF: > { %237 = sbr.rel (!%p1061_p4) target bundleno = 43 (0x2b), region = 61  ;;  %s239_s5 = sand.u32 (%p1061_p4), 1, %s952_s15  }
  0x24   : > { %s773_s6 = sshll.u32 (%p1061_p4), %s968_s19, 5  ;;  %s772_s11 = sshll.u32 (%p1061_p4), %s239_s5, 3 }
  0x25   : > { %s246_s21 = sadd.s32 (%p1061_p4), %s964_s18, %s773_s6  ;;  %s241_s24 = scalar_lea.vmem (%p1061_p4), [#allocation6], %s772_s11 }
  0x26   : > { %s774_s25 = sshll.u32 (%p1061_p4), %s246_s21, 2 }
  0x27   : > { %s248_s26 = scalar_lea.vmem (%p1061_p4), %s1174_s1, %s774_s25 }
  0x28   : > { %v265_v2 = vld [vmem:[%s248_s26] sm:$0xf] }
  0x29   : > { %v267_v3 = vld [vmem:[%s248_s26 + $0x40] sm:$0xf]  ;;  %266 = vst [vmem:[%s241_s24] sm:$0xf] %v265_v2 }
  0x2a   : > { %268 = vst [vmem:[%s241_s24 + $0x4] sm:$0xf] %v267_v3 }
  0x2b PF: > { %296 = sbr.rel (!%p1075_p8) target bundleno = 51 (0x33), region = 102  ;;  %s298_s27 = sand.u32 (%p1075_p8), 1, %s944_s13  }
  0x2c   : > { %s776_s29 = sshll.u32 (%p1075_p8), %s968_s19, 5  ;;  %s775_s30 = sshll.u32 (%p1075_p8), %s298_s27, 3 }
  0x2d   : > { %s671_s4 = sadd.s32 (%p1075_p8), %s964_s18, %s776_s29  ;;  %s300_s11 = scalar_lea.vmem (%p1075_p8), [#allocation7], %s775_s30 }
  0x2e   : > { %s777_s5 = sshll.u32 (%p1075_p8), %s671_s4, 2 }
  0x2f   : > { %s673_s21 = scalar_lea.vmem (%p1075_p8), %s1175_s2, %s777_s5 }
  0x30   : > { %v778_v4 = vld [vmem:[%s673_s21 + $0x10] sm:$0xf] }
  0x31   : > { %v779_v5 = vld [vmem:[%s673_s21 + $0x50] sm:$0xf]  ;;  %326 = vst [vmem:[%s300_s11] sm:$0xf] %v778_v4 }
  0x32   : > { %328 = vst [vmem:[%s300_s11 + $0x4] sm:$0xf] %v779_v5 }
  0x33 PF: > { %p780_p12 = scmp.ge.s32.totalorder %s972_s20, 1  ;;  %p355_p13 = scmp.lt.s32.totalorder %s972_s20, 9 }
  0x35   : > { %p356_p0 = pnand %p780_p12, %p355_p13 }
  0x36   : > { %s362_s7 = sand.u32 (!%p356_p0), 1, %s948_s14   ;;  %s376_s14 = sand.u32 (!%p356_p0), 1, %s940_s12  }
  0x37   : > { %359 = sbr.rel (%p356_p0) target bundleno = 712 (0x2c8), region = 143  ;;  %s1120_s25 = sshll.u32 (!%p356_p0), %s362_s7, 3 }
  0x38   : > { %s371_s28 = scalar_lea.vmem (!%p356_p0), [#allocation6], %s1120_s25  ;;  %s364_s26 = scalar_lea.vmem (!%p356_p0), [#allocation5], %s1120_s25 }
  0x39   : > { %s783_s24 = sshll.u32 (!%p356_p0), %s376_s14, 3  ;;  %s405_s12 = scalar_lea.vmem (!%p356_p0), [#allocation8], %s1120_s25 }
  0x3a   : > { %s378_s27 = scalar_lea.vmem (!%p356_p0), [#allocation7], %s783_s24 }
  0x3c   : > { %v804_v6 = vld [vmem:[%s371_s28] sm:$0xff]  ;;  %v803_v7 = vld [vmem:[%s364_s26] sm:$0xff]  ;;  %vm416_vm0 = vcmask 7168   ;;  %v974_v8 = vmov -inf   ;;  %v430_v9 = vlaneseq  ;;  %v975_v11 = vmov -1e+30  }
  0x3d   : > { %455 = vmatpush.bf16.xpose.msra.mxu0 %v804_v6  ;;  %417 = vst.msk [vmem:[#allocation2] sm:$0xff] %vm416_vm0, %v974_v8  ;;  %vm464_vm2 = vcmask 130048   ;;  %v976_v19 = vmov 0   ;;  %v977_v20 = vmov 0.0   ;;  %v805_v33 = vld [vmem:[%s378_s27] sm:$0xff]  ;;  %s799_s29 = sshll.u32 (%p1088_p10), %s960_s17, 3 }
  0x3e   : > { %418 = vst.msk [vmem:[#allocation2 + $0x8] sm:$0xff] %vm416_vm0, %v974_v8  ;;  %v431_v10 = vand.u32 127, %v430_v9  ;;  %887 = vset.pattern.permute.xlu1 %v976_v19  ;;  %888 = vset.pattern.permute.xlu0 %v976_v19  ;;  %s590_s30 = sadd.s32 (%p1088_p10), %s956_s16, %s799_s29 }
  0x3f   : > { %889 = vset.pattern.permute.xlu2 %v976_v19  ;;  %419 = vst.msk [vmem:[#allocation3] sm:$0xff] %vm416_vm0, %v977_v20  ;;  %541 = vmatpush.bf16.msra.mxu1 %v805_v33  ;;  %s800_s4 = sshll.u32 (%p1088_p10), %s590_s30, 2 }
  0x40   : > { %vm434_vm1 = vcmp.lt.s32.totalorder %v431_v10, 10  ;;  %420 = vst.msk [vmem:[#allocation3 + $0x8] sm:$0xff] %vm416_vm0, %v977_v20  ;;  %s592_s23 = scalar_lea.vmem (%p1088_p10), %s1176_s3, %s800_s4 }
  0x41   : > { %v435_v12 = vsel %vm434_vm1, 0.0, %v975_v11 }
  0x44   : > { %456 = vmatmul.bf16.vlgmr.msra.gmra.mxu0 %v803_v7  ;;  %v462_v21 = vld [vmem:[#allocation2] sm:$0xff] }
  0x45   : > { %v463_v26 = vld [vmem:[#allocation2 + $0x8] sm:$0xff] }
  0x46   : > { %v495_v45 = vld [vmem:[#allocation3] sm:$0xff] }
  0x47   : > { %v496_v49 = vld [vmem:[#allocation3 + $0x8] sm:$0xff] }
  0xc1   : > { %v457_v13 = vpop.f32.mrf.mxu0 }
  0xc2   : > { %v458_v14 = vadd.f32 %v457_v13, %v435_v12 }
  0xc4   : > { %v465_v15 = vsel %vm464_vm2, %v458_v14, -inf }
  0xc5   : > { %466 = vmax.xlane.f32.xlu0 %v465_v15 }
  0xc9   : > { %v459_v16 = vpop.f32.mrf.mxu0 }
  0xca   : > { %v460_v17 = vadd.f32 %v459_v16, %v435_v12 }
  0xcc   : > { %v468_v18 = vsel %vm464_vm2, %v460_v17, -inf }
  0xcd   : > { %469 = vmax.xlane.f32.xlu0 %v468_v18 }
 0x138   : > { %v467_v22 = vpop.xlane.xlu0 %466 }
 0x139   : > { %v471_v23 = vmax.f32 %v462_v21, %v467_v22 }
 0x13b   : > { %v473_v24 = vsub.f32 %v462_v21, %v471_v23  ;;  %552 = vst.msk [vmem:[#allocation2] sm:$0xff] %vm416_vm0, %v471_v23  ;;  %481 = vperm.xlu1 %887, %v471_v23  }
 0x13d   : > { %v475_v25 = vmul.f32 1.442695, %v473_v24 }
 0x13f   : > { %890 = vpow2.f32 %v475_v25 }
 0x140   : > { %v470_v27 = vpop.xlane.xlu0 %469 }
 0x141   : > { %v472_v28 = vmax.f32 %v463_v26, %v470_v27 }
 0x143   : > { %v474_v29 = vsub.f32 %v463_v26, %v472_v28  ;;  %553 = vst.msk [vmem:[#allocation2 + $0x8] sm:$0xff] %vm416_vm0, %v472_v28  ;;  %486 = vperm.xlu1 %887, %v472_v28  }
 0x145   : > { %v891_v30 = vpop.eup %890  ;;  %v477_v31 = vmul.f32 1.442695, %v474_v29 }
 0x146   : > { %514 = vperm.xlu0 %888, %v891_v30   ;;  %v497_v46 = vmul.f32 %v891_v30, %v495_v45 }
 0x147   : > { %892 = vpow2.f32 %v477_v31 }
 0x14d   : > { %v893_v32 = vpop.eup %892 }
 0x14e   : > { %519 = vperm.xlu1 %887, %v893_v32   ;;  %v498_v50 = vmul.f32 %v893_v32, %v496_v49 }
 0x1ad   : > { %v482_v34 = vpop.permute.xlu1 %481 }
 0x1ae   : > { %v489_v35 = vsub.f32 %v458_v14, %v482_v34 }
 0x1b0   : > { %v491_v36 = vmul.f32 1.442695, %v489_v35 }
 0x1b2   : > { %894 = vpow2.f32 %v491_v36 }
 0x1b5   : > { %v487_v37 = vpop.permute.xlu1 %486 }
 0x1b6   : > { %v490_v38 = vsub.f32 %v460_v17, %v487_v37 }
 0x1b8   : > { %v895_v39 = vpop.eup %894  ;;  %v493_v40 = vmul.f32 1.442695, %v490_v38  ;;  %v515_v59 = vpop.permute.xlu0 %514 }
 0x1b9   : > { %v499_v41 = vsel %vm464_vm2, %v895_v39, 0.0  ;;  %v522_v61 = vmul.f32 0.0, %v515_v59 }
 0x1ba   : > { %896 = vpow2.f32 %v493_v40  ;;  %500 = vadd.xlane.f32.xlu2 %v499_v41 }
 0x1c0   : > { %v897_v42 = vpop.eup %896  ;;  %v520_v58 = vpop.permute.xlu1 %519 }
 0x1c1   : > { %v502_v43 = vsel %vm464_vm2, %v897_v42, 0.0  ;;  %v524_v44 = vpack.c.bf16 %v897_v42, %v895_v39  ;;  %v523_v62 = vmul.f32 0.0, %v520_v58 }
 0x1c2   : > { %503 = vadd.xlane.f32.xlu2 %v502_v43 }
 0x1c3   : > { %797 = vmatmul.msk.bf16.vlgmr.msra.gmra.mxu1 %vm464_vm2, %v524_v44 }
 0x22d   : > { %v501_v47 = vpop.xlane.xlu2 %500 }
 0x22e   : > { %v505_v48 = vadd.f32 %v501_v47, %v497_v46 }
 0x230   : > { %508 = vst.msk [vmem:[#allocation3] sm:$0xff] %vm416_vm0, %v505_v48 }
 0x235   : > { %v504_v51 = vpop.xlane.xlu2 %503 }
 0x236   : > { %v506_v52 = vadd.f32 %v504_v51, %v498_v50 }
 0x237   : > { %v559_v53 = vld [vmem:[#allocation3] sm:$0xff] }
 0x238   : > { %509 = vst.msk [vmem:[#allocation3 + $0x8] sm:$0xff] %vm416_vm0, %v506_v52  ;;  %898 = vrcp.f32 %v559_v53 }
 0x23e   : > { %v899_v54 = vpop.eup %898 }
 0x23f   : > { %565 = vperm.xlu2 %889, %v899_v54   ;;  %v560_v55 = vld [vmem:[#allocation3 + $0x8] sm:$0xff] }
 0x240   : > { %900 = vrcp.f32 %v560_v55  ;;  %v543_v57 = vpop.f32.mrf.mxu1 }
 0x241   : > { %v548_v0 = vadd.f32 %v543_v57, %v522_v61 }
 0x246   : > { %v901_v56 = vpop.eup %900 }
 0x247   : > { %570 = vperm.xlu1 %887, %v901_v56  }
 0x248   : > { %v545_v60 = vpop.f32.mrf.mxu1 }
 0x249   : > { %v549_v1 = vadd.f32 %v545_v60, %v523_v62 }
 0x299   : > { %v566_v63 = vpop.permute.xlu2 %565 }
 0x29a   : > { %v573_v3 = vmul.f32 %v566_v63, %v548_v0 }
 0x2b9   : > { %v571_v2 = vpop.permute.xlu1 %570 }
 0x2ba   : > { %v574_v4 = vmul.f32 %v571_v2, %v549_v1  ;;  %585 = sbr.rel (!%p1088_p10) target bundleno = 712 (0x2c8), region = 167 }
 0x2bc   : > { %v809_v5 = vpack.c.bf16 %v574_v4, %v573_v3 }
 0x2be   : > { %810 = vst [vmem:[%s405_s12] sm:$0xff] %v809_v5  }
 0x2c5   : > { %v609_v6 = vld [vmem:[%s405_s12] sm:$0xf]  ;;  %v611_v7 = vld [vmem:[%s405_s12 + $0x4] sm:$0xf] }
 0x2c6   : > { %610 = vst [vmem:[%s592_s23] sm:$0xf] %v609_v6 }
 0x2c7   : > { %612 = vst [vmem:[%s592_s23 + $0x10] sm:$0xf] %v611_v7 }
 0x2c8 PF: > { %s13_s20 = sadd.s32 1, %s972_s20   ;;  %s1182_s10 = sld [smem:[#allocation9_spill]] }
 0x2c9   : > { %p10_p1 = scmp.ge.s32.totalorder %s13_s20, 10   ;;  %s1183_s12 = smov %s944_s13 }
 0x2ca   : > { %s1184_s13 = smov %s1083_s9  ;;  %s1185_s14 = smov %s952_s15 }
 0x2cb   : > { %s1186_s15 = smov %s1080_s8  ;;  %s1187_s16 = smov %s964_s18 }
 0x2cc   : > { %s1188_s17 = smov %s968_s19  ;;  %s1189_s18 = smov %s1192_s22 }
 0x2cd   :  { %12 = sbr.rel (!%p10_p1) target bundleno = 5 (0x5), region = 255 }
 0x2ce   : > { %s1190_s19 = smov %s1182_s10 }

// kernel: decoder_forward.15
= control target key start
LH: loop header
LB: loop body
LE: loop exit
PB: predicated region body
PF: predicated region fallthrough
CT: control target
= control target key end

     0   :  { %s846_s1 = inlined_call_operand.vmem [shape: bf16[128,512], index: 1, kind: input, shape index: {}]   ;;  %s847_s0 = inlined_call_operand.vmem [shape: bf16[32,128], index: 0, kind: input, shape index: {}]   ;;  %s848_s2 = inlined_call_operand.vmem [shape: f32[1,512], index: 2, kind: input, shape index: {}]   ;;  %s849_s3 = inlined_call_operand.vmem [shape: bf16[32,512], index: 3, kind: output, shape index: {}]  }
   0x1   :  { %v553_v0 = vld [vmem:[%s846_s1 + $0xe0] sm:$0xf]  ;;  %v599_v1 = vld [vmem:[%s846_s1 + $0xec] sm:$0xf0]  ;;  %v597_v2 = vld [vmem:[%s846_s1 + $0xe4] sm:$0xf] }
   0x2   :  { %v554_v3 = vor.u32 %v599_v1, %v553_v0  ;;  %v555_v4 = vld [vmem:[%s846_s1 + $0xf0] sm:$0xf0]  ;;  %v561_v5 = vld [vmem:[%s846_s1 + $0xe8] sm:$0xf]  ;;  %v600_v6 = vld [vmem:[%s846_s1 + $0xf4] sm:$0xf0] }
   0x3   :  { %v558_v7 = vor.u32 %v597_v2, %v555_v4  ;;  %v562_v8 = vor.u32 %v600_v6, %v561_v5  ;;  %v598_v9 = vld [vmem:[%s846_s1 + $0xec] sm:$0xf]  ;;  %v563_v10 = vld [vmem:[%s846_s1 + $0xf8] sm:$0xf0]  ;;  %v537_v11 = vld [vmem:[%s846_s1 + $0xc0] sm:$0xf] }
   0x4   :  { %258 = vmatpush.bf16.msra.mxu0 %v554_v3  ;;  %v566_v12 = vor.u32 %v598_v9, %v563_v10  ;;  %v595_v13 = vld [vmem:[%s846_s1 + $0xcc] sm:$0xf0]  ;;  %v593_v14 = vld [vmem:[%s846_s1 + $0xc4] sm:$0xf]  ;;  %v539_v15 = vld [vmem:[%s846_s1 + $0xd0] sm:$0xf0] }
   0x5   :  { %277 = vmatpush.bf16.msra.mxu1 %v558_v7  ;;  %296 = vmatpush.bf16.msra.mxu2 %v562_v8  ;;  %v538_v16 = vor.u32 %v595_v13, %v537_v11  ;;  %v542_v17 = vor.u32 %v593_v14, %v539_v15  ;;  %v545_v18 = vld [vmem:[%s846_s1 + $0xc8] sm:$0xf]  ;;  %v596_v19 = vld [vmem:[%s846_s1 + $0xd4] sm:$0xf0]  ;;  %v594_v20 = vld [vmem:[%s846_s1 + $0xcc] sm:$0xf] }
   0x6   :  { %315 = vmatpush.bf16.msra.mxu3 %v566_v12  ;;  %v546_v21 = vor.u32 %v596_v19, %v545_v18  ;;  %v547_v22 = vld [vmem:[%s846_s1 + $0xd8] sm:$0xf0]  ;;  %v521_v23 = vld [vmem:[%s846_s1 + $0xa0] sm:$0xf]  ;;  %v591_v24 = vld [vmem:[%s846_s1 + $0xac] sm:$0xf0] }
   0x7   :  { %v550_v25 = vor.u32 %v594_v20, %v547_v22  ;;  %v589_v26 = vld [vmem:[%s846_s1 + $0xa4] sm:$0xf]  ;;  %v523_v27 = vld [vmem:[%s846_s1 + $0xb0] sm:$0xf0]  ;;  %v529_v28 = vld [vmem:[%s846_s1 + $0xa8] sm:$0xf]  ;;  %v522_v29 = vor.u32 %v591_v24, %v521_v23 }
   0x8   :  { %259 = vmatpush.bf16.msra.mxu0 %v538_v16  ;;  %v592_v30 = vld [vmem:[%s846_s1 + $0xb4] sm:$0xf0]  ;;  %v590_v31 = vld [vmem:[%s846_s1 + $0xac] sm:$0xf]  ;;  %v531_v32 = vld [vmem:[%s846_s1 + $0xb8] sm:$0xf0]  ;;  %v526_v33 = vor.u32 %v589_v26, %v523_v27 }
   0x9   :  { %278 = vmatpush.bf16.msra.mxu1 %v542_v17  ;;  %297 = vmatpush.bf16.msra.mxu2 %v546_v21  ;;  %v530_v34 = vor.u32 %v592_v30, %v529_v28  ;;  %v505_v35 = vld [vmem:[%s846_s1 + $0x80] sm:$0xf]  ;;  %v587_v36 = vld [vmem:[%s846_s1 + $0x8c] sm:$0xf0]  ;;  %v585_v37 = vld [vmem:[%s846_s1 + $0x84] sm:$0xf]  ;;  %v534_v38 = vor.u32 %v590_v31, %v531_v32 }
   0xa   :  { %316 = vmatpush.bf16.msra.mxu3 %v550_v25  ;;  %v507_v39 = vld [vmem:[%s846_s1 + $0x90] sm:$0xf0]  ;;  %v513_v40 = vld [vmem:[%s846_s1 + $0x88] sm:$0xf]  ;;  %v588_v41 = vld [vmem:[%s846_s1 + $0x94] sm:$0xf0]  ;;  %v506_v44 = vor.u32 %v587_v36, %v505_v35 }
   0xb   :  { %v586_v42 = vld [vmem:[%s846_s1 + $0x8c] sm:$0xf]  ;;  %v515_v43 = vld [vmem:[%s846_s1 + $0x98] sm:$0xf0]  ;;  %v510_v45 = vor.u32 %v585_v37, %v507_v39  ;;  %v514_v46 = vor.u32 %v588_v41, %v513_v40  ;;  %v489_v47 = vld [vmem:[%s846_s1 + $0x60] sm:$0xf] }
   0xc   :  { %260 = vmatpush.bf16.msra.mxu0 %v522_v29  ;;  %v583_v48 = vld [vmem:[%s846_s1 + $0x6c] sm:$0xf0]  ;;  %v581_v49 = vld [vmem:[%s846_s1 + $0x64] sm:$0xf]  ;;  %v518_v50 = vor.u32 %v586_v42, %v515_v43  ;;  %v491_v51 = vld [vmem:[%s846_s1 + $0x70] sm:$0xf0] }
   0xd   :  { %279 = vmatpush.bf16.msra.mxu1 %v526_v33  ;;  %298 = vmatpush.bf16.msra.mxu2 %v530_v34  ;;  %v497_v52 = vld [vmem:[%s846_s1 + $0x68] sm:$0xf]  ;;  %v584_v53 = vld [vmem:[%s846_s1 + $0x74] sm:$0xf0]  ;;  %v582_v54 = vld [vmem:[%s846_s1 + $0x6c] sm:$0xf]  ;;  %v490_v56 = vor.u32 %v583_v48, %v489_v47  ;;  %v494_v57 = vor.u32 %v581_v49, %v491_v51 }
   0xe   :  { %317 = vmatpush.bf16.msra.mxu3 %v534_v38  ;;  %v499_v55 = vld [vmem:[%s846_s1 + $0x78] sm:$0xf0]  ;;  %v498_v58 = vor.u32 %v584_v53, %v497_v52  ;;  %v473_v59 = vld [vmem:[%s846_s1 + $0x40] sm:$0xf]  ;;  %v579_v60 = vld [vmem:[%s846_s1 + $0x4c] sm:$0xf0] }
   0xf   :  { %v577_v61 = vld [vmem:[%s846_s1 + $0x44] sm:$0xf]  ;;  %v502_v62 = vor.u32 %v582_v54, %v499_v55  ;;  %v475_v63 = vld [vmem:[%s846_s1 + $0x50] sm:$0xf0]  ;;  %v481_v0 = vld [vmem:[%s846_s1 + $0x48] sm:$0xf]  ;;  %v474_v4 = vor.u32 %v579_v60, %v473_v59 }
  0x10   :  { %261 = vmatpush.bf16.msra.mxu0 %v506_v44  ;;  %v580_v1 = vld [vmem:[%s846_s1 + $0x54] sm:$0xf0]  ;;  %v578_v2 = vld [vmem:[%s846_s1 + $0x4c] sm:$0xf]  ;;  %v483_v3 = vld [vmem:[%s846_s1 + $0x58] sm:$0xf0]  ;;  %v478_v5 = vor.u32 %v577_v61, %v475_v63 }
  0x11   :  { %280 = vmatpush.bf16.msra.mxu1 %v510_v45  ;;  %299 = vmatpush.bf16.msra.mxu2 %v514_v46  ;;  %v482_v6 = vor.u32 %v580_v1, %v481_v0  ;;  %v457_v7 = vld [vmem:[%s846_s1 + $0x20] sm:$0xf]  ;;  %v575_v8 = vld [vmem:[%s846_s1 + $0x2c] sm:$0xf0]  ;;  %v573_v9 = vld [vmem:[%s846_s1 + $0x24] sm:$0xf]  ;;  %v486_v10 = vor.u32 %v578_v2, %v483_v3 }
  0x12   :  { %318 = vmatpush.bf16.msra.mxu3 %v518_v50  ;;  %v459_v11 = vld [vmem:[%s846_s1 + $0x30] sm:$0xf0]  ;;  %v465_v12 = vld [vmem:[%s846_s1 + $0x28] sm:$0xf]  ;;  %v576_v13 = vld [vmem:[%s846_s1 + $0x34] sm:$0xf0]  ;;  %v458_v16 = vor.u32 %v575_v8, %v457_v7 }
  0x13   :  { %v574_v14 = vld [vmem:[%s846_s1 + $0x2c] sm:$0xf]  ;;  %v467_v15 = vld [vmem:[%s846_s1 + $0x38] sm:$0xf0]  ;;  %v462_v17 = vor.u32 %v573_v9, %v459_v11  ;;  %v466_v18 = vor.u32 %v576_v13, %v465_v12  ;;  %v441_v19 = vld [vmem:[%s846_s1] sm:$0xf] }
  0x14   :  { %262 = vmatpush.bf16.msra.mxu0 %v490_v56  ;;  %v571_v20 = vld [vmem:[%s846_s1 + $0xc] sm:$0xf0]  ;;  %v569_v21 = vld [vmem:[%s846_s1 + $0x4] sm:$0xf]  ;;  %v470_v22 = vor.u32 %v574_v14, %v467_v15  ;;  %v443_v23 = vld [vmem:[%s846_s1 + $0x10] sm:$0xf0] }
  0x15   :  { %281 = vmatpush.bf16.msra.mxu1 %v494_v57  ;;  %300 = vmatpush.bf16.msra.mxu2 %v498_v58  ;;  %v449_v24 = vld [vmem:[%s846_s1 + $0x8] sm:$0xf]  ;;  %v572_v25 = vld [vmem:[%s846_s1 + $0x14] sm:$0xf0]  ;;  %v570_v26 = vld [vmem:[%s846_s1 + $0xc] sm:$0xf]  ;;  %v442_v28 = vor.u32 %v571_v20, %v441_v19  ;;  %v446_v29 = vor.u32 %v569_v21, %v443_v23 }
  0x16   :  { %319 = vmatpush.bf16.msra.mxu3 %v502_v62  ;;  %v451_v27 = vld [vmem:[%s846_s1 + $0x18] sm:$0xf0]  ;;  %v450_v30 = vor.u32 %v572_v25, %v449_v24  ;;  %v567_v32 = vld [vmem:[%s847_s0] sm:$0xff]  ;;  %v568_v33 = vld [vmem:[%s847_s0 + $0x8] sm:$0xff] }
  0x17   :  { %v454_v31 = vor.u32 %v570_v26, %v451_v27  ;;  %v385_v34 = vld [vmem:[%s848_s2] sm:$0xf] }
  0x18   :  { %263 = vmatpush.bf16.msra.mxu0 %v474_v4  ;;  %v387_v35 = vperm.slane %v385_v34, 0  ;;  %v388_v36 = vperm.slane %v385_v34, 1  ;;  %v389_v42 = vperm.slane %v385_v34, 2  ;;  %v390_v43 = vperm.slane %v385_v34, 3 }
  0x19   :  { %282 = vmatpush.bf16.msra.mxu1 %v478_v5  ;;  %301 = vmatpush.bf16.msra.mxu2 %v482_v6 }
  0x1a   :  { %320 = vmatpush.bf16.msra.mxu3 %v486_v10 }
  0x1c   :  { %264 = vmatpush.bf16.msra.mxu0 %v458_v16 }
  0x1d   :  { %283 = vmatpush.bf16.msra.mxu1 %v462_v17  ;;  %302 = vmatpush.bf16.msra.mxu2 %v466_v18 }
  0x1e   :  { %321 = vmatpush.bf16.msra.mxu3 %v470_v22 }
  0x20   :  { %265 = vmatpush.bf16.msra.mxu0 %v442_v28 }
  0x21   :  { %284 = vmatpush.bf16.msra.mxu1 %v446_v29  ;;  %303 = vmatpush.bf16.msra.mxu2 %v450_v30 }
  0x22   :  { %322 = vmatpush.bf16.msra.mxu3 %v454_v31 }
  0x23   :  { %266 = vmatmul.bf16.vlgmr.msra.gmra.mxu0 %v567_v32 }
  0x24   :  { %285 = vmatmul.bf16.vlgmr.msra.gmra.mxu1 %v567_v32  ;;  %304 = vmatmul.bf16.vlgmr.msra.gmra.mxu2 %v567_v32 }
  0x25   :  { %323 = vmatmul.bf16.vlgmr.msra.gmra.mxu3 %v567_v32 }
  0x33   :  { %271 = vmatmul.bf16.gmra.mxu0 %v568_v33 }
  0x34   :  { %290 = vmatmul.bf16.gmra.mxu1 %v568_v33  ;;  %309 = vmatmul.bf16.gmra.mxu2 %v568_v33 }
  0x35   :  { %328 = vmatmul.bf16.gmra.mxu3 %v568_v33 }
  0xa0   :  { %v267_v37 = vpop.f32.mrf.mxu0 }
  0xa1   :  { %v395_v38 = vadd.f32 %v387_v35, %v267_v37  ;;  %v286_v39 = vpop.f32.mrf.mxu1 }
  0xa2   :  { %v396_v40 = vadd.f32 %v388_v36, %v286_v39 }
  0xa4   :  { %v411_v41 = vpack.c.bf16 %v396_v40, %v395_v38 }
  0xa6   :  { %419 = vst [vmem:[%s849_s3] sm:$0xff] %v411_v41 }
  0xa7   :  { %v305_v44 = vpop.f32.mrf.mxu2 }
  0xa8   :  { %v397_v45 = vadd.f32 %v389_v42, %v305_v44  ;;  %v324_v46 = vpop.f32.mrf.mxu3  ;;  %v269_v47 = vpop.f32.mrf.mxu0 }
  0xa9   :  { %v398_v48 = vadd.f32 %v390_v43, %v324_v46  ;;  %v399_v49 = vadd.f32 %v387_v35, %v269_v47  ;;  %v288_v50 = vpop.f32.mrf.mxu1 }
  0xaa   :  { %v400_v51 = vadd.f32 %v388_v36, %v288_v50 }
  0xab   :  { %v412_v52 = vpack.c.bf16 %v398_v48, %v397_v45 }
  0xac   :  { %v413_v53 = vpack.c.bf16 %v400_v51, %v399_v49 }
  0xad   :  { %420 = vst [vmem:[%s849_s3 + $0x8] sm:$0xff] %v412_v52 }
  0xae   :  { %421 = vst [vmem:[%s849_s3 + $0x10] sm:$0xff] %v413_v53 }
  0xaf   :  { %v307_v54 = vpop.f32.mrf.mxu2 }
  0xb0   :  { %v401_v55 = vadd.f32 %v389_v42, %v307_v54  ;;  %v326_v56 = vpop.f32.mrf.mxu3  ;;  %v272_v57 = vpop.f32.mrf.mxu0 }
  0xb1   :  { %v402_v58 = vadd.f32 %v390_v43, %v326_v56  ;;  %v403_v59 = vadd.f32 %v387_v35, %v272_v57  ;;  %v291_v60 = vpop.f32.mrf.mxu1 }
  0xb2   :  { %v404_v61 = vadd.f32 %v388_v36, %v291_v60 }
  0xb3   :  { %v414_v62 = vpack.c.bf16 %v402_v58, %v401_v55 }
  0xb4   :  { %v415_v63 = vpack.c.bf16 %v404_v61, %v403_v59 }
  0xb5   :  { %422 = vst [vmem:[%s849_s3 + $0x18] sm:$0xff] %v414_v62 }
  0xb6   :  { %423 = vst [vmem:[%s849_s3 + $0x20] sm:$0xff] %v415_v63 }
  0xb7   :  { %v310_v0 = vpop.f32.mrf.mxu2 }
  0xb8   :  { %v405_v1 = vadd.f32 %v389_v42, %v310_v0  ;;  %v329_v2 = vpop.f32.mrf.mxu3  ;;  %v274_v3 = vpop.f32.mrf.mxu0 }
  0xb9   :  { %v406_v4 = vadd.f32 %v390_v43, %v329_v2  ;;  %v407_v5 = vadd.f32 %v387_v35, %v274_v3  ;;  %v293_v6 = vpop.f32.mrf.mxu1 }
  0xba   :  { %v408_v7 = vadd.f32 %v388_v36, %v293_v6 }
  0xbb   :  { %v416_v8 = vpack.c.bf16 %v406_v4, %v405_v1 }
  0xbc   :  { %v417_v9 = vpack.c.bf16 %v408_v7, %v407_v5 }
  0xbd   :  { %424 = vst [vmem:[%s849_s3 + $0x28] sm:$0xff] %v416_v8 }
  0xbe   :  { %425 = vst [vmem:[%s849_s3 + $0x30] sm:$0xff] %v417_v9 }
  0xbf   :  { %v312_v10 = vpop.f32.mrf.mxu2 }
  0xc0   :  { %v409_v11 = vadd.f32 %v389_v42, %v312_v10  ;;  %v331_v12 = vpop.f32.mrf.mxu3 }
  0xc1   :  { %v410_v13 = vadd.f32 %v390_v43, %v331_v12 }
  0xc3   :  { %v418_v14 = vpack.c.bf16 %v410_v13, %v409_v11 }
  0xc5   :  { %426 = vst [vmem:[%s849_s3 + $0x38] sm:$0xff] %v418_v14 }

// kernel: decoder_forward.14
= control target key start
LH: loop header
LB: loop body
LE: loop exit
PB: predicated region body
PF: predicated region fallthrough
CT: control target
= control target key end

     0   :  { %8 = vsyncpa [#allocation4], 0  ;;  %s2050_s0 = inlined_call_operand.vmem [shape: bf16[32,128], index: 0, kind: input, shape index: {}]   ;;  %s2051_s1 = inlined_call_operand.hbm [shape: bf16[128,2048], index: 1, kind: input, shape index: {}]   ;;  %s2052_s2 = inlined_call_operand.vmem [shape: f32[1,2048], index: 2, kind: input, shape index: {}]   ;;  %s2053_s3 = inlined_call_operand.vmem [shape: bf16[32,2048], index: 3, kind: output, shape index: {}]  }
   0x1   :  { %10 = vsyncpa [#allocation4 + $0x1], 0  ;;  %s1748_s12 = smov 0   ;;  %s1750_s13 = smov 0  }
   0x2   :  { %s1752_s14 = smov 0   ;;  %s1754_s15 = smov 0  }
   0x3   :  { %s1756_s16 = smov 0   ;;  %s1758_s17 = smov 0  }
   0x4 LB: > { %s1236_s18 = sadd.s32 4294967295, %s1723_s17   ;;  %s31_s19 = sadd.s32 1, %s1719_s16  ;;  %s1723_s17 = sphi %s1758_s17, %s16_s17   ;;  %s1719_s16 = sphi %s1756_s16, %s2061_s16   ;;  %s1715_s15 = sphi %s1754_s15, %s2060_s15   ;;  %s1711_s14 = sphi %s1752_s14, %s2059_s14   ;;  %s1707_s13 = sphi %s1750_s13, %s2058_s13   ;;  %s1703_s12 = sphi %s1748_s12, %s2057_s12  }
   0x5   : > { %p33_p0 = scmp.ge.s32.totalorder %s31_s19, 2  ;;  %s72_s20 = sadd.s32 1, %s1711_s14 }
   0x6   : > { %p79_p1 = scmp.ne.s32.totalorder %s1711_s14, %s1707_s13  ;;  %p80_p2 = scmp.eq.s32.totalorder %s1723_s17, 0 }
   0x7   : > { %s2063_s19 = smov (%p33_p0, %s31_s19), 0  ;;  %p85_p4 = scmp.ne.s32.totalorder %s1707_s13, %s1703_s12 }
   0x8   : > { %p1784_p3 = por %p80_p2, %p79_p1  ;;  %s68_s22 = ssub.s32 %s1719_s16, %s2063_s19 }
   0x9   : > { %p86_p5 = scmp.eq.s32.totalorder %s1236_s18, 0  ;;  %p70_p6 = scmp.eq.s32.totalorder %s68_s22, 0 }
   0xa   : > { %p137_p7 = scmp.eq.s32.totalorder %s1236_s18, 1  ;;  %p1591_p10 = scmp.lt.s32.totalorder %s1723_s17, 2 }
   0xb   : > { %p1791_p8 = por %p86_p5, %p85_p4  ;;  %s175_s26 = sand.u32 1, %s1711_s14  }
   0xc   : > { %s1796_s24 = scalar_select %p70_p6, %s1711_s14, %s72_s20  }
   0xd   : > { %p1798_p9 = por %p137_p7, %p79_p1  ;;  %s1517_s27 = sshll.u32 %s1719_s16, 5 }
   0xe   : > { %s1241_s28 = sshll.u32 %s175_s26, 9  ;;  %s187_s4 = scalar_lea.hbm %s2051_s1, %s1517_s27 }
   0xf   : > { %s188_s5 = sshll.u32 %s187_s4, 4  ;;  %s179_s6 = scalar_lea.vmem [#allocation3], %s1241_s28  ;;  %s189_s5 = int_to_ptr.hbm [resolvable:$true] %s188_s5 }
  0x10   : > { %s190_s7 = sshll.u32 %s179_s6, 4  ;;  %p1588_p11 = pnand %p1591_p10, %p1784_p3  ;;  %s191_s7 = int_to_ptr.vmem [resolvable:$true] %s190_s7 }
  0x11   : > { %p1244_p12 = scmp.ge.s32.totalorder %s1723_s17, 1  ;;  %s176_s8 = scalar_lea.sflag [#allocation4], %s175_s26 }
  0x12   : > { %s1725_s9 = smov 1024   ;;  %s1726_s10 = smov 512  }
  0x13   : > { %s1727_s11 = smov 32   ;;  %p206_p13 = scmp.lt.s32.totalorder %s1723_s17, 3 }
  0x14   : > { %1590 = dma.hbm_to_vmem [thread:$0]  (!%p1588_p11), %s189_s5, 8192, %s191_s7, %s176_s8, %s1725_s9, %s1726_s10, %s1727_s11  }
  0x15   : > { %p207_p0 = pnand %p1244_p12, %p206_p13 }
  0x16   : > { %s1813_s12 = sand.u32 (!%p207_p0), 1, %s1707_s13  }
  0x17   : > { %210 = sbr.rel (%p207_p0) target bundleno = 267 (0x10b), region = 32  ;;  %s1245_s18 = sshll.u32 (!%p207_p0), %s1813_s12, 9 }
  0x18   : > { %s213_s20 = scalar_lea.sflag (!%p207_p0), [#allocation4], %s1813_s12  ;;  %s1817_s22 = scalar_lea.vmem (!%p207_p0), [#allocation3], %s1245_s18 }
  0x1c   : > { %1698 = dma.done.wait (%p1791_p8), %s213_s20, 8192  }
  0x1d   : > { %1700 = vsyncadd (%p1791_p8), %s213_s20, 4294959104  ;;  %v1482_v0 = vld [vmem:[%s1817_s22 + $0x1c0] sm:$0xf]  ;;  %v1576_v2 = vld [vmem:[%s1817_s22 + $0x1c4] sm:$0xf]  ;;  %s1247_s28 = sshll.u32 %s1715_s15, 3 }
  0x1e   : > { %v1580_v1 = vld [vmem:[%s1817_s22 + $0x1dc] sm:$0xf0]  ;;  %v1484_v4 = vld [vmem:[%s1817_s22 + $0x1e0] sm:$0xf0]  ;;  %v1490_v5 = vld [vmem:[%s1817_s22 + $0x1c8] sm:$0xf] }
  0x1f   : > { %v1483_v3 = vor.u32 %v1580_v1, %v1482_v0  ;;  %v1581_v6 = vld [vmem:[%s1817_s22 + $0x1e4] sm:$0xf0]  ;;  %v1487_v7 = vor.u32 %v1576_v2, %v1484_v4  ;;  %v1577_v9 = vld [vmem:[%s1817_s22 + $0x1cc] sm:$0xf]  ;;  %v1450_v11 = vld [vmem:[%s1817_s22 + $0x180] sm:$0xf] }
  0x20   : > { %v1491_v8 = vor.u32 %v1581_v6, %v1490_v5  ;;  %v1492_v10 = vld [vmem:[%s1817_s22 + $0x1e8] sm:$0xf0]  ;;  %v1572_v13 = vld [vmem:[%s1817_s22 + $0x19c] sm:$0xf0]  ;;  %v1568_v14 = vld [vmem:[%s1817_s22 + $0x184] sm:$0xf] }
  0x21   : > { %737 = vmatpush.bf16.msra.mxu0 %v1483_v3  ;;  %v1495_v12 = vor.u32 %v1577_v9, %v1492_v10  ;;  %v1452_v15 = vld [vmem:[%s1817_s22 + $0x1a0] sm:$0xf0]  ;;  %756 = vmatpush.bf16.msra.mxu1 %v1487_v7  ;;  %v1451_v16 = vor.u32 %v1572_v13, %v1450_v11  ;;  %v1458_v18 = vld [vmem:[%s1817_s22 + $0x188] sm:$0xf]  ;;  %v1569_v20 = vld [vmem:[%s1817_s22 + $0x18c] sm:$0xf] }
  0x22   : > { %775 = vmatpush.bf16.msra.mxu2 %v1491_v8  ;;  %v1455_v17 = vor.u32 %v1568_v14, %v1452_v15  ;;  %v1573_v19 = vld [vmem:[%s1817_s22 + $0x1a4] sm:$0xf0]  ;;  %v1460_v22 = vld [vmem:[%s1817_s22 + $0x1a8] sm:$0xf0]  ;;  %v1418_v23 = vld [vmem:[%s1817_s22 + $0x140] sm:$0xf] }
  0x23   : > { %794 = vmatpush.bf16.msra.mxu3 %v1495_v12  ;;  %v1459_v21 = vor.u32 %v1573_v19, %v1458_v18  ;;  %v1564_v24 = vld [vmem:[%s1817_s22 + $0x15c] sm:$0xf0]  ;;  %v1463_v25 = vor.u32 %v1569_v20, %v1460_v22  ;;  %v1560_v26 = vld [vmem:[%s1817_s22 + $0x144] sm:$0xf]  ;;  %v1426_v28 = vld [vmem:[%s1817_s22 + $0x148] sm:$0xf] }
  0x24   : > { %v1420_v27 = vld [vmem:[%s1817_s22 + $0x160] sm:$0xf0]  ;;  %v1419_v29 = vor.u32 %v1564_v24, %v1418_v23  ;;  %v1565_v30 = vld [vmem:[%s1817_s22 + $0x164] sm:$0xf0]  ;;  %v1561_v31 = vld [vmem:[%s1817_s22 + $0x14c] sm:$0xf] }
  0x25   : > { %738 = vmatpush.bf16.msra.mxu0 %v1451_v16  ;;  %v1428_v32 = vld [vmem:[%s1817_s22 + $0x168] sm:$0xf0]  ;;  %757 = vmatpush.bf16.msra.mxu1 %v1455_v17  ;;  %v1423_v33 = vor.u32 %v1560_v26, %v1420_v27  ;;  %v1427_v34 = vor.u32 %v1565_v30, %v1426_v28  ;;  %v1386_v35 = vld [vmem:[%s1817_s22 + $0x100] sm:$0xf]  ;;  %v1552_v37 = vld [vmem:[%s1817_s22 + $0x104] sm:$0xf] }
  0x26   : > { %776 = vmatpush.bf16.msra.mxu2 %v1459_v21  ;;  %v1556_v36 = vld [vmem:[%s1817_s22 + $0x11c] sm:$0xf0]  ;;  %v1431_v38 = vor.u32 %v1561_v31, %v1428_v32  ;;  %v1388_v39 = vld [vmem:[%s1817_s22 + $0x120] sm:$0xf0]  ;;  %v1394_v40 = vld [vmem:[%s1817_s22 + $0x108] sm:$0xf] }
  0x27   : > { %795 = vmatpush.bf16.msra.mxu3 %v1463_v25  ;;  %v1557_v41 = vld [vmem:[%s1817_s22 + $0x124] sm:$0xf0]  ;;  %v1553_v42 = vld [vmem:[%s1817_s22 + $0x10c] sm:$0xf]  ;;  %v1387_v44 = vor.u32 %v1556_v36, %v1386_v35  ;;  %v1391_v45 = vor.u32 %v1552_v37, %v1388_v39  ;;  %v1354_v47 = vld [vmem:[%s1817_s22 + $0xc0] sm:$0xf] }
  0x28   : > { %v1396_v43 = vld [vmem:[%s1817_s22 + $0x128] sm:$0xf0]  ;;  %v1395_v46 = vor.u32 %v1557_v41, %v1394_v40  ;;  %v1548_v48 = vld [vmem:[%s1817_s22 + $0xdc] sm:$0xf0]  ;;  %v1544_v49 = vld [vmem:[%s1817_s22 + $0xc4] sm:$0xf] }
  0x29   : > { %739 = vmatpush.bf16.msra.mxu0 %v1419_v29  ;;  %758 = vmatpush.bf16.msra.mxu1 %v1423_v33  ;;  %v1399_v50 = vor.u32 %v1553_v42, %v1396_v43  ;;  %v1356_v51 = vld [vmem:[%s1817_s22 + $0xe0] sm:$0xf0]  ;;  %v1362_v52 = vld [vmem:[%s1817_s22 + $0xc8] sm:$0xf]  ;;  %v1545_v54 = vld [vmem:[%s1817_s22 + $0xcc] sm:$0xf]  ;;  %v1355_v56 = vor.u32 %v1548_v48, %v1354_v47 }
  0x2a   : > { %777 = vmatpush.bf16.msra.mxu2 %v1427_v34  ;;  %v1549_v53 = vld [vmem:[%s1817_s22 + $0xe4] sm:$0xf0]  ;;  %v1364_v55 = vld [vmem:[%s1817_s22 + $0xe8] sm:$0xf0]  ;;  %v1359_v57 = vor.u32 %v1544_v49, %v1356_v51  ;;  %v1322_v59 = vld [vmem:[%s1817_s22 + $0x80] sm:$0xf] }
  0x2b   : > { %796 = vmatpush.bf16.msra.mxu3 %v1431_v38  ;;  %v1363_v58 = vor.u32 %v1549_v53, %v1362_v52  ;;  %v1540_v60 = vld [vmem:[%s1817_s22 + $0x9c] sm:$0xf0]  ;;  %v1536_v61 = vld [vmem:[%s1817_s22 + $0x84] sm:$0xf]  ;;  %v1367_v62 = vor.u32 %v1545_v54, %v1364_v55  ;;  %v1330_v0 = vld [vmem:[%s1817_s22 + $0x88] sm:$0xf] }
  0x2c   : > { %v1324_v63 = vld [vmem:[%s1817_s22 + $0xa0] sm:$0xf0]  ;;  %v1541_v1 = vld [vmem:[%s1817_s22 + $0xa4] sm:$0xf0]  ;;  %v1537_v2 = vld [vmem:[%s1817_s22 + $0x8c] sm:$0xf]  ;;  %v1323_v4 = vor.u32 %v1540_v60, %v1322_v59 }
  0x2d   : > { %740 = vmatpush.bf16.msra.mxu0 %v1387_v44  ;;  %759 = vmatpush.bf16.msra.mxu1 %v1391_v45  ;;  %v1332_v3 = vld [vmem:[%s1817_s22 + $0xa8] sm:$0xf0]  ;;  %v1327_v5 = vor.u32 %v1536_v61, %v1324_v63  ;;  %v1331_v6 = vor.u32 %v1541_v1, %v1330_v0  ;;  %v1290_v7 = vld [vmem:[%s1817_s22 + $0x40] sm:$0xf]  ;;  %v1528_v9 = vld [vmem:[%s1817_s22 + $0x44] sm:$0xf] }
  0x2e   : > { %778 = vmatpush.bf16.msra.mxu2 %v1395_v46  ;;  %v1532_v8 = vld [vmem:[%s1817_s22 + $0x5c] sm:$0xf0]  ;;  %v1335_v10 = vor.u32 %v1537_v2, %v1332_v3  ;;  %v1292_v11 = vld [vmem:[%s1817_s22 + $0x60] sm:$0xf0]  ;;  %v1298_v12 = vld [vmem:[%s1817_s22 + $0x48] sm:$0xf] }
  0x2f   : > { %797 = vmatpush.bf16.msra.mxu3 %v1399_v50  ;;  %v1533_v13 = vld [vmem:[%s1817_s22 + $0x64] sm:$0xf0]  ;;  %v1529_v14 = vld [vmem:[%s1817_s22 + $0x4c] sm:$0xf]  ;;  %v1291_v16 = vor.u32 %v1532_v8, %v1290_v7  ;;  %v1258_v17 = vld [vmem:[%s1817_s22] sm:$0xf]  ;;  %v1295_v18 = vor.u32 %v1528_v9, %v1292_v11 }
  0x30   : > { %v1300_v15 = vld [vmem:[%s1817_s22 + $0x68] sm:$0xf0]  ;;  %v1299_v19 = vor.u32 %v1533_v13, %v1298_v12  ;;  %v1524_v20 = vld [vmem:[%s1817_s22 + $0x1c] sm:$0xf0]  ;;  %v1520_v21 = vld [vmem:[%s1817_s22 + $0x4] sm:$0xf] }
  0x31   : > { %741 = vmatpush.bf16.msra.mxu0 %v1355_v56  ;;  %760 = vmatpush.bf16.msra.mxu1 %v1359_v57  ;;  %v1260_v22 = vld [vmem:[%s1817_s22 + $0x20] sm:$0xf0]  ;;  %v1303_v23 = vor.u32 %v1529_v14, %v1300_v15  ;;  %v1266_v24 = vld [vmem:[%s1817_s22 + $0x8] sm:$0xf]  ;;  %v1521_v26 = vld [vmem:[%s1817_s22 + $0xc] sm:$0xf]  ;;  %v1259_v30 = vor.u32 %v1524_v20, %v1258_v17 }
  0x32   : > { %779 = vmatpush.bf16.msra.mxu2 %v1363_v58  ;;  %v1525_v25 = vld [vmem:[%s1817_s22 + $0x24] sm:$0xf0]  ;;  %v1268_v27 = vld [vmem:[%s1817_s22 + $0x28] sm:$0xf0]  ;;  %v1506_v28 = vld [vmem:[%s1817_s22 + $0x1d8] sm:$0xf]  ;;  %v1263_v33 = vor.u32 %v1520_v21, %v1260_v22 }
  0x33   : > { %798 = vmatpush.bf16.msra.mxu3 %v1367_v62  ;;  %v1583_v29 = vld [vmem:[%s1817_s22 + $0x1f4] sm:$0xf0]  ;;  %v1579_v31 = vld [vmem:[%s1817_s22 + $0x1dc] sm:$0xf]  ;;  %v1267_v34 = vor.u32 %v1525_v25, %v1266_v24  ;;  %v1894_v35 = vld [vmem:[%s2050_s0] sm:$0xff]  ;;  %v1271_v36 = vor.u32 %v1521_v26, %v1268_v27  ;;  %p263_p1 = scmp.lt.s32.totalorder %s1247_s28, 15 }
  0x34   : > { %v1508_v32 = vld [vmem:[%s1817_s22 + $0x1f8] sm:$0xf0]  ;;  %v1507_v37 = vor.u32 %v1583_v29, %v1506_v28  ;;  %v1498_v38 = vld [vmem:[%s1817_s22 + $0x1d0] sm:$0xf]  ;;  %v1578_v40 = vld [vmem:[%s1817_s22 + $0x1d4] sm:$0xf] }
  0x35   : > { %742 = vmatpush.bf16.msra.mxu0 %v1323_v4  ;;  %761 = vmatpush.bf16.msra.mxu1 %v1327_v5  ;;  %v1582_v39 = vld [vmem:[%s1817_s22 + $0x1ec] sm:$0xf0]  ;;  %v1511_v41 = vor.u32 %v1579_v31, %v1508_v32  ;;  %v1500_v42 = vld [vmem:[%s1817_s22 + $0x1f0] sm:$0xf0]  ;;  %v1474_v43 = vld [vmem:[%s1817_s22 + $0x198] sm:$0xf] }
  0x36   : > { %780 = vmatpush.bf16.msra.mxu2 %v1331_v6  ;;  %v1575_v44 = vld [vmem:[%s1817_s22 + $0x1b4] sm:$0xf0]  ;;  %v1571_v45 = vld [vmem:[%s1817_s22 + $0x19c] sm:$0xf]  ;;  %v1499_v47 = vor.u32 %v1582_v39, %v1498_v38  ;;  %v1503_v48 = vor.u32 %v1578_v40, %v1500_v42  ;;  %v1466_v50 = vld [vmem:[%s1817_s22 + $0x190] sm:$0xf] }
  0x37   : > { %799 = vmatpush.bf16.msra.mxu3 %v1335_v10  ;;  %v1476_v46 = vld [vmem:[%s1817_s22 + $0x1b8] sm:$0xf0]  ;;  %v1475_v49 = vor.u32 %v1575_v44, %v1474_v43  ;;  %v1574_v51 = vld [vmem:[%s1817_s22 + $0x1ac] sm:$0xf0]  ;;  %v1570_v52 = vld [vmem:[%s1817_s22 + $0x194] sm:$0xf] }
  0x38   : > { %v1479_v53 = vor.u32 %v1571_v45, %v1476_v46  ;;  %v1468_v54 = vld [vmem:[%s1817_s22 + $0x1b0] sm:$0xf0]  ;;  %v1442_v55 = vld [vmem:[%s1817_s22 + $0x158] sm:$0xf]  ;;  %v1563_v57 = vld [vmem:[%s1817_s22 + $0x15c] sm:$0xf]  ;;  %v1467_v59 = vor.u32 %v1574_v51, %v1466_v50 }
  0x39   : > { %743 = vmatpush.bf16.msra.mxu0 %v1291_v16  ;;  %762 = vmatpush.bf16.msra.mxu1 %v1295_v18  ;;  %v1567_v56 = vld [vmem:[%s1817_s22 + $0x174] sm:$0xf0]  ;;  %v1444_v58 = vld [vmem:[%s1817_s22 + $0x178] sm:$0xf0]  ;;  %v1471_v60 = vor.u32 %v1570_v52, %v1468_v54  ;;  %v1434_v62 = vld [vmem:[%s1817_s22 + $0x150] sm:$0xf] }
  0x3a   : > { %781 = vmatpush.bf16.msra.mxu2 %v1299_v19  ;;  %v1443_v61 = vor.u32 %v1567_v56, %v1442_v55  ;;  %v1566_v63 = vld [vmem:[%s1817_s22 + $0x16c] sm:$0xf0]  ;;  %v1562_v0 = vld [vmem:[%s1817_s22 + $0x154] sm:$0xf]  ;;  %v1447_v1 = vor.u32 %v1563_v57, %v1444_v58  ;;  %v1410_v3 = vld [vmem:[%s1817_s22 + $0x118] sm:$0xf] }
  0x3b   : > { %800 = vmatpush.bf16.msra.mxu3 %v1303_v23  ;;  %v1436_v2 = vld [vmem:[%s1817_s22 + $0x170] sm:$0xf0]  ;;  %v1559_v4 = vld [vmem:[%s1817_s22 + $0x134] sm:$0xf0]  ;;  %v1555_v5 = vld [vmem:[%s1817_s22 + $0x11c] sm:$0xf]  ;;  %v1435_v7 = vor.u32 %v1566_v63, %v1434_v62 }
  0x3c   : > { %v1412_v6 = vld [vmem:[%s1817_s22 + $0x138] sm:$0xf0]  ;;  %v1439_v8 = vor.u32 %v1562_v0, %v1436_v2  ;;  %v1411_v9 = vor.u32 %v1559_v4, %v1410_v3  ;;  %v1402_v10 = vld [vmem:[%s1817_s22 + $0x110] sm:$0xf]  ;;  %v1554_v12 = vld [vmem:[%s1817_s22 + $0x114] sm:$0xf] }
  0x3d   : > { %744 = vmatpush.bf16.msra.mxu0 %v1259_v30  ;;  %763 = vmatpush.bf16.msra.mxu1 %v1263_v33  ;;  %v1558_v11 = vld [vmem:[%s1817_s22 + $0x12c] sm:$0xf0]  ;;  %v1415_v13 = vor.u32 %v1555_v5, %v1412_v6  ;;  %v1404_v14 = vld [vmem:[%s1817_s22 + $0x130] sm:$0xf0]  ;;  %v1378_v15 = vld [vmem:[%s1817_s22 + $0xd8] sm:$0xf] }
  0x3e   : > { %782 = vmatpush.bf16.msra.mxu2 %v1267_v34  ;;  %v1551_v16 = vld [vmem:[%s1817_s22 + $0xf4] sm:$0xf0]  ;;  %v1547_v17 = vld [vmem:[%s1817_s22 + $0xdc] sm:$0xf]  ;;  %v1403_v19 = vor.u32 %v1558_v11, %v1402_v10  ;;  %v1935_v20 = vld [vmem:[%s2050_s0 + $0x8] sm:$0xff]  ;;  %v1407_v21 = vor.u32 %v1554_v12, %v1404_v14  ;;  %s2065_s28 = smov (!%p263_p1, %s1247_s28), 15 }
  0x3f   : > { %801 = vmatpush.bf16.msra.mxu3 %v1271_v36  ;;  %v1380_v18 = vld [vmem:[%s1817_s22 + $0xf8] sm:$0xf0]  ;;  %v1379_v22 = vor.u32 %v1551_v16, %v1378_v15  ;;  %v1370_v23 = vld [vmem:[%s1817_s22 + $0xd0] sm:$0xf]  ;;  %v1546_v25 = vld [vmem:[%s1817_s22 + $0xd4] sm:$0xf]  ;;  %s265_s4 = scalar_lea.vmem %s2052_s2, %s2065_s28 }
  0x40   : > { %745 = vmatmul.bf16.vlgmr.msra.gmra.mxu0 %v1894_v35  ;;  %764 = vmatmul.bf16.vlgmr.msra.gmra.mxu1 %v1894_v35  ;;  %v1550_v24 = vld [vmem:[%s1817_s22 + $0xec] sm:$0xf0]  ;;  %v1383_v26 = vor.u32 %v1547_v17, %v1380_v18  ;;  %v1372_v27 = vld [vmem:[%s1817_s22 + $0xf0] sm:$0xf0]  ;;  %v1346_v28 = vld [vmem:[%s1817_s22 + $0x98] sm:$0xf] }
  0x41   : > { %783 = vmatmul.bf16.vlgmr.msra.gmra.mxu2 %v1894_v35  ;;  %813 = vmatpush.bf16.msrb.mxu0 %v1499_v47  ;;  %v1543_v29 = vld [vmem:[%s1817_s22 + $0xb4] sm:$0xf0]  ;;  %v1539_v30 = vld [vmem:[%s1817_s22 + $0x9c] sm:$0xf]  ;;  %v1371_v32 = vor.u32 %v1550_v24, %v1370_v23  ;;  %v1375_v33 = vor.u32 %v1546_v25, %v1372_v27  ;;  %v1338_v36 = vld [vmem:[%s1817_s22 + $0x90] sm:$0xf] }
  0x42   : > { %851 = vmatpush.bf16.msrb.mxu2 %v1507_v37  ;;  %802 = vmatmul.bf16.vlgmr.msra.gmra.mxu3 %v1894_v35  ;;  %v1348_v31 = vld [vmem:[%s1817_s22 + $0xb8] sm:$0xf0]  ;;  %v1347_v34 = vor.u32 %v1543_v29, %v1346_v28  ;;  %v1542_v37 = vld [vmem:[%s1817_s22 + $0xac] sm:$0xf0]  ;;  %v1538_v38 = vld [vmem:[%s1817_s22 + $0x94] sm:$0xf] }
  0x43   : > { %870 = vmatpush.bf16.msrb.mxu3 %v1511_v41  ;;  %832 = vmatpush.bf16.msrb.mxu1 %v1503_v48  ;;  %v1351_v39 = vor.u32 %v1539_v30, %v1348_v31  ;;  %v1340_v40 = vld [vmem:[%s1817_s22 + $0xb0] sm:$0xf0]  ;;  %v1314_v41 = vld [vmem:[%s1817_s22 + $0x58] sm:$0xf]  ;;  %v1531_v43 = vld [vmem:[%s1817_s22 + $0x5c] sm:$0xf]  ;;  %v1339_v45 = vor.u32 %v1542_v37, %v1338_v36 }
  0x44   : > { %v1535_v42 = vld [vmem:[%s1817_s22 + $0x74] sm:$0xf0]  ;;  %v1316_v44 = vld [vmem:[%s1817_s22 + $0x78] sm:$0xf0]  ;;  %v1343_v46 = vor.u32 %v1538_v38, %v1340_v40  ;;  %v1306_v48 = vld [vmem:[%s1817_s22 + $0x50] sm:$0xf] }
  0x45   : > { %814 = vmatpush.bf16.msrb.mxu0 %v1467_v59  ;;  %v1315_v47 = vor.u32 %v1535_v42, %v1314_v41  ;;  %v1530_v50 = vld [vmem:[%s1817_s22 + $0x54] sm:$0xf]  ;;  %v1319_v51 = vor.u32 %v1531_v43, %v1316_v44  ;;  %v1527_v54 = vld [vmem:[%s1817_s22 + $0x34] sm:$0xf0]  ;;  %v1523_v55 = vld [vmem:[%s1817_s22 + $0x1c] sm:$0xf] }
  0x46   : > { %852 = vmatpush.bf16.msrb.mxu2 %v1475_v49  ;;  %v1534_v49 = vld [vmem:[%s1817_s22 + $0x6c] sm:$0xf0]  ;;  %v1308_v52 = vld [vmem:[%s1817_s22 + $0x70] sm:$0xf0]  ;;  %v1284_v56 = vld [vmem:[%s1817_s22 + $0x38] sm:$0xf0] }
  0x47   : > { %871 = vmatpush.bf16.msrb.mxu3 %v1479_v53  ;;  %833 = vmatpush.bf16.msrb.mxu1 %v1471_v60  ;;  %v1282_v53 = vld [vmem:[%s1817_s22 + $0x18] sm:$0xf]  ;;  %v1307_v57 = vor.u32 %v1534_v49, %v1306_v48  ;;  %v1311_v58 = vor.u32 %v1530_v50, %v1308_v52  ;;  %v1274_v60 = vld [vmem:[%s1817_s22 + $0x10] sm:$0xf]  ;;  %v1287_v62 = vor.u32 %v1523_v55, %v1284_v56  ;;  %v1522_v63 = vld [vmem:[%s1817_s22 + $0x14] sm:$0xf] }
  0x48   : > { %v1283_v59 = vor.u32 %v1527_v54, %v1282_v53  ;;  %v1276_v0 = vld [vmem:[%s1817_s22 + $0x30] sm:$0xf0]  ;;  %v1981_v3 = vld [vmem:[%s265_s4] sm:$0xff]  ;;  %s1246_s5 = sshll.u32 %s1813_s12, 7  ;;  %s1584_s7 = sshll.u32 (%p1798_p9), %s1715_s15, 5 }
  0x49   : > { %815 = vmatpush.bf16.msrb.mxu0 %v1435_v7  ;;  %v1279_v2 = vor.u32 %v1522_v63, %v1276_v0  ;;  %v990_v4 = vperm.slane %v1981_v3, 0  ;;  %v992_v10 = vperm.slane %v1981_v3, 2  ;;  %v993_v11 = vperm.slane %v1981_v3, 3  ;;  %s1988_s6 = scalar_lea.vmem [#allocation5], %s1246_s5  ;;  %s1082_s10 = scalar_lea.vmem (%p1798_p9), %s2053_s3, %s1584_s7 }
  0x4a   : > { %853 = vmatpush.bf16.msrb.mxu2 %v1443_v61  ;;  %v1526_v61 = vld [vmem:[%s1817_s22 + $0x2c] sm:$0xf0]  ;;  %v994_v43 = vperm.slane %v1981_v3, 4  ;;  %v996_v54 = vperm.slane %v1981_v3, 6  ;;  %v997_v56 = vperm.slane %v1981_v3, 7 }
  0x4b   : > { %872 = vmatpush.bf16.msrb.mxu3 %v1447_v1  ;;  %834 = vmatpush.bf16.msrb.mxu1 %v1439_v8  ;;  %v1275_v1 = vor.u32 %v1526_v61, %v1274_v60 }
  0x4d   : > { %816 = vmatpush.bf16.msrb.mxu0 %v1403_v19 }
  0x4e   : > { %854 = vmatpush.bf16.msrb.mxu2 %v1411_v9 }
  0x4f   : > { %873 = vmatpush.bf16.msrb.mxu3 %v1415_v13  ;;  %835 = vmatpush.bf16.msrb.mxu1 %v1407_v21 }
  0x50   : > { %750 = vmatmul.bf16.gmra.mxu0 %v1935_v20  ;;  %769 = vmatmul.bf16.gmra.mxu1 %v1935_v20 }
  0x51   : > { %788 = vmatmul.bf16.gmra.mxu2 %v1935_v20  ;;  %817 = vmatpush.bf16.msrb.mxu0 %v1371_v32 }
  0x52   : > { %855 = vmatpush.bf16.msrb.mxu2 %v1379_v22  ;;  %807 = vmatmul.bf16.gmra.mxu3 %v1935_v20 }
  0x53   : > { %874 = vmatpush.bf16.msrb.mxu3 %v1383_v26  ;;  %836 = vmatpush.bf16.msrb.mxu1 %v1375_v33 }
  0x55   : > { %818 = vmatpush.bf16.msrb.mxu0 %v1339_v45  ;;  %v995_v45 = vperm.slane %v1981_v3, 5 }
  0x56   : > { %856 = vmatpush.bf16.msrb.mxu2 %v1347_v34 }
  0x57   : > { %875 = vmatpush.bf16.msrb.mxu3 %v1351_v39  ;;  %837 = vmatpush.bf16.msrb.mxu1 %v1343_v46 }
  0x59   : > { %819 = vmatpush.bf16.msrb.mxu0 %v1307_v57 }
  0x5a   : > { %857 = vmatpush.bf16.msrb.mxu2 %v1315_v47 }
  0x5b   : > { %876 = vmatpush.bf16.msrb.mxu3 %v1319_v51  ;;  %838 = vmatpush.bf16.msrb.mxu1 %v1311_v58 }
  0x5d   : > { %820 = vmatpush.bf16.msrb.mxu0 %v1275_v1 }
  0x5e   : > { %858 = vmatpush.bf16.msrb.mxu2 %v1283_v59 }
  0x5f   : > { %877 = vmatpush.bf16.msrb.mxu3 %v1287_v62  ;;  %839 = vmatpush.bf16.msrb.mxu1 %v1279_v2 }
  0x60   : > { %821 = vmatmul.bf16.vlgmr.msrb.gmra.mxu0 %v1894_v35 }
  0x61   : > { %859 = vmatmul.bf16.vlgmr.msrb.gmra.mxu2 %v1894_v35 }
  0x62   : > { %840 = vmatmul.bf16.vlgmr.msrb.gmra.mxu1 %v1894_v35  ;;  %878 = vmatmul.bf16.vlgmr.msrb.gmra.mxu3 %v1894_v35  ;;  %v991_v35 = vperm.slane %v1981_v3, 1 }
  0x70   : > { %826 = vmatmul.bf16.gmra.mxu0 %v1935_v20 }
  0x71   : > { %864 = vmatmul.bf16.gmra.mxu2 %v1935_v20 }
  0x72   : > { %845 = vmatmul.bf16.gmra.mxu1 %v1935_v20  ;;  %883 = vmatmul.bf16.gmra.mxu3 %v1935_v20 }
  0xbd   : > { %v746_v5 = vpop.f32.mrf.mxu0  ;;  %v765_v7 = vpop.f32.mrf.mxu1 }
  0xbe   : > { %v1006_v6 = vadd.f32 %v990_v4, %v746_v5  ;;  %v1007_v8 = vadd.f32 %v991_v35, %v765_v7 }
  0xc0   : > { %v1038_v9 = vpack.c.bf16 %v1007_v8, %v1006_v6 }
  0xc2   : > { %1054 = vst [vmem:[%s1988_s6] sm:$0xff] %v1038_v9 }
  0xc4   : > { %v784_v12 = vpop.f32.mrf.mxu2 }
  0xc5   : > { %v1008_v13 = vadd.f32 %v992_v10, %v784_v12  ;;  %v803_v14 = vpop.f32.mrf.mxu3  ;;  %v748_v15 = vpop.f32.mrf.mxu0 }
  0xc6   : > { %v1009_v16 = vadd.f32 %v993_v11, %v803_v14  ;;  %v1014_v17 = vadd.f32 %v990_v4, %v748_v15  ;;  %v767_v18 = vpop.f32.mrf.mxu1 }
  0xc7   : > { %v1015_v19 = vadd.f32 %v991_v35, %v767_v18 }
  0xc8   : > { %v1039_v20 = vpack.c.bf16 %v1009_v16, %v1008_v13 }
  0xc9   : > { %v1042_v21 = vpack.c.bf16 %v1015_v19, %v1014_v17 }
  0xca   : > { %1055 = vst [vmem:[%s1988_s6 + $0x8] sm:$0xff] %v1039_v20 }
  0xcb   : > { %1058 = vst [vmem:[%s1988_s6 + $0x20] sm:$0xff] %v1042_v21 }
  0xcc   : > { %v786_v22 = vpop.f32.mrf.mxu2 }
  0xcd   : > { %v1016_v23 = vadd.f32 %v992_v10, %v786_v22  ;;  %v805_v24 = vpop.f32.mrf.mxu3  ;;  %v751_v25 = vpop.f32.mrf.mxu0 }
  0xce   : > { %v1017_v26 = vadd.f32 %v993_v11, %v805_v24  ;;  %v1022_v27 = vadd.f32 %v990_v4, %v751_v25  ;;  %v770_v28 = vpop.f32.mrf.mxu1 }
  0xcf   : > { %v1023_v29 = vadd.f32 %v991_v35, %v770_v28 }
  0xd0   : > { %v1043_v30 = vpack.c.bf16 %v1017_v26, %v1016_v23 }
  0xd1   : > { %v1046_v31 = vpack.c.bf16 %v1023_v29, %v1022_v27  ;;  %v1095_v27 = vld [vmem:[%s1988_s6] sm:$0xff] (%p1798_p9)  ;;  %v1097_v28 = vld [vmem:[%s1988_s6 + $0x8] sm:$0xff] (%p1798_p9) }
  0xd2   : > { %1059 = vst [vmem:[%s1988_s6 + $0x28] sm:$0xff] %v1043_v30 }
  0xd3   : > { %1062 = vst [vmem:[%s1988_s6 + $0x40] sm:$0xff] %v1046_v31  ;;  %v1103_v31 = vld [vmem:[%s1988_s6 + $0x20] sm:$0xff] (%p1798_p9) }
  0xd4   : > { %v789_v32 = vpop.f32.mrf.mxu2  ;;  %1096 = vst [vmem:[%s1082_s10] sm:$0xff] (%p1798_p9), %v1095_v27 }
  0xd5   : > { %v1024_v33 = vadd.f32 %v992_v10, %v789_v32  ;;  %v808_v34 = vpop.f32.mrf.mxu3  ;;  %v753_v36 = vpop.f32.mrf.mxu0  ;;  %1098 = vst [vmem:[%s1082_s10 + $0x8] sm:$0xff] (%p1798_p9), %v1097_v28 }
  0xd6   : > { %v1025_v37 = vadd.f32 %v993_v11, %v808_v34  ;;  %v1030_v38 = vadd.f32 %v990_v4, %v753_v36  ;;  %v772_v39 = vpop.f32.mrf.mxu1  ;;  %1104 = vst [vmem:[%s1082_s10 + $0x40] sm:$0xff] (%p1798_p9), %v1103_v31 }
  0xd7   : > { %v1031_v40 = vadd.f32 %v991_v35, %v772_v39 }
  0xd8   : > { %v1047_v41 = vpack.c.bf16 %v1025_v37, %v1024_v33 }
  0xd9   : > { %v1050_v42 = vpack.c.bf16 %v1031_v40, %v1030_v38  ;;  %v1105_v32 = vld [vmem:[%s1988_s6 + $0x28] sm:$0xff] (%p1798_p9) }
  0xda   : > { %1063 = vst [vmem:[%s1988_s6 + $0x48] sm:$0xff] %v1047_v41  ;;  %v1111_v36 = vld [vmem:[%s1988_s6 + $0x40] sm:$0xff] (%p1798_p9) }
  0xdb   : > { %1066 = vst [vmem:[%s1988_s6 + $0x60] sm:$0xff] %v1050_v42 }
  0xdc   : > { %v791_v44 = vpop.f32.mrf.mxu2  ;;  %1106 = vst [vmem:[%s1082_s10 + $0x48] sm:$0xff] (%p1798_p9), %v1105_v32 }
  0xdd   : > { %v1032_v46 = vadd.f32 %v992_v10, %v791_v44  ;;  %v810_v47 = vpop.f32.mrf.mxu3  ;;  %v822_v49 = vpop.f32.mrf.mxu0  ;;  %1112 = vst [vmem:[%s1082_s10 + $0x80] sm:$0xff] (%p1798_p9), %v1111_v36 }
  0xde   : > { %v1033_v48 = vadd.f32 %v993_v11, %v810_v47  ;;  %v1010_v50 = vadd.f32 %v994_v43, %v822_v49 }
  0xdf   : > { %v841_v51 = vpop.f32.mrf.mxu1 }
  0xe0   : > { %v1051_v52 = vpack.c.bf16 %v1033_v48, %v1032_v46  ;;  %v1011_v53 = vadd.f32 %v995_v45, %v841_v51 }
  0xe1   : > { %v1113_v37 = vld [vmem:[%s1988_s6 + $0x48] sm:$0xff] (%p1798_p9) }
  0xe2   : > { %1067 = vst [vmem:[%s1988_s6 + $0x68] sm:$0xff] %v1051_v52  ;;  %v1040_v55 = vpack.c.bf16 %v1011_v53, %v1010_v50  ;;  %v1119_v40 = vld [vmem:[%s1988_s6 + $0x60] sm:$0xff] (%p1798_p9) }
  0xe3   : > { %1114 = vst [vmem:[%s1082_s10 + $0x88] sm:$0xff] (%p1798_p9), %v1113_v37 }
  0xe4   : > { %1056 = vst [vmem:[%s1988_s6 + $0x10] sm:$0xff] %v1040_v55  ;;  %v860_v57 = vpop.f32.mrf.mxu2 }
  0xe5   : > { %v1012_v58 = vadd.f32 %v996_v54, %v860_v57  ;;  %v879_v59 = vpop.f32.mrf.mxu3  ;;  %v824_v61 = vpop.f32.mrf.mxu0  ;;  %1120 = vst [vmem:[%s1082_s10 + $0xc0] sm:$0xff] (%p1798_p9), %v1119_v40 }
  0xe6   : > { %v1013_v60 = vadd.f32 %v997_v56, %v879_v59  ;;  %v1018_v62 = vadd.f32 %v994_v43, %v824_v61 }
  0xe7   : > { %v843_v63 = vpop.f32.mrf.mxu1 }
  0xe8   : > { %v1041_v0 = vpack.c.bf16 %v1013_v60, %v1012_v58  ;;  %v1019_v1 = vadd.f32 %v995_v45, %v843_v63 }
  0xe9   : > { %v1121_v41 = vld [vmem:[%s1988_s6 + $0x68] sm:$0xff] (%p1798_p9) }
  0xea   : > { %1057 = vst [vmem:[%s1988_s6 + $0x18] sm:$0xff] %v1041_v0  ;;  %v1044_v2 = vpack.c.bf16 %v1019_v1, %v1018_v62 }
  0xeb   : > { %v1099_v29 = vld [vmem:[%s1988_s6 + $0x10] sm:$0xff] (%p1798_p9)  ;;  %1122 = vst [vmem:[%s1082_s10 + $0xc8] sm:$0xff] (%p1798_p9), %v1121_v41 }
  0xec   : > { %1060 = vst [vmem:[%s1988_s6 + $0x30] sm:$0xff] %v1044_v2  ;;  %v862_v4 = vpop.f32.mrf.mxu2 }
  0xed   : > { %v1020_v35 = vadd.f32 %v996_v54, %v862_v4  ;;  %v881_v5 = vpop.f32.mrf.mxu3  ;;  %v827_v3 = vpop.f32.mrf.mxu0  ;;  %1100 = vst [vmem:[%s1082_s10 + $0x10] sm:$0xff] (%p1798_p9), %v1099_v29 }
  0xee   : > { %v1021_v6 = vadd.f32 %v997_v56, %v881_v5  ;;  %v1026_v7 = vadd.f32 %v994_v43, %v827_v3 }
  0xef   : > { %v846_v8 = vpop.f32.mrf.mxu1 }
  0xf0   : > { %v1045_v9 = vpack.c.bf16 %v1021_v6, %v1020_v35  ;;  %v1027_v10 = vadd.f32 %v995_v45, %v846_v8 }
  0xf1   : > { %v1101_v30 = vld [vmem:[%s1988_s6 + $0x18] sm:$0xff] (%p1798_p9) }
  0xf2   : > { %1061 = vst [vmem:[%s1988_s6 + $0x38] sm:$0xff] %v1045_v9  ;;  %v1048_v11 = vpack.c.bf16 %v1027_v10, %v1026_v7 }
  0xf3   : > { %1102 = vst [vmem:[%s1082_s10 + $0x18] sm:$0xff] (%p1798_p9), %v1101_v30  ;;  %v1107_v33 = vld [vmem:[%s1988_s6 + $0x30] sm:$0xff] (%p1798_p9) }
  0xf4   : > { %1064 = vst [vmem:[%s1988_s6 + $0x50] sm:$0xff] %v1048_v11  ;;  %v865_v12 = vpop.f32.mrf.mxu2 }
  0xf5   : > { %v1028_v13 = vadd.f32 %v996_v54, %v865_v12  ;;  %v884_v14 = vpop.f32.mrf.mxu3  ;;  %v829_v16 = vpop.f32.mrf.mxu0  ;;  %1108 = vst [vmem:[%s1082_s10 + $0x50] sm:$0xff] (%p1798_p9), %v1107_v33 }
  0xf6   : > { %v1029_v15 = vadd.f32 %v997_v56, %v884_v14  ;;  %v1034_v17 = vadd.f32 %v994_v43, %v829_v16 }
  0xf7   : > { %v848_v18 = vpop.f32.mrf.mxu1 }
  0xf8   : > { %v1049_v19 = vpack.c.bf16 %v1029_v15, %v1028_v13  ;;  %v1035_v20 = vadd.f32 %v995_v45, %v848_v18 }
  0xf9   : > { %v1109_v34 = vld [vmem:[%s1988_s6 + $0x38] sm:$0xff] (%p1798_p9) }
  0xfa   : > { %1065 = vst [vmem:[%s1988_s6 + $0x58] sm:$0xff] %v1049_v19  ;;  %v1052_v21 = vpack.c.bf16 %v1035_v20, %v1034_v17 }
  0xfb   : > { %1110 = vst [vmem:[%s1082_s10 + $0x58] sm:$0xff] (%p1798_p9), %v1109_v34  ;;  %v1115_v38 = vld [vmem:[%s1988_s6 + $0x50] sm:$0xff] (%p1798_p9) }
  0xfc   : > { %1068 = vst [vmem:[%s1988_s6 + $0x70] sm:$0xff] %v1052_v21  ;;  %v867_v22 = vpop.f32.mrf.mxu2 }
  0xfd   : > { %v1036_v23 = vadd.f32 %v996_v54, %v867_v22  ;;  %v886_v24 = vpop.f32.mrf.mxu3  ;;  %1116 = vst [vmem:[%s1082_s10 + $0x90] sm:$0xff] (%p1798_p9), %v1115_v38 }
  0xfe   : > { %v1037_v25 = vadd.f32 %v997_v56, %v886_v24  ;;  %1076 = sbr.rel (!%p1798_p9) target bundleno = 267 (0x10b), region = 48 }
 0x100   : > { %v1053_v26 = vpack.c.bf16 %v1037_v25, %v1036_v23 }
 0x101   : > { %v1117_v39 = vld [vmem:[%s1988_s6 + $0x58] sm:$0xff] (%p1798_p9) }
 0x102   : > { %1069 = vst [vmem:[%s1988_s6 + $0x78] sm:$0xff] %v1053_v26 }
 0x103   : > { %1118 = vst [vmem:[%s1082_s10 + $0x98] sm:$0xff] %v1117_v39  ;;  %v1123_v42 = vld [vmem:[%s1988_s6 + $0x70] sm:$0xff] }
 0x104   : > { %1124 = vst [vmem:[%s1082_s10 + $0xd0] sm:$0xff] %v1123_v42 }
 0x109   : > { %v1125_v43 = vld [vmem:[%s1988_s6 + $0x78] sm:$0xff] }
 0x10a   : > { %1126 = vst [vmem:[%s1082_s10 + $0xd8] sm:$0xff] %v1125_v43 }
 0x10b PF: > { %s16_s17 = sadd.s32 1, %s1723_s17   ;;  %s2057_s12 = smov %s1707_s13 }
 0x10c   : > { %p13_p2 = scmp.ge.s32.totalorder %s16_s17, 4   ;;  %s2058_s13 = smov %s1711_s14 }
 0x10d   : > { %s2059_s14 = smov %s1796_s24  ;;  %s2060_s15 = smov %s1719_s16 }
 0x10e   : > { %s2061_s16 = smov %s2063_s19  ;;  %15 = sbr.rel (!%p13_p2) target bundleno = 4 (0x4), region = 109 }
 0x113   :  { %1142 = vsyncpa [#allocation4], 1 }
 0x114   :  { %1144 = vsyncpa [#allocation4 + $0x1], 1 }

// kernel: decoder_forward.18
= control target key start
LH: loop header
LB: loop body
LE: loop exit
PB: predicated region body
PF: predicated region fallthrough
CT: control target
= control target key end

     0   :  { %s293_s1 = inlined_call_operand.vmem [shape: bf16[128,128], index: 1, kind: input, shape index: {}]   ;;  %s294_s2 = inlined_call_operand.vmem [shape: f32[1,128], index: 2, kind: input, shape index: {}]   ;;  %s295_s0 = inlined_call_operand.vmem [shape: bf16[32,128], index: 0, kind: input, shape index: {}]   ;;  %s296_s3 = inlined_call_operand.vmem [shape: bf16[32,128], index: 3, kind: output, shape index: {}]  }
   0x1   :  { %v213_v0 = vld [vmem:[%s293_s1 + $0x38] sm:$0xff]  ;;  %v212_v1 = vld [vmem:[%s293_s1 + $0x30] sm:$0xff]  ;;  %v211_v2 = vld [vmem:[%s293_s1 + $0x28] sm:$0xff] }
   0x2   :  { %106 = vmatpush.bf16.msra.mxu0 %v213_v0  ;;  %225 = vmatpush.bf16.msra.mxu1 %v213_v0  ;;  %v210_v3 = vld [vmem:[%s293_s1 + $0x20] sm:$0xff]  ;;  %v209_v4 = vld [vmem:[%s293_s1 + $0x18] sm:$0xff]  ;;  %v208_v5 = vld [vmem:[%s293_s1 + $0x10] sm:$0xff] }
   0x3   :  { %v207_v6 = vld [vmem:[%s293_s1 + $0x8] sm:$0xff]  ;;  %v206_v7 = vld [vmem:[%s293_s1] sm:$0xff] }
   0x4   :  { %v204_v8 = vld [vmem:[%s295_s0] sm:$0xff]  ;;  %v205_v9 = vld [vmem:[%s295_s0 + $0x8] sm:$0xff] }
   0x5   :  { %v233_v12 = vld [vmem:[%s294_s2] ss:$0 sm:$0xff] }
   0x6   :  { %107 = vmatpush.bf16.msra.mxu0 %v212_v1  ;;  %226 = vmatpush.bf16.msra.mxu1 %v212_v1 }
   0xa   :  { %108 = vmatpush.bf16.msra.mxu0 %v211_v2  ;;  %227 = vmatpush.bf16.msra.mxu1 %v211_v2 }
   0xe   :  { %109 = vmatpush.bf16.msra.mxu0 %v210_v3  ;;  %228 = vmatpush.bf16.msra.mxu1 %v210_v3 }
  0x12   :  { %110 = vmatpush.bf16.msra.mxu0 %v209_v4  ;;  %229 = vmatpush.bf16.msra.mxu1 %v209_v4 }
  0x16   :  { %111 = vmatpush.bf16.msra.mxu0 %v208_v5  ;;  %230 = vmatpush.bf16.msra.mxu1 %v208_v5 }
  0x1a   :  { %112 = vmatpush.bf16.msra.mxu0 %v207_v6  ;;  %231 = vmatpush.bf16.msra.mxu1 %v207_v6 }
  0x1e   :  { %113 = vmatpush.bf16.msra.mxu0 %v206_v7  ;;  %232 = vmatpush.bf16.msra.mxu1 %v206_v7 }
  0x21   :  { %114 = vmatmul.bf16.vlgmr.msra.gmra.mxu0 %v204_v8  ;;  %119 = vmatmul.bf16.vlgmr.msra.gmra.mxu1 %v205_v9 }
  0x9e   :  { %v115_v10 = vpop.f32.mrf.mxu0  ;;  %v120_v11 = vpop.f32.mrf.mxu1 }
  0x9f   :  { %v144_v13 = vadd.f32 %v233_v12, %v115_v10  ;;  %v146_v14 = vadd.f32 %v233_v12, %v120_v11 }
  0xa1   :  { %v148_v19 = vmax.f32 %v144_v13, 0.0  ;;  %v150_v20 = vmax.f32 %v146_v14, 0.0 }
  0xa6   :  { %v117_v15 = vpop.f32.mrf.mxu0  ;;  %v122_v16 = vpop.f32.mrf.mxu1 }
  0xa7   :  { %v145_v17 = vadd.f32 %v233_v12, %v117_v15  ;;  %v147_v18 = vadd.f32 %v233_v12, %v122_v16 }
  0xa9   :  { %v149_v21 = vmax.f32 %v145_v17, 0.0  ;;  %v151_v22 = vmax.f32 %v147_v18, 0.0 }
  0xab   :  { %v217_v23 = vpack.c.bf16 %v149_v21, %v148_v19  ;;  %v222_v24 = vpack.c.bf16 %v151_v22, %v150_v20 }
  0xad   :  { %218 = vst [vmem:[%s296_s3] sm:$0xff] %v217_v23  }
  0xae   :  { %224 = vst [vmem:[%s296_s3 + $0x8] sm:$0xff] %v222_v24  }

// kernel: decoder_forward.19
= control target key start
LH: loop header
LB: loop body
LE: loop exit
PB: predicated region body
PF: predicated region fallthrough
CT: control target
= control target key end

     0   :  { %11 = vsyncpa [#allocation4], 0  ;;  %s421_s24 = smov [#allocation3]   ;;  %s422_s26 = smov 64   ;;  %s513_s0 = inlined_call_operand.vmem [shape: bf16[32,128], index: 0, kind: input, shape index: {}]   ;;  %s514_s1 = inlined_call_operand.hbm [shape: bf16[128,128], index: 1, kind: input, shape index: {}]   ;;  %s515_s2 = inlined_call_operand.vmem [shape: f32[1,128], index: 2, kind: input, shape index: {}]   ;;  %s516_s3 = inlined_call_operand.vmem [shape: bf16[32,128], index: 3, kind: input, shape index: {}]   ;;  %s517_s4 = inlined_call_operand.vmem [shape: f32[1,128], index: 4, kind: input, shape index: {}]   ;;  %s518_s5 = inlined_call_operand.vmem [shape: f32[1,128], index: 5, kind: input, shape index: {}]   ;;  %s519_s6 = inlined_call_operand.vmem [shape: bf16[32,128], index: 6, kind: output, shape index: {}]  }
   0x1   :  { %s18_s23 = sshll.u32 %s514_s1, 4  ;;  %s20_s25 = sshll.u32 %s421_s24, 4  ;;  %s19_s23 = int_to_ptr.hbm [resolvable:$true] %s18_s23  ;;  %s21_s25 = int_to_ptr.vmem [resolvable:$true] %s20_s25 }
   0x2   :  { %s423_s27 = smov 4  }
   0x3   :  { %26 = dma.hbm_to_vmem [thread:$0]  %s19_s23, 1024, %s21_s25, [#allocation4], %s422_s26, %s422_s26, %s423_s27  }
   0x4   :  { %419 = dma.done.wait [#allocation4], 1024  }
   0x5   :  { %420 = vsyncadd [#allocation4], 4294966272  ;;  %v352_v0 = vld [vmem:[#allocation3 + $0x38] sm:$0xff]  ;;  %v351_v1 = vld [vmem:[#allocation3 + $0x30] sm:$0xff]  ;;  %v201_v29 = vlaneseq }
   0x6   :  { %131 = vmatpush.bf16.msra.mxu0 %v352_v0  ;;  %373 = vmatpush.bf16.msra.mxu1 %v352_v0  ;;  %v350_v2 = vld [vmem:[#allocation3 + $0x28] sm:$0xff]  ;;  %v349_v3 = vld [vmem:[#allocation3 + $0x20] sm:$0xff]  ;;  %v348_v4 = vld [vmem:[#allocation3 + $0x18] sm:$0xff] }
   0x7   :  { %v347_v5 = vld [vmem:[#allocation3 + $0x10] sm:$0xff]  ;;  %v346_v6 = vld [vmem:[#allocation3 + $0x8] sm:$0xff]  ;;  %v345_v7 = vld [vmem:[#allocation3] sm:$0xff]  ;;  %v202_v30 = vand.u32 127, %v201_v29 }
   0x8   :  { %v343_v8 = vld [vmem:[%s513_s0] sm:$0xff]  ;;  %v344_v9 = vld [vmem:[%s513_s0 + $0x8] sm:$0xff] }
   0x9   :  { %v371_v10 = vld [vmem:[%s516_s3 + $0x8] sm:$0xff]   ;;  %v354_v11 = vld [vmem:[%s516_s3] sm:$0xff]   ;;  %vm203_vm0 = vcmp.lt.s32.totalorder %v202_v30, 32 }
   0xa   :  { %132 = vmatpush.bf16.msra.mxu0 %v351_v1  ;;  %374 = vmatpush.bf16.msra.mxu1 %v351_v1  ;;  %v384_v12 = vld [vmem:[%s515_s2] ss:$0 sm:$0xff]  ;;  %v359_v13 = vunpack.c.l.bf16 %v371_v10  ;;  %v355_v14 = vunpack.c.l.bf16 %v354_v11  ;;  %v360_v21 = vunpack.c.h.bf16 %v371_v10  ;;  %v356_v22 = vunpack.c.h.bf16 %v354_v11 }
   0xb   :  { %v386_v29 = vld [vmem:[%s518_s5] ss:$0 sm:$0xff] }
   0xe   :  { %133 = vmatpush.bf16.msra.mxu0 %v350_v2  ;;  %375 = vmatpush.bf16.msra.mxu1 %v350_v2 }
  0x12   :  { %134 = vmatpush.bf16.msra.mxu0 %v349_v3  ;;  %376 = vmatpush.bf16.msra.mxu1 %v349_v3 }
  0x16   :  { %135 = vmatpush.bf16.msra.mxu0 %v348_v4  ;;  %377 = vmatpush.bf16.msra.mxu1 %v348_v4 }
  0x1a   :  { %136 = vmatpush.bf16.msra.mxu0 %v347_v5  ;;  %378 = vmatpush.bf16.msra.mxu1 %v347_v5 }
  0x1e   :  { %137 = vmatpush.bf16.msra.mxu0 %v346_v6  ;;  %379 = vmatpush.bf16.msra.mxu1 %v346_v6 }
  0x22   :  { %138 = vmatpush.bf16.msra.mxu0 %v345_v7  ;;  %380 = vmatpush.bf16.msra.mxu1 %v345_v7 }
  0x25   :  { %139 = vmatmul.bf16.vlgmr.msra.gmra.mxu0 %v343_v8  ;;  %144 = vmatmul.bf16.vlgmr.msra.gmra.mxu1 %v344_v9 }
  0xa2   :  { %v140_v15 = vpop.f32.mrf.mxu0  ;;  %v145_v16 = vpop.f32.mrf.mxu1 }
  0xa3   :  { %v169_v17 = vadd.f32 %v384_v12, %v140_v15  ;;  %v171_v18 = vadd.f32 %v384_v12, %v145_v16 }
  0xa5   :  { %v183_v19 = vadd.f32 %v359_v13, %v171_v18  ;;  %v181_v20 = vadd.f32 %v355_v14, %v169_v17 }
  0xa7   :  { %189 = vadd.xlane.f32.xlu1 %v183_v19  ;;  %185 = vadd.xlane.f32.xlu0 %v181_v20 }
  0xaa   :  { %v142_v23 = vpop.f32.mrf.mxu0  ;;  %v147_v24 = vpop.f32.mrf.mxu1 }
  0xab   :  { %v170_v25 = vadd.f32 %v384_v12, %v142_v23  ;;  %v172_v26 = vadd.f32 %v384_v12, %v147_v24 }
  0xad   :  { %v184_v27 = vadd.f32 %v360_v21, %v172_v26  ;;  %v182_v28 = vadd.f32 %v356_v22, %v170_v25  ;;  %v385_v22 = vld [vmem:[%s517_s4] ss:$0 sm:$0xff] }
  0xaf   :  { %191 = vadd.xlane.f32.xlu1 %v184_v27  ;;  %187 = vadd.xlane.f32.xlu0 %v182_v28 }
 0x11a   :  { %v190_v31 = vpop.xlane.xlu1 %189  ;;  %v186_v32 = vpop.xlane.xlu0 %185 }
 0x11b   :  { %v195_v33 = vmul.f32 0.03125, %v190_v31  ;;  %v193_v34 = vmul.f32 0.03125, %v186_v32 }
 0x11d   :  { %v199_v35 = vsub.f32 %v183_v19, %v195_v33  ;;  %v197_v36 = vsub.f32 %v181_v20, %v193_v34 }
 0x11f   :  { %v478_v37 = vsel %vm203_vm0, %v197_v36, 0.0  ;;  %v481_v38 = vsel %vm203_vm0, %v199_v35, 0.0 }
 0x120   :  { %v210_v39 = vmul.f32 %v478_v37, %v478_v37  ;;  %v212_v40 = vmul.f32 %v481_v38, %v481_v38 }
 0x122   :  { %v192_v41 = vpop.xlane.xlu1 %191  ;;  %214 = vadd.xlane.f32.xlu2 %v210_v39  ;;  %218 = vadd.xlane.f32.xlu0 %v212_v40  ;;  %v188_v42 = vpop.xlane.xlu0 %187 }
 0x123   :  { %v196_v43 = vmul.f32 0.03125, %v192_v41  ;;  %v194_v44 = vmul.f32 0.03125, %v188_v42 }
 0x125   :  { %v200_v45 = vsub.f32 %v184_v27, %v196_v43  ;;  %v198_v46 = vsub.f32 %v182_v28, %v194_v44 }
 0x127   :  { %v488_v47 = vsel %vm203_vm0, %v200_v45, 0.0  ;;  %v491_v48 = vsel %vm203_vm0, %v198_v46, 0.0 }
 0x128   :  { %v213_v49 = vmul.f32 %v488_v47, %v488_v47  ;;  %v211_v50 = vmul.f32 %v491_v48, %v491_v48 }
 0x12a   :  { %220 = vadd.xlane.f32.xlu1 %v213_v49  ;;  %216 = vadd.xlane.f32.xlu2 %v211_v50 }
 0x195   :  { %v215_v51 = vpop.xlane.xlu2 %214  ;;  %v219_v52 = vpop.xlane.xlu0 %218 }
 0x196   :  { %v222_v53 = vmul.f32 0.03125, %v215_v51  ;;  %v224_v54 = vmul.f32 0.03125, %v219_v52 }
 0x198   :  { %v226_v55 = vadd.f32 1e-05, %v222_v53  ;;  %v228_v56 = vadd.f32 1e-05, %v224_v54 }
 0x19a   :  { %387 = vrsqrt.f32 %v226_v55  ;;  %vm256_vm3 = vweird.f32 %v228_v56  ;;  %vm236_vm4 = vweird.f32 %v226_v55 }
 0x19b   :  { %389 = vrsqrt.f32 %v228_v56 }
 0x19d   :  { %v221_v57 = vpop.xlane.xlu1 %220  ;;  %v217_v58 = vpop.xlane.xlu2 %216 }
 0x19e   :  { %v225_v59 = vmul.f32 0.03125, %v221_v57  ;;  %v223_v60 = vmul.f32 0.03125, %v217_v58 }
 0x1a0   :  { %v388_v61 = vpop.eup %387  ;;  %v229_v62 = vadd.f32 1e-05, %v225_v59  ;;  %v227_v63 = vadd.f32 1e-05, %v223_v60 }
 0x1a1   :  { %v390_v0 = vpop.eup %389  ;;  %v231_v1 = vmul.f32 %v388_v61, %v226_v55  ;;  %vm237_vm2 = vweird.f32 %v388_v61 }
 0x1a2   :  { %v251_v2 = vmul.f32 %v390_v0, %v228_v56  ;;  %391 = vrsqrt.f32 %v229_v62  ;;  %vm257_vm1 = vweird.f32 %v390_v0  ;;  %vm238_vm6 = vmor %vm236_vm4, %vm237_vm2  ;;  %vm266_vm9 = vweird.f32 %v229_v62 }
 0x1a3   :  { %v232_v3 = vmul.f32 %v388_v61, %v231_v1  ;;  %393 = vrsqrt.f32 %v227_v63  ;;  %vm258_vm5 = vmor %vm256_vm3, %vm257_vm1  ;;  %vm246_vm11 = vweird.f32 %v227_v63 }
 0x1a4   :  { %v252_v4 = vmul.f32 %v390_v0, %v251_v2 }
 0x1a5   :  { %v233_v5 = vmul.f32 0.5, %v232_v3 }
 0x1a6   :  { %v253_v6 = vmul.f32 0.5, %v252_v4 }
 0x1a7   :  { %v234_v7 = vsub.f32 1.5, %v233_v5 }
 0x1a8   :  { %v392_v8 = vpop.eup %391  ;;  %v254_v9 = vsub.f32 1.5, %v253_v6 }
 0x1a9   :  { %v394_v10 = vpop.eup %393  ;;  %v261_v11 = vmul.f32 %v392_v8, %v229_v62  ;;  %v235_v12 = vmul.f32 %v388_v61, %v234_v7  ;;  %vm267_vm7 = vweird.f32 %v392_v8 }
 0x1aa   :  { %v255_v13 = vmul.f32 %v390_v0, %v254_v9  ;;  %v241_v14 = vmul.f32 %v394_v10, %v227_v63  ;;  %vm247_vm8 = vweird.f32 %v394_v10  ;;  %vm268_vm10 = vmor %vm266_vm9, %vm267_vm7 }
 0x1ab   :  { %v262_v15 = vmul.f32 %v392_v8, %v261_v11  ;;  %v239_v19 = vsel %vm238_vm6, %v388_v61, %v235_v12  ;;  %vm248_vm12 = vmor %vm246_vm11, %vm247_vm8 }
 0x1ac   :  { %v242_v16 = vmul.f32 %v394_v10, %v241_v14  ;;  %v259_v17 = vsel %vm258_vm5, %v390_v0, %v255_v13  ;;  %v270_v25 = vmul.f32 %v239_v19, %v478_v37 }
 0x1ad   :  { %v263_v18 = vmul.f32 0.5, %v262_v15  ;;  %v272_v23 = vmul.f32 %v259_v17, %v481_v38 }
 0x1ae   :  { %v243_v20 = vmul.f32 0.5, %v242_v16  ;;  %v278_v33 = vmul.f32 %v385_v22, %v270_v25 }
 0x1af   :  { %v264_v21 = vsub.f32 1.5, %v263_v18  ;;  %v280_v30 = vmul.f32 %v385_v22, %v272_v23 }
 0x1b0   :  { %v244_v24 = vsub.f32 1.5, %v243_v20  ;;  %v286_v39 = vadd.f32 %v386_v29, %v278_v33 }
 0x1b1   :  { %v265_v26 = vmul.f32 %v392_v8, %v264_v21  ;;  %v288_v37 = vadd.f32 %v386_v29, %v280_v30 }
 0x1b2   :  { %v245_v27 = vmul.f32 %v394_v10, %v244_v24 }
 0x1b3   :  { %v269_v28 = vsel %vm268_vm10, %v392_v8, %v265_v26 }
 0x1b4   :  { %v273_v31 = vmul.f32 %v269_v28, %v488_v47  ;;  %v249_v32 = vsel %vm248_vm12, %v394_v10, %v245_v27 }
 0x1b5   :  { %v271_v34 = vmul.f32 %v249_v32, %v491_v48 }
 0x1b6   :  { %v281_v35 = vmul.f32 %v385_v22, %v273_v31 }
 0x1b7   :  { %v279_v36 = vmul.f32 %v385_v22, %v271_v34 }
 0x1b8   :  { %v289_v38 = vadd.f32 %v386_v29, %v281_v35 }
 0x1b9   :  { %v287_v40 = vadd.f32 %v386_v29, %v279_v36 }
 0x1ba   :  { %v369_v41 = vpack.c.bf16 %v289_v38, %v288_v37 }
 0x1bb   :  { %v364_v42 = vpack.c.bf16 %v287_v40, %v286_v39 }
 0x1bc   :  { %372 = vst [vmem:[%s519_s6 + $0x8] sm:$0xff] %v369_v41  }
 0x1bd   :  { %365 = vst [vmem:[%s519_s6] sm:$0xff] %v364_v42  }
 0x1be   :  { %302 = vsyncpa [#allocation4], 1 }

// kernel: decoder_forward.17
= control target key start
LH: loop header
LB: loop body
LE: loop exit
PB: predicated region body
PF: predicated region fallthrough
CT: control target
= control target key end

     0   :  { %11 = vsyncpa [#allocation4], 0  ;;  %s844_s24 = smov [#allocation3]   ;;  %s845_s26 = smov 64   ;;  %s968_s0 = inlined_call_operand.vmem [shape: bf16[32,512], index: 0, kind: input, shape index: {}]   ;;  %s969_s1 = inlined_call_operand.hbm [shape: bf16[512,128], index: 1, kind: input, shape index: {}]   ;;  %s970_s2 = inlined_call_operand.vmem [shape: f32[1,128], index: 2, kind: input, shape index: {}]   ;;  %s971_s3 = inlined_call_operand.vmem [shape: bf16[32,128], index: 3, kind: input, shape index: {}]   ;;  %s972_s4 = inlined_call_operand.vmem [shape: f32[1,128], index: 4, kind: input, shape index: {}]   ;;  %s973_s5 = inlined_call_operand.vmem [shape: f32[1,128], index: 5, kind: input, shape index: {}]   ;;  %s974_s6 = inlined_call_operand.vmem [shape: bf16[32,128], index: 6, kind: output, shape index: {}]  }
   0x1   :  { %s18_s23 = sshll.u32 %s969_s1, 4  ;;  %s20_s25 = sshll.u32 %s844_s24, 4  ;;  %s19_s23 = int_to_ptr.hbm [resolvable:$true] %s18_s23  ;;  %s21_s25 = int_to_ptr.vmem [resolvable:$true] %s20_s25 }
   0x2   :  { %s846_s27 = smov 4  }
   0x3   :  { %26 = dma.hbm_to_vmem [thread:$0]  %s19_s23, 4096, %s21_s25, [#allocation4], %s845_s26, %s845_s26, %s846_s27  }
   0x4   :  { %842 = dma.done.wait [#allocation4], 4096  }
   0x5   :  { %843 = vsyncadd [#allocation4], 4294963200  ;;  %v759_v0 = vld [vmem:[#allocation3 + $0x38] sm:$0xff]  ;;  %v758_v4 = vld [vmem:[#allocation3 + $0x30] sm:$0xff] }
   0x6   :  { %v767_v1 = vld [vmem:[#allocation3 + $0x78] sm:$0xff]  ;;  %355 = vmatpush.bf16.msra.mxu0 %v759_v0  ;;  %v766_v5 = vld [vmem:[#allocation3 + $0x70] sm:$0xff]  ;;  %v757_v8 = vld [vmem:[#allocation3 + $0x28] sm:$0xff] }
   0x7   :  { %v775_v2 = vld [vmem:[#allocation3 + $0xb8] sm:$0xff]  ;;  %374 = vmatpush.bf16.msra.mxu1 %v767_v1  ;;  %v774_v6 = vld [vmem:[#allocation3 + $0xb0] sm:$0xff]  ;;  %v765_v9 = vld [vmem:[#allocation3 + $0x68] sm:$0xff] }
   0x8   :  { %v783_v3 = vld [vmem:[#allocation3 + $0xf8] sm:$0xff]  ;;  %393 = vmatpush.bf16.msra.mxu2 %v775_v2  ;;  %v782_v7 = vld [vmem:[#allocation3 + $0xf0] sm:$0xff]  ;;  %v773_v10 = vld [vmem:[#allocation3 + $0xa8] sm:$0xff] }
   0x9   :  { %412 = vmatpush.bf16.msra.mxu3 %v783_v3  ;;  %v781_v11 = vld [vmem:[#allocation3 + $0xe8] sm:$0xff]  ;;  %v756_v12 = vld [vmem:[#allocation3 + $0x20] sm:$0xff]  ;;  %v755_v16 = vld [vmem:[#allocation3 + $0x18] sm:$0xff] }
   0xa   :  { %356 = vmatpush.bf16.msra.mxu0 %v758_v4  ;;  %v764_v13 = vld [vmem:[#allocation3 + $0x60] sm:$0xff]  ;;  %v763_v17 = vld [vmem:[#allocation3 + $0x58] sm:$0xff]  ;;  %v754_v20 = vld [vmem:[#allocation3 + $0x10] sm:$0xff] }
   0xb   :  { %375 = vmatpush.bf16.msra.mxu1 %v766_v5  ;;  %v772_v14 = vld [vmem:[#allocation3 + $0xa0] sm:$0xff]  ;;  %v771_v18 = vld [vmem:[#allocation3 + $0x98] sm:$0xff]  ;;  %v762_v21 = vld [vmem:[#allocation3 + $0x50] sm:$0xff] }
   0xc   :  { %394 = vmatpush.bf16.msra.mxu2 %v774_v6  ;;  %v780_v15 = vld [vmem:[#allocation3 + $0xe0] sm:$0xff]  ;;  %v779_v19 = vld [vmem:[#allocation3 + $0xd8] sm:$0xff]  ;;  %v770_v22 = vld [vmem:[#allocation3 + $0x90] sm:$0xff] }
   0xd   :  { %413 = vmatpush.bf16.msra.mxu3 %v782_v7  ;;  %v778_v23 = vld [vmem:[#allocation3 + $0xd0] sm:$0xff]  ;;  %v753_v24 = vld [vmem:[#allocation3 + $0x8] sm:$0xff]  ;;  %v752_v28 = vld [vmem:[#allocation3] sm:$0xff] }
   0xe   :  { %357 = vmatpush.bf16.msra.mxu0 %v757_v8  ;;  %v761_v25 = vld [vmem:[#allocation3 + $0x48] sm:$0xff]  ;;  %v760_v29 = vld [vmem:[#allocation3 + $0x40] sm:$0xff]  ;;  %v746_v33 = vld [vmem:[%s968_s0 + $0xc] sm:$0xf0] }
   0xf   :  { %376 = vmatpush.bf16.msra.mxu1 %v765_v9  ;;  %v769_v26 = vld [vmem:[#allocation3 + $0x88] sm:$0xff]  ;;  %v768_v30 = vld [vmem:[#allocation3 + $0x80] sm:$0xff]  ;;  %v588_v35 = vld [vmem:[%s968_s0 + $0x10] sm:$0xf0] }
  0x10   :  { %395 = vmatpush.bf16.msra.mxu2 %v773_v10  ;;  %v777_v27 = vld [vmem:[#allocation3 + $0xc8] sm:$0xff]  ;;  %v776_v31 = vld [vmem:[#allocation3 + $0xc0] sm:$0xff]  ;;  %v747_v37 = vld [vmem:[%s968_s0 + $0x14] sm:$0xf0] }
  0x11   :  { %414 = vmatpush.bf16.msra.mxu3 %v781_v11  ;;  %v586_v32 = vld [vmem:[%s968_s0] sm:$0xf]  ;;  %v744_v34 = vld [vmem:[%s968_s0 + $0x4] sm:$0xf]  ;;  %v594_v36 = vld [vmem:[%s968_s0 + $0x8] sm:$0xf] }
  0x12   :  { %358 = vmatpush.bf16.msra.mxu0 %v756_v12  ;;  %v745_v38 = vld [vmem:[%s968_s0 + $0xc] sm:$0xf]  ;;  %v596_v39 = vld [vmem:[%s968_s0 + $0x18] sm:$0xf0]  ;;  %v587_v40 = vor.u32 %v746_v33, %v586_v32  ;;  %v591_v41 = vor.u32 %v744_v34, %v588_v35  ;;  %v595_v42 = vor.u32 %v747_v37, %v594_v36  ;;  %v602_v44 = vld [vmem:[%s968_s0 + $0x20] sm:$0xf]  ;;  %v482_v35 = vlaneseq }
  0x13   :  { %377 = vmatpush.bf16.msra.mxu1 %v764_v13  ;;  %v599_v43 = vor.u32 %v745_v38, %v596_v39  ;;  %v750_v45 = vld [vmem:[%s968_s0 + $0x2c] sm:$0xf0]  ;;  %v748_v46 = vld [vmem:[%s968_s0 + $0x24] sm:$0xf]  ;;  %v604_v47 = vld [vmem:[%s968_s0 + $0x30] sm:$0xf0] }
  0x14   :  { %396 = vmatpush.bf16.msra.mxu2 %v772_v14  ;;  %v610_v48 = vld [vmem:[%s968_s0 + $0x28] sm:$0xf]  ;;  %v751_v49 = vld [vmem:[%s968_s0 + $0x34] sm:$0xf0]  ;;  %v749_v50 = vld [vmem:[%s968_s0 + $0x2c] sm:$0xf]  ;;  %v603_v52 = vor.u32 %v750_v45, %v602_v44  ;;  %v607_v53 = vor.u32 %v748_v46, %v604_v47 }
  0x15   :  { %415 = vmatpush.bf16.msra.mxu3 %v780_v15  ;;  %v612_v51 = vld [vmem:[%s968_s0 + $0x38] sm:$0xf0]  ;;  %v611_v54 = vor.u32 %v751_v49, %v610_v48  ;;  %v785_v61 = vld [vmem:[%s971_s3] sm:$0xff]   ;;  %v483_v36 = vand.u32 127, %v482_v35 }
  0x16   :  { %359 = vmatpush.bf16.msra.mxu0 %v755_v16  ;;  %v615_v55 = vor.u32 %v749_v50, %v612_v51  ;;  %v807_v63 = vld [vmem:[%s970_s2] ss:$0 sm:$0xff]  ;;  %v786_v3 = vunpack.c.l.bf16 %v785_v61  ;;  %v787_v13 = vunpack.c.h.bf16 %v785_v61 }
  0x17   :  { %378 = vmatpush.bf16.msra.mxu1 %v763_v17  ;;  %vm484_vm0 = vcmp.lt.s32.totalorder %v483_v36, 32 }
  0x18   :  { %397 = vmatpush.bf16.msra.mxu2 %v771_v18 }
  0x19   :  { %416 = vmatpush.bf16.msra.mxu3 %v779_v19  ;;  %v802_v19 = vld [vmem:[%s971_s3 + $0x8] sm:$0xff]  }
  0x1a   :  { %360 = vmatpush.bf16.msra.mxu0 %v754_v20  ;;  %v791_v32 = vunpack.c.h.bf16 %v802_v19 }
  0x1b   :  { %379 = vmatpush.bf16.msra.mxu1 %v762_v21 }
  0x1c   :  { %398 = vmatpush.bf16.msra.mxu2 %v770_v22  ;;  %v790_v22 = vunpack.c.l.bf16 %v802_v19 }
  0x1d   :  { %417 = vmatpush.bf16.msra.mxu3 %v778_v23 }
  0x1e   :  { %361 = vmatpush.bf16.msra.mxu0 %v753_v24 }
  0x1f   :  { %380 = vmatpush.bf16.msra.mxu1 %v761_v25 }
  0x20   :  { %399 = vmatpush.bf16.msra.mxu2 %v769_v26 }
  0x21   :  { %418 = vmatpush.bf16.msra.mxu3 %v777_v27 }
  0x22   :  { %362 = vmatpush.bf16.msra.mxu0 %v752_v28 }
  0x23   :  { %381 = vmatpush.bf16.msra.mxu1 %v760_v29 }
  0x24   :  { %400 = vmatpush.bf16.msra.mxu2 %v768_v30 }
  0x25   :  { %419 = vmatpush.bf16.msra.mxu3 %v776_v31  ;;  %363 = vmatmul.bf16.vlgmr.msra.gmra.mxu0 %v587_v40 }
  0x26   :  { %382 = vmatmul.bf16.vlgmr.msra.gmra.mxu1 %v591_v41 }
  0x27   :  { %401 = vmatmul.bf16.vlgmr.msra.gmra.mxu2 %v595_v42 }
  0x28   :  { %420 = vmatmul.bf16.vlgmr.msra.gmra.mxu3 %v599_v43 }
  0x35   :  { %368 = vmatmul.bf16.gmra.mxu0 %v603_v52 }
  0x36   :  { %387 = vmatmul.bf16.gmra.mxu1 %v607_v53 }
  0x37   :  { %406 = vmatmul.bf16.gmra.mxu2 %v611_v54 }
  0x38   :  { %425 = vmatmul.bf16.gmra.mxu3 %v615_v55 }
  0xa2   :  { %v364_v56 = vpop.f32.mrf.mxu0 }
  0xa3   :  { %v383_v57 = vpop.f32.mrf.mxu1 }
  0xa4   :  { %v384_v58 = vadd.f32 %v383_v57, %v364_v56 }
  0xaa   :  { %v402_v59 = vpop.f32.mrf.mxu2  ;;  %v366_v0 = vpop.f32.mrf.mxu0 }
  0xab   :  { %v421_v60 = vpop.f32.mrf.mxu3  ;;  %v403_v62 = vadd.f32 %v402_v59, %v384_v58  ;;  %v385_v1 = vpop.f32.mrf.mxu1 }
  0xac   :  { %v386_v5 = vadd.f32 %v385_v1, %v366_v0 }
  0xad   :  { %v422_v2 = vadd.f32 %v421_v60, %v403_v62 }
  0xaf   :  { %v450_v4 = vadd.f32 %v807_v63, %v422_v2 }
  0xb1   :  { %v462_v6 = vadd.f32 %v786_v3, %v450_v4 }
  0xb2   :  { %v404_v7 = vpop.f32.mrf.mxu2  ;;  %v369_v10 = vpop.f32.mrf.mxu0 }
  0xb3   :  { %v423_v8 = vpop.f32.mrf.mxu3  ;;  %v405_v9 = vadd.f32 %v404_v7, %v386_v5  ;;  %466 = vadd.xlane.f32.xlu0 %v462_v6  ;;  %v388_v11 = vpop.f32.mrf.mxu1 }
  0xb4   :  { %v389_v15 = vadd.f32 %v388_v11, %v369_v10 }
  0xb5   :  { %v424_v12 = vadd.f32 %v423_v8, %v405_v9 }
  0xb7   :  { %v451_v14 = vadd.f32 %v807_v63, %v424_v12 }
  0xb9   :  { %v463_v16 = vadd.f32 %v787_v13, %v451_v14 }
  0xba   :  { %v407_v17 = vpop.f32.mrf.mxu2  ;;  %v371_v23 = vpop.f32.mrf.mxu0 }
  0xbb   :  { %v426_v18 = vpop.f32.mrf.mxu3  ;;  %v408_v20 = vadd.f32 %v407_v17, %v389_v15  ;;  %468 = vadd.xlane.f32.xlu0 %v463_v16  ;;  %v390_v24 = vpop.f32.mrf.mxu1  ;;  %v808_v17 = vld [vmem:[%s972_s4] ss:$0 sm:$0xff] }
  0xbc   :  { %v391_v26 = vadd.f32 %v390_v24, %v371_v23  ;;  %v809_v24 = vld [vmem:[%s973_s5] ss:$0 sm:$0xff] }
  0xbd   :  { %v427_v21 = vadd.f32 %v426_v18, %v408_v20 }
  0xbf   :  { %v452_v25 = vadd.f32 %v807_v63, %v427_v21 }
  0xc1   :  { %v464_v27 = vadd.f32 %v790_v22, %v452_v25 }
  0xc2   :  { %v409_v28 = vpop.f32.mrf.mxu2 }
  0xc3   :  { %v410_v29 = vadd.f32 %v409_v28, %v391_v26  ;;  %470 = vadd.xlane.f32.xlu1 %v464_v27  ;;  %v428_v30 = vpop.f32.mrf.mxu3 }
  0xc5   :  { %v429_v31 = vadd.f32 %v428_v30, %v410_v29 }
  0xc7   :  { %v453_v33 = vadd.f32 %v807_v63, %v429_v31 }
  0xc9   :  { %v465_v34 = vadd.f32 %v791_v32, %v453_v33 }
  0xcb   :  { %472 = vadd.xlane.f32.xlu1 %v465_v34 }
 0x126   :  { %v467_v37 = vpop.xlane.xlu0 %466 }
 0x127   :  { %v474_v38 = vmul.f32 0.03125, %v467_v37 }
 0x129   :  { %v478_v39 = vsub.f32 %v462_v6, %v474_v38 }
 0x12b   :  { %v487_v40 = vsel %vm484_vm0, %v478_v39, 0.0 }
 0x12c   :  { %v491_v41 = vmul.f32 %v487_v40, %v487_v40 }
 0x12e   :  { %495 = vadd.xlane.f32.xlu2 %v491_v41  ;;  %v469_v42 = vpop.xlane.xlu0 %468 }
 0x12f   :  { %v475_v43 = vmul.f32 0.03125, %v469_v42 }
 0x131   :  { %v479_v44 = vsub.f32 %v463_v16, %v475_v43 }
 0x133   :  { %v488_v45 = vsel %vm484_vm0, %v479_v44, 0.0 }
 0x134   :  { %v492_v46 = vmul.f32 %v488_v45, %v488_v45 }
 0x136   :  { %v471_v47 = vpop.xlane.xlu1 %470  ;;  %497 = vadd.xlane.f32.xlu2 %v492_v46 }
 0x137   :  { %v476_v48 = vmul.f32 0.03125, %v471_v47 }
 0x139   :  { %v480_v49 = vsub.f32 %v464_v27, %v476_v48 }
 0x13b   :  { %v945_v50 = vsel %vm484_vm0, %v480_v49, 0.0 }
 0x13c   :  { %v493_v51 = vmul.f32 %v945_v50, %v945_v50 }
 0x13e   :  { %v473_v52 = vpop.xlane.xlu1 %472  ;;  %499 = vadd.xlane.f32.xlu0 %v493_v51 }
 0x13f   :  { %v477_v53 = vmul.f32 0.03125, %v473_v52 }
 0x141   :  { %v481_v54 = vsub.f32 %v465_v34, %v477_v53 }
 0x143   :  { %v950_v55 = vsel %vm484_vm0, %v481_v54, 0.0 }
 0x144   :  { %v494_v56 = vmul.f32 %v950_v55, %v950_v55 }
 0x146   :  { %501 = vadd.xlane.f32.xlu1 %v494_v56 }
 0x1a1   :  { %v496_v57 = vpop.xlane.xlu2 %495 }
 0x1a2   :  { %v503_v58 = vmul.f32 0.03125, %v496_v57 }
 0x1a4   :  { %v507_v59 = vadd.f32 1e-05, %v503_v58 }
 0x1a6   :  { %810 = vrsqrt.f32 %v507_v59  ;;  %vm517_vm2 = vweird.f32 %v507_v59 }
 0x1a9   :  { %v498_v60 = vpop.xlane.xlu2 %497 }
 0x1aa   :  { %v504_v61 = vmul.f32 0.03125, %v498_v60 }
 0x1ac   :  { %v811_v62 = vpop.eup %810  ;;  %v508_v63 = vadd.f32 1e-05, %v504_v61 }
 0x1ad   :  { %v512_v0 = vmul.f32 %v811_v62, %v507_v59  ;;  %vm518_vm1 = vweird.f32 %v811_v62 }
 0x1ae   :  { %812 = vrsqrt.f32 %v508_v63  ;;  %vm519_vm3 = vmor %vm517_vm2, %vm518_vm1  ;;  %vm527_vm5 = vweird.f32 %v508_v63 }
 0x1af   :  { %v513_v1 = vmul.f32 %v811_v62, %v512_v0 }
 0x1b1   :  { %v514_v2 = vmul.f32 0.5, %v513_v1  ;;  %v500_v3 = vpop.xlane.xlu0 %499 }
 0x1b2   :  { %v505_v4 = vmul.f32 0.03125, %v500_v3 }
 0x1b3   :  { %v515_v5 = vsub.f32 1.5, %v514_v2 }
 0x1b4   :  { %v813_v6 = vpop.eup %812  ;;  %v509_v7 = vadd.f32 1e-05, %v505_v4 }
 0x1b5   :  { %v516_v8 = vmul.f32 %v811_v62, %v515_v5  ;;  %v522_v9 = vmul.f32 %v813_v6, %v508_v63  ;;  %vm528_vm4 = vweird.f32 %v813_v6 }
 0x1b6   :  { %814 = vrsqrt.f32 %v509_v7  ;;  %vm529_vm6 = vmor %vm527_vm5, %vm528_vm4  ;;  %vm537_vm8 = vweird.f32 %v509_v7 }
 0x1b7   :  { %v523_v10 = vmul.f32 %v813_v6, %v522_v9  ;;  %v520_v11 = vsel %vm519_vm3, %v811_v62, %v516_v8 }
 0x1b8   :  { %v551_v18 = vmul.f32 %v520_v11, %v487_v40 }
 0x1b9   :  { %v524_v12 = vmul.f32 0.5, %v523_v10  ;;  %v502_v13 = vpop.xlane.xlu1 %501 }
 0x1ba   :  { %v506_v14 = vmul.f32 0.03125, %v502_v13  ;;  %v559_v25 = vmul.f32 %v808_v17, %v551_v18 }
 0x1bb   :  { %v525_v15 = vsub.f32 1.5, %v524_v12 }
 0x1bc   :  { %v815_v16 = vpop.eup %814  ;;  %v510_v19 = vadd.f32 1e-05, %v506_v14  ;;  %v567_v31 = vadd.f32 %v809_v24, %v559_v25 }
 0x1bd   :  { %v526_v20 = vmul.f32 %v813_v6, %v525_v15  ;;  %v532_v21 = vmul.f32 %v815_v16, %v509_v7  ;;  %vm538_vm7 = vweird.f32 %v815_v16 }
 0x1be   :  { %816 = vrsqrt.f32 %v510_v19  ;;  %vm539_vm9 = vmor %vm537_vm8, %vm538_vm7  ;;  %vm547_vm11 = vweird.f32 %v510_v19 }
 0x1bf   :  { %v530_v22 = vsel %vm529_vm6, %v813_v6, %v526_v20  ;;  %v533_v23 = vmul.f32 %v815_v16, %v532_v21 }
 0x1c0   :  { %v552_v26 = vmul.f32 %v530_v22, %v488_v45 }
 0x1c1   :  { %v534_v27 = vmul.f32 0.5, %v533_v23 }
 0x1c2   :  { %v560_v28 = vmul.f32 %v808_v17, %v552_v26 }
 0x1c3   :  { %v535_v29 = vsub.f32 1.5, %v534_v27 }
 0x1c4   :  { %v817_v30 = vpop.eup %816  ;;  %v568_v32 = vadd.f32 %v809_v24, %v560_v28 }
 0x1c5   :  { %v536_v33 = vmul.f32 %v815_v16, %v535_v29  ;;  %v542_v34 = vmul.f32 %v817_v30, %v510_v19  ;;  %vm548_vm10 = vweird.f32 %v817_v30 }
 0x1c6   :  { %v795_v35 = vpack.c.bf16 %v568_v32, %v567_v31  ;;  %vm549_vm12 = vmor %vm547_vm11, %vm548_vm10 }
 0x1c7   :  { %v543_v36 = vmul.f32 %v817_v30, %v542_v34  ;;  %v540_v37 = vsel %vm539_vm9, %v815_v16, %v536_v33 }
 0x1c8   :  { %796 = vst [vmem:[%s974_s6] sm:$0xff] %v795_v35   ;;  %v553_v40 = vmul.f32 %v540_v37, %v945_v50 }
 0x1c9   :  { %v544_v38 = vmul.f32 0.5, %v543_v36 }
 0x1ca   :  { %v561_v43 = vmul.f32 %v808_v17, %v553_v40 }
 0x1cb   :  { %v545_v39 = vsub.f32 1.5, %v544_v38 }
 0x1cc   :  { %v569_v46 = vadd.f32 %v809_v24, %v561_v43 }
 0x1cd   :  { %v546_v41 = vmul.f32 %v817_v30, %v545_v39 }
 0x1cf   :  { %v550_v42 = vsel %vm549_vm12, %v817_v30, %v546_v41 }
 0x1d0   :  { %v554_v44 = vmul.f32 %v550_v42, %v950_v55 }
 0x1d2   :  { %v562_v45 = vmul.f32 %v808_v17, %v554_v44 }
 0x1d4   :  { %v570_v47 = vadd.f32 %v809_v24, %v562_v45 }
 0x1d6   :  { %v800_v48 = vpack.c.bf16 %v570_v47, %v569_v46 }
 0x1d8   :  { %803 = vst [vmem:[%s974_s6 + $0x8] sm:$0xff] %v800_v48  }
 0x1d9   :  { %583 = vsyncpa [#allocation4], 1 }

// kernel: decoder_forward.20
= control target key start
LH: loop header
LB: loop body
LE: loop exit
PB: predicated region body
PF: predicated region fallthrough
CT: control target
= control target key end

     0   :  { %8 = vsyncpa [#allocation4], 0  ;;  %s647_s15 = smov [#allocation3]   ;;  %s648_s17 = smov 256   ;;  %s706_s0 = inlined_call_operand.vmem [shape: bf16[32,128], index: 0, kind: input, shape index: {}]   ;;  %s707_s1 = inlined_call_operand.hbm [shape: bf16[128,512], index: 1, kind: input, shape index: {}]   ;;  %s708_s2 = inlined_call_operand.vmem [shape: f32[1,512], index: 2, kind: input, shape index: {}]   ;;  %s709_s3 = inlined_call_operand.vmem [shape: bf16[32,512], index: 3, kind: output, shape index: {}]  }
   0x1   :  { %s15_s14 = sshll.u32 %s707_s1, 4  ;;  %s17_s16 = sshll.u32 %s647_s15, 4  ;;  %s16_s14 = int_to_ptr.hbm [resolvable:$true] %s15_s14  ;;  %s18_s16 = int_to_ptr.vmem [resolvable:$true] %s17_s16 }
   0x2   :  { %s649_s18 = smov 16  }
   0x3   :  { %23 = dma.hbm_to_vmem [thread:$0]  %s16_s14, 4096, %s18_s16, [#allocation4], %s648_s17, %s648_s17, %s649_s18  }
   0x4   :  { %645 = dma.done.wait [#allocation4], 4096  }
   0x5   :  { %646 = vsyncadd [#allocation4], 4294963200  ;;  %v570_v0 = vld [vmem:[#allocation3 + $0xe0] sm:$0xf]  ;;  %v616_v1 = vld [vmem:[#allocation3 + $0xec] sm:$0xf0] }
   0x6   :  { %v614_v2 = vld [vmem:[#allocation3 + $0xe4] sm:$0xf]  ;;  %v571_v3 = vor.u32 %v616_v1, %v570_v0  ;;  %v572_v4 = vld [vmem:[#allocation3 + $0xf0] sm:$0xf0]  ;;  %v578_v5 = vld [vmem:[#allocation3 + $0xe8] sm:$0xf] }
   0x7   :  { %v617_v6 = vld [vmem:[#allocation3 + $0xf4] sm:$0xf0]  ;;  %v575_v7 = vor.u32 %v614_v2, %v572_v4  ;;  %v615_v9 = vld [vmem:[#allocation3 + $0xec] sm:$0xf]  ;;  %v580_v10 = vld [vmem:[#allocation3 + $0xf8] sm:$0xf0] }
   0x8   :  { %v579_v8 = vor.u32 %v617_v6, %v578_v5  ;;  %v554_v11 = vld [vmem:[#allocation3 + $0xc0] sm:$0xf]  ;;  %274 = vmatpush.bf16.msra.mxu0 %v571_v3  ;;  %v583_v12 = vor.u32 %v615_v9, %v580_v10  ;;  %v612_v13 = vld [vmem:[#allocation3 + $0xcc] sm:$0xf0]  ;;  %v610_v14 = vld [vmem:[#allocation3 + $0xc4] sm:$0xf] }
   0x9   :  { %v556_v15 = vld [vmem:[#allocation3 + $0xd0] sm:$0xf0]  ;;  %293 = vmatpush.bf16.msra.mxu1 %v575_v7  ;;  %v555_v16 = vor.u32 %v612_v13, %v554_v11  ;;  %v562_v18 = vld [vmem:[#allocation3 + $0xc8] sm:$0xf]  ;;  %v613_v19 = vld [vmem:[#allocation3 + $0xd4] sm:$0xf0] }
   0xa   :  { %312 = vmatpush.bf16.msra.mxu2 %v579_v8  ;;  %v559_v17 = vor.u32 %v610_v14, %v556_v15  ;;  %v611_v20 = vld [vmem:[#allocation3 + $0xcc] sm:$0xf]  ;;  %331 = vmatpush.bf16.msra.mxu3 %v583_v12  ;;  %v563_v21 = vor.u32 %v613_v19, %v562_v18  ;;  %v564_v22 = vld [vmem:[#allocation3 + $0xd8] sm:$0xf0]  ;;  %v538_v23 = vld [vmem:[#allocation3 + $0xa0] sm:$0xf] }
   0xb   :  { %v608_v24 = vld [vmem:[#allocation3 + $0xac] sm:$0xf0]  ;;  %v567_v25 = vor.u32 %v611_v20, %v564_v22  ;;  %v606_v26 = vld [vmem:[#allocation3 + $0xa4] sm:$0xf]  ;;  %v540_v27 = vld [vmem:[#allocation3 + $0xb0] sm:$0xf0] }
   0xc   :  { %v546_v28 = vld [vmem:[#allocation3 + $0xa8] sm:$0xf]  ;;  %275 = vmatpush.bf16.msra.mxu0 %v555_v16  ;;  %v539_v29 = vor.u32 %v608_v24, %v538_v23  ;;  %v609_v30 = vld [vmem:[#allocation3 + $0xb4] sm:$0xf0]  ;;  %v607_v31 = vld [vmem:[#allocation3 + $0xac] sm:$0xf]  ;;  %v543_v33 = vor.u32 %v606_v26, %v540_v27 }
   0xd   :  { %v548_v32 = vld [vmem:[#allocation3 + $0xb8] sm:$0xf0]  ;;  %294 = vmatpush.bf16.msra.mxu1 %v559_v17  ;;  %v547_v34 = vor.u32 %v609_v30, %v546_v28  ;;  %v522_v35 = vld [vmem:[#allocation3 + $0x80] sm:$0xf]  ;;  %v604_v36 = vld [vmem:[#allocation3 + $0x8c] sm:$0xf0] }
   0xe   :  { %313 = vmatpush.bf16.msra.mxu2 %v563_v21  ;;  %v602_v37 = vld [vmem:[#allocation3 + $0x84] sm:$0xf]  ;;  %332 = vmatpush.bf16.msra.mxu3 %v567_v25  ;;  %v551_v38 = vor.u32 %v607_v31, %v548_v32  ;;  %v524_v39 = vld [vmem:[#allocation3 + $0x90] sm:$0xf0]  ;;  %v530_v40 = vld [vmem:[#allocation3 + $0x88] sm:$0xf]  ;;  %v523_v44 = vor.u32 %v604_v36, %v522_v35 }
   0xf   :  { %v605_v41 = vld [vmem:[#allocation3 + $0x94] sm:$0xf0]  ;;  %v603_v42 = vld [vmem:[#allocation3 + $0x8c] sm:$0xf]  ;;  %v532_v43 = vld [vmem:[#allocation3 + $0x98] sm:$0xf0]  ;;  %v527_v45 = vor.u32 %v602_v37, %v524_v39 }
  0x10   :  { %276 = vmatpush.bf16.msra.mxu0 %v539_v29  ;;  %v531_v46 = vor.u32 %v605_v41, %v530_v40  ;;  %v506_v47 = vld [vmem:[#allocation3 + $0x60] sm:$0xf]  ;;  %v600_v48 = vld [vmem:[#allocation3 + $0x6c] sm:$0xf0]  ;;  %v598_v49 = vld [vmem:[#allocation3 + $0x64] sm:$0xf]  ;;  %v535_v50 = vor.u32 %v603_v42, %v532_v43 }
  0x11   :  { %295 = vmatpush.bf16.msra.mxu1 %v543_v33  ;;  %v508_v51 = vld [vmem:[#allocation3 + $0x70] sm:$0xf0]  ;;  %v514_v52 = vld [vmem:[#allocation3 + $0x68] sm:$0xf]  ;;  %v601_v53 = vld [vmem:[#allocation3 + $0x74] sm:$0xf0]  ;;  %v507_v56 = vor.u32 %v600_v48, %v506_v47 }
  0x12   :  { %314 = vmatpush.bf16.msra.mxu2 %v547_v34  ;;  %333 = vmatpush.bf16.msra.mxu3 %v551_v38  ;;  %v599_v54 = vld [vmem:[#allocation3 + $0x6c] sm:$0xf]  ;;  %v516_v55 = vld [vmem:[#allocation3 + $0x78] sm:$0xf0]  ;;  %v511_v57 = vor.u32 %v598_v49, %v508_v51  ;;  %v515_v58 = vor.u32 %v601_v53, %v514_v52  ;;  %v490_v59 = vld [vmem:[#allocation3 + $0x40] sm:$0xf] }
  0x13   :  { %v596_v60 = vld [vmem:[#allocation3 + $0x4c] sm:$0xf0]  ;;  %v594_v61 = vld [vmem:[#allocation3 + $0x44] sm:$0xf]  ;;  %v519_v62 = vor.u32 %v599_v54, %v516_v55  ;;  %v492_v63 = vld [vmem:[#allocation3 + $0x50] sm:$0xf0] }
  0x14   :  { %277 = vmatpush.bf16.msra.mxu0 %v523_v44  ;;  %v498_v0 = vld [vmem:[#allocation3 + $0x48] sm:$0xf]  ;;  %v597_v1 = vld [vmem:[#allocation3 + $0x54] sm:$0xf0]  ;;  %v595_v2 = vld [vmem:[#allocation3 + $0x4c] sm:$0xf]  ;;  %v491_v4 = vor.u32 %v596_v60, %v490_v59  ;;  %v495_v5 = vor.u32 %v594_v61, %v492_v63 }
  0x15   :  { %296 = vmatpush.bf16.msra.mxu1 %v527_v45  ;;  %v500_v3 = vld [vmem:[#allocation3 + $0x58] sm:$0xf0]  ;;  %v499_v6 = vor.u32 %v597_v1, %v498_v0  ;;  %v474_v7 = vld [vmem:[#allocation3 + $0x20] sm:$0xf]  ;;  %v592_v8 = vld [vmem:[#allocation3 + $0x2c] sm:$0xf0] }
  0x16   :  { %315 = vmatpush.bf16.msra.mxu2 %v531_v46  ;;  %334 = vmatpush.bf16.msra.mxu3 %v535_v50  ;;  %v590_v9 = vld [vmem:[#allocation3 + $0x24] sm:$0xf]  ;;  %v503_v10 = vor.u32 %v595_v2, %v500_v3  ;;  %v476_v11 = vld [vmem:[#allocation3 + $0x30] sm:$0xf0]  ;;  %v482_v12 = vld [vmem:[#allocation3 + $0x28] sm:$0xf]  ;;  %v475_v16 = vor.u32 %v592_v8, %v474_v7 }
  0x17   :  { %v593_v13 = vld [vmem:[#allocation3 + $0x34] sm:$0xf0]  ;;  %v591_v14 = vld [vmem:[#allocation3 + $0x2c] sm:$0xf]  ;;  %v484_v15 = vld [vmem:[#allocation3 + $0x38] sm:$0xf0]  ;;  %v479_v17 = vor.u32 %v590_v9, %v476_v11 }
  0x18   :  { %278 = vmatpush.bf16.msra.mxu0 %v507_v56  ;;  %v483_v18 = vor.u32 %v593_v13, %v482_v12  ;;  %v458_v19 = vld [vmem:[#allocation3] sm:$0xf]  ;;  %v588_v20 = vld [vmem:[#allocation3 + $0xc] sm:$0xf0]  ;;  %v586_v21 = vld [vmem:[#allocation3 + $0x4] sm:$0xf]  ;;  %v487_v22 = vor.u32 %v591_v14, %v484_v15 }
  0x19   :  { %297 = vmatpush.bf16.msra.mxu1 %v511_v57  ;;  %v460_v23 = vld [vmem:[#allocation3 + $0x10] sm:$0xf0]  ;;  %v466_v24 = vld [vmem:[#allocation3 + $0x8] sm:$0xf]  ;;  %v589_v25 = vld [vmem:[#allocation3 + $0x14] sm:$0xf0]  ;;  %v459_v28 = vor.u32 %v588_v20, %v458_v19 }
  0x1a   :  { %316 = vmatpush.bf16.msra.mxu2 %v515_v58  ;;  %335 = vmatpush.bf16.msra.mxu3 %v519_v62  ;;  %v587_v26 = vld [vmem:[#allocation3 + $0xc] sm:$0xf]  ;;  %v468_v27 = vld [vmem:[#allocation3 + $0x18] sm:$0xf0]  ;;  %v463_v29 = vor.u32 %v586_v21, %v460_v23  ;;  %v467_v30 = vor.u32 %v589_v25, %v466_v24  ;;  %v584_v32 = vld [vmem:[%s706_s0] sm:$0xff] }
  0x1b   :  { %v471_v31 = vor.u32 %v587_v26, %v468_v27  ;;  %v585_v33 = vld [vmem:[%s706_s0 + $0x8] sm:$0xff]  ;;  %v401_v34 = vld [vmem:[%s708_s2] sm:$0xf] }
  0x1c   :  { %279 = vmatpush.bf16.msra.mxu0 %v491_v4  ;;  %v403_v35 = vperm.slane %v401_v34, 0  ;;  %v404_v36 = vperm.slane %v401_v34, 1  ;;  %v405_v42 = vperm.slane %v401_v34, 2  ;;  %v406_v43 = vperm.slane %v401_v34, 3 }
  0x1d   :  { %298 = vmatpush.bf16.msra.mxu1 %v495_v5 }
  0x1e   :  { %317 = vmatpush.bf16.msra.mxu2 %v499_v6  ;;  %336 = vmatpush.bf16.msra.mxu3 %v503_v10 }
  0x20   :  { %280 = vmatpush.bf16.msra.mxu0 %v475_v16 }
  0x21   :  { %299 = vmatpush.bf16.msra.mxu1 %v479_v17 }
  0x22   :  { %318 = vmatpush.bf16.msra.mxu2 %v483_v18  ;;  %337 = vmatpush.bf16.msra.mxu3 %v487_v22 }
  0x24   :  { %281 = vmatpush.bf16.msra.mxu0 %v459_v28 }
  0x25   :  { %300 = vmatpush.bf16.msra.mxu1 %v463_v29 }
  0x26   :  { %319 = vmatpush.bf16.msra.mxu2 %v467_v30  ;;  %338 = vmatpush.bf16.msra.mxu3 %v471_v31 }
  0x27   :  { %282 = vmatmul.bf16.vlgmr.msra.gmra.mxu0 %v584_v32 }
  0x28   :  { %301 = vmatmul.bf16.vlgmr.msra.gmra.mxu1 %v584_v32 }
  0x29   :  { %320 = vmatmul.bf16.vlgmr.msra.gmra.mxu2 %v584_v32  ;;  %339 = vmatmul.bf16.vlgmr.msra.gmra.mxu3 %v584_v32 }
  0x37   :  { %287 = vmatmul.bf16.gmra.mxu0 %v585_v33 }
  0x38   :  { %306 = vmatmul.bf16.gmra.mxu1 %v585_v33 }
  0x39   :  { %325 = vmatmul.bf16.gmra.mxu2 %v585_v33  ;;  %344 = vmatmul.bf16.gmra.mxu3 %v585_v33 }
  0xa4   :  { %v283_v37 = vpop.f32.mrf.mxu0 }
  0xa5   :  { %v411_v38 = vadd.f32 %v403_v35, %v283_v37  ;;  %v302_v39 = vpop.f32.mrf.mxu1 }
  0xa6   :  { %v412_v40 = vadd.f32 %v404_v36, %v302_v39 }
  0xa8   :  { %v427_v41 = vpack.c.bf16 %v412_v40, %v411_v38 }
  0xaa   :  { %435 = vst [vmem:[%s709_s3] sm:$0xff] %v427_v41 }
  0xac   :  { %v321_v44 = vpop.f32.mrf.mxu2  ;;  %v340_v46 = vpop.f32.mrf.mxu3 }
  0xad   :  { %v413_v45 = vadd.f32 %v405_v42, %v321_v44  ;;  %v285_v47 = vpop.f32.mrf.mxu0  ;;  %v414_v48 = vadd.f32 %v406_v43, %v340_v46  ;;  %v304_v50 = vpop.f32.mrf.mxu1 }
  0xae   :  { %v415_v49 = vadd.f32 %v403_v35, %v285_v47  ;;  %v416_v51 = vadd.f32 %v404_v36, %v304_v50 }
  0xaf   :  { %v428_v52 = vpack.c.bf16 %v414_v48, %v413_v45 }
  0xb0   :  { %v429_v53 = vpack.c.bf16 %v416_v51, %v415_v49 }
  0xb1   :  { %436 = vst [vmem:[%s709_s3 + $0x8] sm:$0xff] %v428_v52 }
  0xb2   :  { %437 = vst [vmem:[%s709_s3 + $0x10] sm:$0xff] %v429_v53 }
  0xb4   :  { %v323_v54 = vpop.f32.mrf.mxu2  ;;  %v342_v56 = vpop.f32.mrf.mxu3 }
  0xb5   :  { %v417_v55 = vadd.f32 %v405_v42, %v323_v54  ;;  %v288_v57 = vpop.f32.mrf.mxu0  ;;  %v418_v58 = vadd.f32 %v406_v43, %v342_v56  ;;  %v307_v60 = vpop.f32.mrf.mxu1 }
  0xb6   :  { %v419_v59 = vadd.f32 %v403_v35, %v288_v57  ;;  %v420_v61 = vadd.f32 %v404_v36, %v307_v60 }
  0xb7   :  { %v430_v62 = vpack.c.bf16 %v418_v58, %v417_v55 }
  0xb8   :  { %v431_v63 = vpack.c.bf16 %v420_v61, %v419_v59 }
  0xb9   :  { %438 = vst [vmem:[%s709_s3 + $0x18] sm:$0xff] %v430_v62 }
  0xba   :  { %439 = vst [vmem:[%s709_s3 + $0x20] sm:$0xff] %v431_v63 }
  0xbc   :  { %v326_v0 = vpop.f32.mrf.mxu2  ;;  %v345_v2 = vpop.f32.mrf.mxu3 }
  0xbd   :  { %v421_v1 = vadd.f32 %v405_v42, %v326_v0  ;;  %v290_v3 = vpop.f32.mrf.mxu0  ;;  %v422_v4 = vadd.f32 %v406_v43, %v345_v2  ;;  %v309_v6 = vpop.f32.mrf.mxu1 }
  0xbe   :  { %v423_v5 = vadd.f32 %v403_v35, %v290_v3  ;;  %v424_v7 = vadd.f32 %v404_v36, %v309_v6 }
  0xbf   :  { %v432_v8 = vpack.c.bf16 %v422_v4, %v421_v1 }
  0xc0   :  { %v433_v9 = vpack.c.bf16 %v424_v7, %v423_v5 }
  0xc1   :  { %440 = vst [vmem:[%s709_s3 + $0x28] sm:$0xff] %v432_v8 }
  0xc2   :  { %441 = vst [vmem:[%s709_s3 + $0x30] sm:$0xff] %v433_v9 }
  0xc4   :  { %v328_v10 = vpop.f32.mrf.mxu2  ;;  %v347_v12 = vpop.f32.mrf.mxu3 }
  0xc5   :  { %v425_v11 = vadd.f32 %v405_v42, %v328_v10  ;;  %v426_v13 = vadd.f32 %v406_v43, %v347_v12 }
  0xc7   :  { %v434_v14 = vpack.c.bf16 %v426_v13, %v425_v11 }
  0xc9   :  { %442 = vst [vmem:[%s709_s3 + $0x38] sm:$0xff] %v434_v14 }
  0xca   :  { %447 = vsyncpa [#allocation4], 1 }

// kernel: decoder_forward.21
= control target key start
LH: loop header
LB: loop body
LE: loop exit
PB: predicated region body
PF: predicated region fallthrough
CT: control target
= control target key end

     0   :  { %s1244_s0 = inlined_call_operand.vmem [shape: bf16[2,16,512], index: 0, kind: input, shape index: {}]   ;;  %s1245_s1 = inlined_call_operand.vmem [shape: bf16[2,16,2048], index: 1, kind: input, shape index: {}, may-alias: {1,2}]   ;;  %s1246_s2 = inlined_call_operand.vmem [shape: bf16[2,16,2048], index: 2, kind: input, shape index: {}, may-alias: {1,2}]   ;;  %s1247_s3 = inlined_call_operand.vmem [shape: bf16[2,16,512], index: 3, kind: output, shape index: {}]  }
   0x1   :  { %1250 = sst [smem:[#allocation12_spill]] %s1247_s3 }
   0x2   :  { %s1037_s12 = smov 0   ;;  %s1039_s13 = smov 0  }
   0x3   :  { %s1041_s14 = smov 0   ;;  %s1043_s15 = smov 0  }
   0x4   :  { %s1045_s16 = smov 0   ;;  %s1047_s17 = smov 0  }
   0x5   :  { %s1049_s18 = smov 0   ;;  %s1051_s19 = smov 0  }
   0x6   :  { %s1053_s20 = smov 0   ;;  %s1055_s21 = smov 0  }
   0x7   :  { %s1057_s22 = smov 0  }
   0x8 LB: > { %s35_s24 = sadd.s32 1, %s1003_s20  ;;  %s39_s25 = sadd.s32 1, %s1007_s21  ;;  %s1011_s22 = sphi %s1057_s22, %s13_s22   ;;  %s1007_s21 = sphi %s1055_s21, %s1272_s21   ;;  %s1003_s20 = sphi %s1053_s20, %s1271_s20   ;;  %s999_s19 = sphi %s1051_s19, %s1270_s19   ;;  %s995_s18 = sphi %s1049_s18, %s1269_s18   ;;  %s991_s17 = sphi %s1047_s17, %s1268_s17   ;;  %s987_s16 = sphi %s1045_s16, %s1267_s16   ;;  %s983_s15 = sphi %s1043_s15, %s1266_s15   ;;  %s979_s14 = sphi %s1041_s14, %s1265_s14   ;;  %s975_s13 = sphi %s1039_s13, %s1264_s13   ;;  %s971_s12 = sphi %s1037_s12, %s1263_s12  }
   0x9   : > { %p37_p0 = scmp.ge.s32.totalorder %s35_s24, 4  ;;  %s50_s26 = sadd.s32 1, %s991_s17 }
   0xa   : > { %p57_p1 = scmp.ne.s32.totalorder %s991_s17, %s987_s16  ;;  %p58_p2 = scmp.eq.s32.totalorder %s1011_s22, 0 }
   0xb   : > { %s1274_s24 = smov (%p37_p0, %s35_s24), 0  ;;  %s1276_s25 = smov (!%p37_p0, %s39_s25), %s1007_s21 }
   0xc   : > { %1251 = sst [smem:[#allocation9_spill]] %s1274_s24  ;;  %s46_s27 = ssub.s32 %s1003_s20, %s1274_s24 }
   0xd   : > { %p41_p3 = scmp.ge.s32.totalorder %s1276_s25, 2  ;;  %s73_s28 = sadd.s32 8, %s1003_s20 }
   0xe   : > { %p1110_p4 = por %p58_p2, %p57_p1  ;;  %s74_s30 = sadd.s32 8, %s1274_s24 }
   0xf   : > { %s1278_s25 = smov (%p41_p3, %s1276_s25), 0  ;;  %s78_s4 = ssub.s32 %s73_s28, %s74_s30 }
  0x10   : > { %1253 = sst [smem:[#allocation10_spill]] %s1278_s25  ;;  %s82_s5 = sadd.s32 1, %s983_s15 }
  0x11   : > { %s43_s6 = ssub.s32 %s1007_s21, %s1278_s25  ;;  %p89_p5 = scmp.ne.s32.totalorder %s983_s15, %s979_s14 }
  0x12   : > { %s47_s7 = sor.u32 %s46_s27, %s43_s6  ;;  %s79_s8 = sor.u32 %s78_s4, %s43_s6 }
  0x13   : > { %p48_p6 = scmp.eq.s32.totalorder %s47_s7, 0  ;;  %p80_p7 = scmp.eq.s32.totalorder %s79_s8, 0 }
  0x14   : > { %p1124_p8 = por %p89_p5, %p58_p2  ;;  %s105_s10 = sadd.s32 12, %s1003_s20 }
  0x15   : > { %s1130_s11 = scalar_select %p48_p6, %s991_s17, %s50_s26  }
  0x16   : > { %s1133_s28 = scalar_select %p80_p7, %s983_s15, %s82_s5  }
  0x17   : > { %1255 = sst [smem:[#allocation11_spill]] %s1130_s11  ;;  %s106_s30 = sadd.s32 12, %s1274_s24 }
  0x18   : > { %s114_s23 = sadd.s32 1, %s975_s13  ;;  %s110_s25 = ssub.s32 %s105_s10, %s106_s30 }
  0x19   : > { %p121_p9 = scmp.ne.s32.totalorder %s975_s13, %s971_s12  ;;  %s111_s27 = sor.u32 %s110_s25, %s43_s6 }
  0x1a   : > { %s1256_s3 = sadd.s32 4294967295, %s1011_s22   ;;  %p112_p11 = scmp.eq.s32.totalorder %s111_s27, 0 }
  0x1b   : > { %p155_p10 = scmp.eq.s32.totalorder %s1256_s3, 7  ;;  %p1143_p12 = por %p121_p9, %p58_p2 }
  0x1c   : > { %s1155_s26 = scalar_select %p112_p11, %s975_s13, %s114_s23  }
  0x1d   : > { %p1150_p13 = por %p155_p10, %p57_p1  ;;  %p773_p0 = scmp.ge.s32.totalorder %s1011_s22, 8 }
  0x1f   : > { %177 = sbr.rel (%p773_p0) target bundleno = 60 (0x3c), region = 16 }
  0x24   : > { %180 = sbr.rel (!%p1110_p4) target bundleno = 44 (0x2c), region = 20  ;;  %s182_s3 = sand.u32 (%p1110_p4), 1, %s991_s17  }
  0x25   : > { %s775_s25 = sshll.u32 (%p1110_p4), %s1007_s21, 3  ;;  %s774_s5 = sshll.u32 (%p1110_p4), %s182_s3, 3 }
  0x26   : > { %s189_s6 = sadd.s32 (%p1110_p4), %s1003_s20, %s775_s25  ;;  %s184_s23 = scalar_lea.vmem (%p1110_p4), [#allocation5], %s774_s5 }
  0x27   : > { %s776_s8 = sshll.u32 (%p1110_p4), %s189_s6, 2 }
  0x28   : > { %s191_s27 = scalar_lea.vmem (%p1110_p4), %s1244_s0, %s776_s8 }
  0x29   : > { %v208_v0 = vld [vmem:[%s191_s27] sm:$0xf]  ;;  %v210_v1 = vld [vmem:[%s191_s27 + $0x10] sm:$0xf] }
  0x2a   : > { %209 = vst [vmem:[%s184_s23] sm:$0xf] %v208_v0 }
  0x2b   : > { %211 = vst [vmem:[%s184_s23 + $0x4] sm:$0xf] %v210_v1 }
  0x2c PF: > { %239 = sbr.rel (!%p1124_p8) target bundleno = 52 (0x34), region = 61  ;;  %s241_s29 = sand.u32 (%p1124_p8), 1, %s983_s15  }
  0x2d   : > { %s778_s3 = sshll.u32 (%p1124_p8), %s1007_s21, 5  ;;  %s777_s25 = sshll.u32 (%p1124_p8), %s241_s29, 3 }
  0x2e   : > { %s667_s6 = sadd.s32 (%p1124_p8), %s1003_s20, %s778_s3  ;;  %s243_s5 = scalar_lea.vmem (%p1124_p8), [#allocation6], %s777_s25 }
  0x2f   : > { %s779_s24 = sshll.u32 (%p1124_p8), %s667_s6, 2 }
  0x30   : > { %s669_s8 = scalar_lea.vmem (%p1124_p8), %s1245_s1, %s779_s24 }
  0x31   : > { %v780_v2 = vld [vmem:[%s669_s8 + $0x20] sm:$0xf] }
  0x32   : > { %v781_v3 = vld [vmem:[%s669_s8 + $0x60] sm:$0xf]  ;;  %269 = vst [vmem:[%s243_s5] sm:$0xf] %v780_v2 }
  0x33   : > { %271 = vst [vmem:[%s243_s5 + $0x4] sm:$0xf] %v781_v3 }
  0x34 PF: > { %299 = sbr.rel (!%p1143_p12) target bundleno = 60 (0x3c), region = 102  ;;  %s301_s9 = sand.u32 (%p1143_p12), 1, %s975_s13  }
  0x35   : > { %s783_s30 = sshll.u32 (%p1143_p12), %s1007_s21, 5  ;;  %s782_s27 = sshll.u32 (%p1143_p12), %s301_s9, 3 }
  0x36   : > { %s676_s23 = sadd.s32 (%p1143_p12), %s1003_s20, %s783_s30  ;;  %s303_s25 = scalar_lea.vmem (%p1143_p12), [#allocation7], %s782_s27 }
  0x37   : > { %s784_s29 = sshll.u32 (%p1143_p12), %s676_s23, 2 }
  0x38   : > { %s678_s24 = scalar_lea.vmem (%p1143_p12), %s1246_s2, %s784_s29 }
  0x39   : > { %v785_v4 = vld [vmem:[%s678_s24 + $0x30] sm:$0xf] }
  0x3a   : > { %v786_v5 = vld [vmem:[%s678_s24 + $0x70] sm:$0xf]  ;;  %329 = vst [vmem:[%s303_s25] sm:$0xf] %v785_v4 }
  0x3b   : > { %331 = vst [vmem:[%s303_s25 + $0x4] sm:$0xf] %v786_v5 }
  0x3c PF: > { %p787_p1 = scmp.ge.s32.totalorder %s1011_s22, 1  ;;  %p358_p2 = scmp.lt.s32.totalorder %s1011_s22, 9 }
  0x3e   : > { %p359_p3 = pnand %p787_p1, %p358_p2 }
  0x3f   : > { %s372_s4 = sand.u32 (!%p359_p3), 1, %s979_s14   ;;  %s365_s6 = sand.u32 (!%p359_p3), 1, %s987_s16  }
  0x40   : > { %362 = sbr.rel (%p359_p3) target bundleno = 721 (0x2d1), region = 143  ;;  %s789_s10 = sshll.u32 (!%p359_p3), %s372_s4, 3 }
  0x41   : > { %s1186_s8 = sshll.u32 (!%p359_p3), %s365_s6, 3  ;;  %s374_s5 = scalar_lea.vmem (!%p359_p3), [#allocation6], %s789_s10 }
  0x42   : > { %s367_s9 = scalar_lea.vmem (!%p359_p3), [#allocation5], %s1186_s8  ;;  %s379_s14 = sand.u32 (!%p359_p3), 1, %s971_s12  }
  0x43   : > { %s790_s16 = sshll.u32 (!%p359_p3), %s379_s14, 3  ;;  %s408_s12 = scalar_lea.vmem (!%p359_p3), [#allocation8], %s1186_s8 }
  0x44   : > { %s381_s30 = scalar_lea.vmem (!%p359_p3), [#allocation7], %s790_s16 }
  0x45   : > { %v811_v6 = vld [vmem:[%s374_s5] sm:$0xff]  ;;  %v810_v7 = vld [vmem:[%s367_s9] sm:$0xff]  ;;  %vm420_vm0 = vcmask 7168   ;;  %v1013_v8 = vmov -inf   ;;  %v434_v9 = vlaneseq  ;;  %v1014_v11 = vmov -1e+30  }
  0x46   : > { %459 = vmatpush.bf16.xpose.msra.mxu0 %v811_v6  ;;  %421 = vst.msk [vmem:[#allocation2] sm:$0xff] %vm420_vm0, %v1013_v8  ;;  %vm468_vm2 = vcmask 130048   ;;  %v1015_v19 = vmov 0   ;;  %v1016_v20 = vmov 0.0   ;;  %v812_v33 = vld [vmem:[%s381_s30] sm:$0xff]  ;;  %s806_s27 = sshll.u32 (%p1150_p13), %s999_s19, 3 }
  0x47   : > { %422 = vst.msk [vmem:[#allocation2 + $0x8] sm:$0xff] %vm420_vm0, %v1013_v8  ;;  %v435_v10 = vand.u32 127, %v434_v9  ;;  %910 = vset.pattern.permute.xlu1 %v1015_v19  ;;  %911 = vset.pattern.permute.xlu0 %v1015_v19  ;;  %s594_s23 = sadd.s32 (%p1150_p13), %s995_s18, %s806_s27  ;;  %s1259_s24 = sld [smem:[#allocation12_spill]] (%p1150_p13) }
  0x48   : > { %912 = vset.pattern.permute.xlu2 %v1015_v19  ;;  %423 = vst.msk [vmem:[#allocation3] sm:$0xff] %vm420_vm0, %v1016_v20  ;;  %545 = vmatpush.bf16.msra.mxu1 %v812_v33  ;;  %s807_s29 = sshll.u32 (%p1150_p13), %s594_s23, 2 }
  0x49   : > { %vm438_vm1 = vcmp.lt.s32.totalorder %v435_v10, 10  ;;  %424 = vst.msk [vmem:[#allocation3 + $0x8] sm:$0xff] %vm420_vm0, %v1016_v20 }
  0x4a   : > { %v439_v12 = vsel %vm438_vm1, 0.0, %v1014_v11 }
  0x4d   : > { %460 = vmatmul.bf16.vlgmr.msra.gmra.mxu0 %v810_v7  ;;  %v466_v21 = vld [vmem:[#allocation2] sm:$0xff]  ;;  %s596_s25 = scalar_lea.vmem (%p1150_p13), %s1259_s24, %s807_s29 }
  0x4e   : > { %v467_v26 = vld [vmem:[#allocation2 + $0x8] sm:$0xff] }
  0x4f   : > { %v499_v45 = vld [vmem:[#allocation3] sm:$0xff] }
  0x50   : > { %v500_v49 = vld [vmem:[#allocation3 + $0x8] sm:$0xff] }
  0xca   : > { %v461_v13 = vpop.f32.mrf.mxu0 }
  0xcb   : > { %v462_v14 = vadd.f32 %v461_v13, %v439_v12 }
  0xcd   : > { %v469_v15 = vsel %vm468_vm2, %v462_v14, -inf }
  0xce   : > { %470 = vmax.xlane.f32.xlu0 %v469_v15 }
  0xd2   : > { %v463_v16 = vpop.f32.mrf.mxu0 }
  0xd3   : > { %v464_v17 = vadd.f32 %v463_v16, %v439_v12 }
  0xd5   : > { %v472_v18 = vsel %vm468_vm2, %v464_v17, -inf }
  0xd6   : > { %473 = vmax.xlane.f32.xlu0 %v472_v18 }
 0x141   : > { %v471_v22 = vpop.xlane.xlu0 %470 }
 0x142   : > { %v475_v23 = vmax.f32 %v466_v21, %v471_v22 }
 0x144   : > { %v477_v24 = vsub.f32 %v466_v21, %v475_v23  ;;  %556 = vst.msk [vmem:[#allocation2] sm:$0xff] %vm420_vm0, %v475_v23  ;;  %485 = vperm.xlu1 %910, %v475_v23  }
 0x146   : > { %v479_v25 = vmul.f32 1.442695, %v477_v24 }
 0x148   : > { %913 = vpow2.f32 %v479_v25 }
 0x149   : > { %v474_v27 = vpop.xlane.xlu0 %473 }
 0x14a   : > { %v476_v28 = vmax.f32 %v467_v26, %v474_v27 }
 0x14c   : > { %v478_v29 = vsub.f32 %v467_v26, %v476_v28  ;;  %557 = vst.msk [vmem:[#allocation2 + $0x8] sm:$0xff] %vm420_vm0, %v476_v28  ;;  %490 = vperm.xlu1 %910, %v476_v28  }
 0x14e   : > { %v914_v30 = vpop.eup %913  ;;  %v481_v31 = vmul.f32 1.442695, %v478_v29 }
 0x14f   : > { %518 = vperm.xlu0 %911, %v914_v30   ;;  %v501_v46 = vmul.f32 %v914_v30, %v499_v45 }
 0x150   : > { %915 = vpow2.f32 %v481_v31 }
 0x156   : > { %v916_v32 = vpop.eup %915 }
 0x157   : > { %523 = vperm.xlu1 %910, %v916_v32   ;;  %v502_v50 = vmul.f32 %v916_v32, %v500_v49 }
 0x1b6   : > { %v486_v34 = vpop.permute.xlu1 %485 }
 0x1b7   : > { %v493_v35 = vsub.f32 %v462_v14, %v486_v34 }
 0x1b9   : > { %v495_v36 = vmul.f32 1.442695, %v493_v35 }
 0x1bb   : > { %917 = vpow2.f32 %v495_v36 }
 0x1be   : > { %v491_v37 = vpop.permute.xlu1 %490 }
 0x1bf   : > { %v494_v38 = vsub.f32 %v464_v17, %v491_v37 }
 0x1c1   : > { %v918_v39 = vpop.eup %917  ;;  %v497_v40 = vmul.f32 1.442695, %v494_v38  ;;  %v519_v59 = vpop.permute.xlu0 %518 }
 0x1c2   : > { %v503_v41 = vsel %vm468_vm2, %v918_v39, 0.0  ;;  %v526_v61 = vmul.f32 0.0, %v519_v59 }
 0x1c3   : > { %919 = vpow2.f32 %v497_v40  ;;  %504 = vadd.xlane.f32.xlu2 %v503_v41 }
 0x1c9   : > { %v920_v42 = vpop.eup %919  ;;  %v524_v58 = vpop.permute.xlu1 %523 }
 0x1ca   : > { %v506_v43 = vsel %vm468_vm2, %v920_v42, 0.0  ;;  %v528_v44 = vpack.c.bf16 %v920_v42, %v918_v39  ;;  %v527_v62 = vmul.f32 0.0, %v524_v58 }
 0x1cb   : > { %507 = vadd.xlane.f32.xlu2 %v506_v43 }
 0x1cc   : > { %804 = vmatmul.msk.bf16.vlgmr.msra.gmra.mxu1 %vm468_vm2, %v528_v44 }
 0x236   : > { %v505_v47 = vpop.xlane.xlu2 %504 }
 0x237   : > { %v509_v48 = vadd.f32 %v505_v47, %v501_v46 }
 0x239   : > { %512 = vst.msk [vmem:[#allocation3] sm:$0xff] %vm420_vm0, %v509_v48 }
 0x23e   : > { %v508_v51 = vpop.xlane.xlu2 %507 }
 0x23f   : > { %v510_v52 = vadd.f32 %v508_v51, %v502_v50 }
 0x240   : > { %v563_v53 = vld [vmem:[#allocation3] sm:$0xff] }
 0x241   : > { %513 = vst.msk [vmem:[#allocation3 + $0x8] sm:$0xff] %vm420_vm0, %v510_v52  ;;  %921 = vrcp.f32 %v563_v53 }
 0x247   : > { %v922_v54 = vpop.eup %921 }
 0x248   : > { %569 = vperm.xlu2 %912, %v922_v54   ;;  %v564_v55 = vld [vmem:[#allocation3 + $0x8] sm:$0xff] }
 0x249   : > { %923 = vrcp.f32 %v564_v55  ;;  %v547_v57 = vpop.f32.mrf.mxu1 }
 0x24a   : > { %v552_v0 = vadd.f32 %v547_v57, %v526_v61 }
 0x24f   : > { %v924_v56 = vpop.eup %923 }
 0x250   : > { %574 = vperm.xlu1 %910, %v924_v56  }
 0x251   : > { %v549_v60 = vpop.f32.mrf.mxu1 }
 0x252   : > { %v553_v1 = vadd.f32 %v549_v60, %v527_v62 }
 0x2a2   : > { %v570_v63 = vpop.permute.xlu2 %569 }
 0x2a3   : > { %v577_v3 = vmul.f32 %v570_v63, %v552_v0 }
 0x2c2   : > { %v575_v2 = vpop.permute.xlu1 %574 }
 0x2c3   : > { %v578_v4 = vmul.f32 %v575_v2, %v553_v1  ;;  %589 = sbr.rel (!%p1150_p13) target bundleno = 721 (0x2d1), region = 167 }
 0x2c5   : > { %v816_v5 = vpack.c.bf16 %v578_v4, %v577_v3 }
 0x2c7   : > { %817 = vst [vmem:[%s408_s12] sm:$0xff] %v816_v5  }
 0x2ce   : > { %v613_v6 = vld [vmem:[%s408_s12] sm:$0xf]  ;;  %v615_v7 = vld [vmem:[%s408_s12 + $0x4] sm:$0xf] }
 0x2cf   : > { %614 = vst [vmem:[%s596_s25] sm:$0xf] %v613_v6 }
 0x2d0   : > { %616 = vst [vmem:[%s596_s25 + $0x10] sm:$0xf] %v615_v7 }
 0x2d1 PF: > { %s13_s22 = sadd.s32 1, %s1011_s22   ;;  %s1260_s18 = sld [smem:[#allocation11_spill]] }
 0x2d2   : > { %p10_p4 = scmp.ge.s32.totalorder %s13_s22, 10   ;;  %s1261_s7 = sld [smem:[#allocation9_spill]] }
 0x2d3   : > { %s1262_s4 = sld [smem:[#allocation10_spill]]  ;;  %s1263_s12 = smov %s975_s13 }
 0x2d4   : > { %s1264_s13 = smov %s1155_s26  ;;  %s1265_s14 = smov %s983_s15 }
 0x2d5   : > { %s1266_s15 = smov %s1133_s28  ;;  %s1267_s16 = smov %s991_s17 }
 0x2d6   : > { %s1270_s19 = smov %s1007_s21  ;;  %12 = sbr.rel (!%p10_p4) target bundleno = 8 (0x8), region = 255 }
 0x2d7   : > { %s1268_s17 = smov %s1260_s18  ;;  %s1269_s18 = smov %s1003_s20 }
 0x2d8   : > { %s1271_s20 = smov %s1261_s7 }
 0x2d9   : > { %s1272_s21 = smov %s1262_s4 }

// kernel: decoder_forward.23
= control target key start
LH: loop header
LB: loop body
LE: loop exit
PB: predicated region body
PF: predicated region fallthrough
CT: control target
= control target key end

     0   :  { %8 = vsyncpa [#allocation4], 0  ;;  %s280_s15 = smov [#allocation3]   ;;  %s281_s17 = smov 64   ;;  %s321_s0 = inlined_call_operand.vmem [shape: bf16[32,128], index: 0, kind: input, shape index: {}]   ;;  %s322_s1 = inlined_call_operand.hbm [shape: bf16[128,128], index: 1, kind: input, shape index: {}]   ;;  %s323_s2 = inlined_call_operand.vmem [shape: f32[1,128], index: 2, kind: input, shape index: {}]   ;;  %s324_s3 = inlined_call_operand.vmem [shape: bf16[32,128], index: 3, kind: output, shape index: {}]  }
   0x1   :  { %s15_s14 = sshll.u32 %s322_s1, 4  ;;  %s17_s16 = sshll.u32 %s280_s15, 4  ;;  %s16_s14 = int_to_ptr.hbm [resolvable:$true] %s15_s14  ;;  %s18_s16 = int_to_ptr.vmem [resolvable:$true] %s17_s16 }
   0x2   :  { %s282_s18 = smov 4  }
   0x3   :  { %23 = dma.hbm_to_vmem [thread:$0]  %s16_s14, 1024, %s18_s16, [#allocation4], %s281_s17, %s281_s17, %s282_s18  }
   0x4   :  { %278 = dma.done.wait [#allocation4], 1024  }
   0x5   :  { %279 = vsyncadd [#allocation4], 4294966272  ;;  %v230_v0 = vld [vmem:[#allocation3 + $0x38] sm:$0xff]  ;;  %v229_v1 = vld [vmem:[#allocation3 + $0x30] sm:$0xff] }
   0x6   :  { %122 = vmatpush.bf16.msra.mxu0 %v230_v0  ;;  %242 = vmatpush.bf16.msra.mxu1 %v230_v0  ;;  %v228_v2 = vld [vmem:[#allocation3 + $0x28] sm:$0xff]  ;;  %v227_v3 = vld [vmem:[#allocation3 + $0x20] sm:$0xff]  ;;  %v226_v4 = vld [vmem:[#allocation3 + $0x18] sm:$0xff] }
   0x7   :  { %v225_v5 = vld [vmem:[#allocation3 + $0x10] sm:$0xff]  ;;  %v224_v6 = vld [vmem:[#allocation3 + $0x8] sm:$0xff]  ;;  %v223_v7 = vld [vmem:[#allocation3] sm:$0xff] }
   0x8   :  { %v221_v8 = vld [vmem:[%s321_s0] sm:$0xff]  ;;  %v222_v9 = vld [vmem:[%s321_s0 + $0x8] sm:$0xff] }
   0x9   :  { %v253_v12 = vld [vmem:[%s323_s2] ss:$0 sm:$0xff] }
   0xa   :  { %123 = vmatpush.bf16.msra.mxu0 %v229_v1  ;;  %243 = vmatpush.bf16.msra.mxu1 %v229_v1 }
   0xe   :  { %124 = vmatpush.bf16.msra.mxu0 %v228_v2  ;;  %244 = vmatpush.bf16.msra.mxu1 %v228_v2 }
  0x12   :  { %125 = vmatpush.bf16.msra.mxu0 %v227_v3  ;;  %245 = vmatpush.bf16.msra.mxu1 %v227_v3 }
  0x16   :  { %126 = vmatpush.bf16.msra.mxu0 %v226_v4  ;;  %246 = vmatpush.bf16.msra.mxu1 %v226_v4 }
  0x1a   :  { %127 = vmatpush.bf16.msra.mxu0 %v225_v5  ;;  %247 = vmatpush.bf16.msra.mxu1 %v225_v5 }
  0x1e   :  { %128 = vmatpush.bf16.msra.mxu0 %v224_v6  ;;  %248 = vmatpush.bf16.msra.mxu1 %v224_v6 }
  0x22   :  { %129 = vmatpush.bf16.msra.mxu0 %v223_v7  ;;  %249 = vmatpush.bf16.msra.mxu1 %v223_v7 }
  0x25   :  { %130 = vmatmul.bf16.vlgmr.msra.gmra.mxu0 %v221_v8  ;;  %135 = vmatmul.bf16.vlgmr.msra.gmra.mxu1 %v222_v9 }
  0xa2   :  { %v131_v10 = vpop.f32.mrf.mxu0  ;;  %v136_v11 = vpop.f32.mrf.mxu1 }
  0xa3   :  { %v160_v13 = vadd.f32 %v253_v12, %v131_v10  ;;  %v162_v14 = vadd.f32 %v253_v12, %v136_v11 }
  0xa5   :  { %v164_v19 = vmax.f32 %v160_v13, 0.0  ;;  %v166_v20 = vmax.f32 %v162_v14, 0.0 }
  0xaa   :  { %v133_v15 = vpop.f32.mrf.mxu0  ;;  %v138_v16 = vpop.f32.mrf.mxu1 }
  0xab   :  { %v161_v17 = vadd.f32 %v253_v12, %v133_v15  ;;  %v163_v18 = vadd.f32 %v253_v12, %v138_v16 }
  0xad   :  { %v165_v21 = vmax.f32 %v161_v17, 0.0  ;;  %v167_v22 = vmax.f32 %v163_v18, 0.0 }
  0xaf   :  { %v234_v23 = vpack.c.bf16 %v165_v21, %v164_v19  ;;  %v239_v24 = vpack.c.bf16 %v167_v22, %v166_v20 }
  0xb1   :  { %235 = vst [vmem:[%s324_s3] sm:$0xff] %v234_v23  }
  0xb2   :  { %241 = vst [vmem:[%s324_s3 + $0x8] sm:$0xff] %v239_v24  }
  0xb3   :  { %180 = vsyncpa [#allocation4], 1 }

// kernel: decoder_forward.25
= control target key start
LH: loop header
LB: loop body
LE: loop exit
PB: predicated region body
PF: predicated region fallthrough
CT: control target
= control target key end

     0   :  { %8 = vsyncpa [#allocation4], 0  ;;  %s276_s15 = smov [#allocation3]   ;;  %s277_s17 = smov 64   ;;  %s317_s0 = inlined_call_operand.vmem [shape: bf16[32,128], index: 0, kind: input, shape index: {}]   ;;  %s318_s1 = inlined_call_operand.hbm [shape: bf16[128,128], index: 1, kind: input, shape index: {}]   ;;  %s319_s2 = inlined_call_operand.vmem [shape: f32[1,128], index: 2, kind: input, shape index: {}]   ;;  %s320_s3 = inlined_call_operand.vmem [shape: bf16[32,128], index: 3, kind: output, shape index: {}]  }
   0x1   :  { %s15_s14 = sshll.u32 %s318_s1, 4  ;;  %s17_s16 = sshll.u32 %s276_s15, 4  ;;  %s16_s14 = int_to_ptr.hbm [resolvable:$true] %s15_s14  ;;  %s18_s16 = int_to_ptr.vmem [resolvable:$true] %s17_s16 }
   0x2   :  { %s278_s18 = smov 4  }
   0x3   :  { %23 = dma.hbm_to_vmem [thread:$0]  %s16_s14, 1024, %s18_s16, [#allocation4], %s277_s17, %s277_s17, %s278_s18  }
   0x4   :  { %274 = dma.done.wait [#allocation4], 1024  }
   0x5   :  { %275 = vsyncadd [#allocation4], 4294966272  ;;  %v226_v0 = vld [vmem:[#allocation3 + $0x38] sm:$0xff]  ;;  %v225_v1 = vld [vmem:[#allocation3 + $0x30] sm:$0xff] }
   0x6   :  { %122 = vmatpush.bf16.msra.mxu0 %v226_v0  ;;  %238 = vmatpush.bf16.msra.mxu1 %v226_v0  ;;  %v224_v2 = vld [vmem:[#allocation3 + $0x28] sm:$0xff]  ;;  %v223_v3 = vld [vmem:[#allocation3 + $0x20] sm:$0xff]  ;;  %v222_v4 = vld [vmem:[#allocation3 + $0x18] sm:$0xff] }
   0x7   :  { %v221_v5 = vld [vmem:[#allocation3 + $0x10] sm:$0xff]  ;;  %v220_v6 = vld [vmem:[#allocation3 + $0x8] sm:$0xff]  ;;  %v219_v7 = vld [vmem:[#allocation3] sm:$0xff] }
   0x8   :  { %v217_v8 = vld [vmem:[%s317_s0] sm:$0xff]  ;;  %v218_v9 = vld [vmem:[%s317_s0 + $0x8] sm:$0xff] }
   0x9   :  { %v249_v12 = vld [vmem:[%s319_s2] ss:$0 sm:$0xff] }
   0xa   :  { %123 = vmatpush.bf16.msra.mxu0 %v225_v1  ;;  %239 = vmatpush.bf16.msra.mxu1 %v225_v1 }
   0xe   :  { %124 = vmatpush.bf16.msra.mxu0 %v224_v2  ;;  %240 = vmatpush.bf16.msra.mxu1 %v224_v2 }
  0x12   :  { %125 = vmatpush.bf16.msra.mxu0 %v223_v3  ;;  %241 = vmatpush.bf16.msra.mxu1 %v223_v3 }
  0x16   :  { %126 = vmatpush.bf16.msra.mxu0 %v222_v4  ;;  %242 = vmatpush.bf16.msra.mxu1 %v222_v4 }
  0x1a   :  { %127 = vmatpush.bf16.msra.mxu0 %v221_v5  ;;  %243 = vmatpush.bf16.msra.mxu1 %v221_v5 }
  0x1e   :  { %128 = vmatpush.bf16.msra.mxu0 %v220_v6  ;;  %244 = vmatpush.bf16.msra.mxu1 %v220_v6 }
  0x22   :  { %129 = vmatpush.bf16.msra.mxu0 %v219_v7  ;;  %245 = vmatpush.bf16.msra.mxu1 %v219_v7 }
  0x25   :  { %130 = vmatmul.bf16.vlgmr.msra.gmra.mxu0 %v217_v8  ;;  %135 = vmatmul.bf16.vlgmr.msra.gmra.mxu1 %v218_v9 }
  0xa2   :  { %v131_v10 = vpop.f32.mrf.mxu0  ;;  %v136_v11 = vpop.f32.mrf.mxu1 }
  0xa3   :  { %v160_v15 = vadd.f32 %v249_v12, %v131_v10  ;;  %v162_v16 = vadd.f32 %v249_v12, %v136_v11 }
  0xaa   :  { %v133_v13 = vpop.f32.mrf.mxu0  ;;  %v138_v14 = vpop.f32.mrf.mxu1 }
  0xab   :  { %v161_v17 = vadd.f32 %v249_v12, %v133_v13  ;;  %v163_v18 = vadd.f32 %v249_v12, %v138_v14 }
  0xad   :  { %v230_v19 = vpack.c.bf16 %v161_v17, %v160_v15  ;;  %v235_v20 = vpack.c.bf16 %v163_v18, %v162_v16 }
  0xaf   :  { %231 = vst [vmem:[%s320_s3] sm:$0xff] %v230_v19  }
  0xb0   :  { %237 = vst [vmem:[%s320_s3 + $0x8] sm:$0xff] %v235_v20  }
  0xb1   :  { %176 = vsyncpa [#allocation4], 1 }

</bundles_post_ra>
